<compile_context>
chip_gen: v6e
topology: v6e:2x2x1
jax: 0.10.0
libtpu: 0.0.40
codegen_flags: <defaults>
</compile_context>

<pallas_src>
import functools

import jax
import jax.numpy as jnp
import numpy as np
from jax.experimental import pallas as pl
from jax.experimental.pallas import tpu as pltpu

NEG_SLOPE = 0.2

_BLUR3 = np.array([[1., 2., 1.], [2., 4., 2.], [1., 2., 1.]], np.float32) / 16.0


def _lrelu(x):
    return jnp.where(x > 0, x, NEG_SLOPE * x)


# ---------------------------------------------------------------------------
# Host-side construction of the structured operator matrices (run once,
# outside the kernel).  Only the conv-weight dependent parts are traceable jnp.
# ---------------------------------------------------------------------------

def _shift_mat(h, s):
    """(h, h) matrix M with (M @ x)[i] = x[i + s], zero outside [0, h)."""
    m = np.zeros((h, h), np.float32)
    for i in range(h):
        j = i + s
        if 0 <= j < h:
            m[i, j] = 1.0
    return m


def _band_pattern(w, dx):
    """(w, w) pattern T with T[w_in, w_out] = 1 iff w_in == w_out + dx - 1."""
    t = np.zeros((w, w), np.float32)
    for wo in range(w):
        wi = wo + dx - 1
        if 0 <= wi < w:
            t[wi, wo] = 1.0
    return t


def _pool_rows(h):
    """(h//2, h) matrix averaging row pairs (2i, 2i+1) with weight 0.5 each."""
    r = np.zeros((h // 2, h), np.float32)
    for i in range(h // 2):
        r[i, 2 * i] = 0.5
        r[i, 2 * i + 1] = 0.5
    return r


def _shift_stack(n, h):
    """(2, n*h, n*h): block-diagonal row-shift operators for the dy=0 / dy=2 taps."""
    eye_n = np.eye(n, dtype=np.float32)
    return jnp.asarray(np.stack([np.kron(eye_n, _shift_mat(h, -1)),
                                 np.kron(eye_n, _shift_mat(h, +1))], axis=0))


def _conv_rights(w3, w):
    """w3: (3, 3, cin, cout) -> (3, w*cin, w*cout) banded conv matrices (per dy).
    Zero padding along the width axis is encoded by dropping out-of-range taps."""
    mats = []
    for dy in range(3):
        b = None
        for dx in range(3):
            t = jnp.kron(jnp.asarray(_band_pattern(w, dx)), w3[dy, dx])
            b = t if b is None else b + t
        mats.append(b)
    return jnp.stack(mats, axis=0)


def _blur_rights(w, c):
    """(3, w*c, w*c) banded depthwise blur ([[1,2,1],[2,4,2],[1,2,1]]/16, pad 1)."""
    eye_c = np.eye(c, dtype=np.float32)
    mats = []
    for dy in range(3):
        b = np.zeros((w * c, w * c), np.float32)
        for dx in range(3):
            b += _BLUR3[dy, dx] * np.kron(_band_pattern(w, dx), eye_c)
        mats.append(b)
    return jnp.asarray(np.stack(mats, axis=0))


def _convpool_lefts(n, h):
    """(3, n*(h//2), n*h): row shift (per dy) composed with the stride-2 row pool."""
    r = _pool_rows(h)
    eye_n = np.eye(n, dtype=np.float32)
    mats = [np.kron(eye_n, r @ _shift_mat(h, dy - 1)) for dy in range(3)]
    return jnp.asarray(np.stack(mats, axis=0))


def _convpool_rights(w3, w):
    """(3, w*cin, (w//2)*cout): banded conv (per dy) composed with stride-2 w-pool."""
    cout = w3.shape[3]
    wo = w // 2
    q = np.zeros((w, wo), np.float32)
    for i in range(wo):
        q[2 * i, i] = 1.0
        q[2 * i + 1, i] = 1.0
    pw = jnp.asarray(0.5 * np.kron(q, np.eye(cout, dtype=np.float32)))
    mats = []
    for dy in range(3):
        b = None
        for dx in range(3):
            t = jnp.kron(jnp.asarray(_band_pattern(w, dx)), w3[dy, dx])
            b = t if b is None else b + t
        mats.append(jnp.dot(b, pw))
    return jnp.stack(mats, axis=0)


def pack_operands(params, batch, height, width):
    """Fold padding, conv taps, blurs, the stride-2 downsample and the NCHW
    flatten order into dense matmul operands for the fused kernel."""
    nb = len(params["blocks"])
    assert height == width == 7 * (2 ** nb), (
        "spatial size must be 7 * 2**nb_blocks so the final feature map is 7x7")
    n, h, w = batch, height, width

    ops = []
    w0, b0 = params["init_conv"]                                  # (cin,c0), (c0,)
    ops.append(jnp.kron(jnp.eye(w, dtype=jnp.float32), w0))       # (w*cin, w*c0)
    ops.append(jnp.tile(b0, w)[None, :])

    for (w1, b1, w2, b2) in params["blocks"]:
        c = w1.shape[2]
        ops.append(_shift_stack(n, h))                            # (2, n*h, n*h)
        ops.append(_conv_rights(w1, w))                           # (3, w*c, w*c)
        ops.append(jnp.tile(b1, w)[None, :])
        ops.append(_blur_rights(w, c))                            # (3, w*c, w*c)
        ops.append(_convpool_lefts(n, h))                         # (3, n*h/2, n*h)
        ops.append(_convpool_rights(w2, w))                       # (3, w*c, (w/2)*2c)
        ops.append(jnp.tile(b2, w // 2)[None, :])
        h, w = h // 2, w // 2

    wf, bf = params["final_conv"]
    cf = wf.shape[3]
    ops.append(_shift_stack(n, h))
    ops.append(_conv_rights(wf, w))
    ops.append(jnp.tile(bf, w)[None, :])

    # fc1 weight rows permuted offline from the PyTorch x.view(N,-1) order
    # (c, h, w) to the kernel's slab contraction; no activation transpose needed.
    w1f, b1f = params["fc1"]                                      # ((cf*h*w), cf), (cf,)
    w2f, b2f = params["fc2"]                                      # (cf, 1), (1,)
    vbig = jnp.transpose(w1f.reshape(cf, h, w, cf), (2, 0, 1, 3)).reshape(w * cf, h * cf)
    ops.append(vbig)                                              # (w*cf, h*cf)
    ops.append(jnp.asarray(np.kron(np.ones((n, 1), np.float32),
                                   np.kron(np.eye(h, dtype=np.float32),
                                           np.ones((1, cf), np.float32)))))   # mask
    ops.append(jnp.asarray(np.kron(np.ones((h, 1), np.float32),
                                   np.eye(cf, dtype=np.float32))))            # ksum
    ops.append(jnp.asarray(np.kron(np.eye(n, dtype=np.float32),
                                   np.ones((1, h), np.float32))))             # gsum
    ops.append(b1f[None, :])
    ops.append(jnp.reshape(w2f, (1, -1)))                         # (1, cf)
    ops.append(b2f[None, :])                                      # (1, 1)
    return ops


# --------------------------------------------------------------- kernel ----

def _dot(a, b):
    return jnp.dot(a, b, preferred_element_type=jnp.float32)


def _conv_slab(x, ls_ref, r_ref):
    """Stride-1 3x3 conv / blur on a slab: x@R1 + (S_-1 x)@R0 + (S_+1 x)@R2."""
    acc = _dot(x, r_ref[1])                       # dy = 1 (no row shift)
    acc = acc + _dot(_dot(ls_ref[0], x), r_ref[0])  # dy = 0
    acc = acc + _dot(_dot(ls_ref[1], x), r_ref[2])  # dy = 2
    return acc


def _conv_pool_slab(x, l_ref, r_ref):
    """3x3 conv fused with the 2x2 stride-2 average blur: sum_dy (L_dy x)@R_dy."""
    acc = _dot(_dot(l_ref[0], x), r_ref[0])
    acc = acc + _dot(_dot(l_ref[1], x), r_ref[1])
    acc = acc + _dot(_dot(l_ref[2], x), r_ref[2])
    return acc


def _fused_kernel(*args, nb_blocks):
    refs = args[:-1]
    o_ref = args[-1]
    idx = 0

    def take(k):
        nonlocal idx
        out = refs[idx:idx + k]
        idx += k
        return out

    (x_ref, w0_ref, b0_ref) = take(3)
    block_refs = [take(7) for _ in range(nb_blocks)]
    (lsf_ref, fr_ref, fb_ref) = take(3)
    (v_ref, m_ref, ks_ref, gs_ref, b1_ref, w2_ref, b2_ref) = take(7)

    # init 1x1 conv: block-diagonal weight, K = W * img_channels
    a = _dot(x_ref[...], w0_ref[...]) + b0_ref[...]

    for (ls, c1r, c1b, blr, cpl, cpr, cpb) in block_refs:
        a = _lrelu(_conv_slab(a, ls, c1r) + c1b[...])        # Conv3x3 + LeakyReLU
        a = _conv_slab(a, ls, blr)                           # BlurLayer 3x3
        a = _lrelu(_conv_pool_slab(a, cpl, cpr) + cpb[...])  # Conv3x3 (+) 2x2/s2 blur, LeakyReLU

    a = _lrelu(_conv_slab(a, lsf_ref, fr_ref) + fb_ref[...])  # final conv + LeakyReLU

    # fc1 over the NCHW-flattened features (weights permuted offline); mask /
    # ksum / gsum realize the per-row h-diagonal select + per-sample sum.
    r = _dot(a, v_ref[...]) * m_ref[...]
    z = _dot(_dot(gs_ref[...], r), ks_ref[...]) + b1_ref[...]
    z = _lrelu(z)
    # fc2 (16 -> 1) on the VPU: broadcast multiply + lane reduction.
    y = jnp.sum(z * w2_ref[...], axis=1, keepdims=True) + b2_ref[...]
    o_ref[...] = y.astype(o_ref.dtype)


def fused_apply(ops, x_nchw):
    """Single-pallas_call forward.  `ops` comes from pack_operands(params, N, H, W)."""
    n, c, h, w = x_nchw.shape
    x_slab = jnp.transpose(x_nchw.astype(jnp.float32), (0, 2, 3, 1)).reshape(n * h, w * c)
    nb_blocks = (len(ops) - 12) // 7
    inputs = [x_slab] + list(ops)
    vmem = pl.BlockSpec(memory_space=pltpu.MemorySpace.VMEM)
    return pl.pallas_call(
        functools.partial(_fused_kernel, nb_blocks=nb_blocks),
        out_shape=jax.ShapeDtypeStruct((n, 1), jnp.float32),
        in_specs=[vmem] * len(inputs),
        out_specs=vmem,
    )(*inputs)


def discriminator_forward(params, x_nchw):
    """Convenience wrapper: fold weights, then run the fused kernel."""
    n, _, h, w = x_nchw.shape
    return fused_apply(pack_operands(params, n, h, w), x_nchw)


# ------------------------------------------------------- params / reference ----

def init_params(key, img_channel, start_channel, nb_blocks=2):
    keys = iter(jax.random.split(key, 4 + 2 * nb_blocks))

    def w_init(k, shape, fan_in):
        return (1.0 / np.sqrt(fan_in)) * jax.random.normal(k, shape, jnp.float32)

    params = {"init_conv": (w_init(next(keys), (img_channel, start_channel), img_channel),
                            0.01 * jnp.ones((start_channel,), jnp.float32))}
    blocks = []
    for i in range(nb_blocks):
        ch = (2 ** i) * start_channel
        blocks.append((w_init(next(keys), (3, 3, ch, ch), 9 * ch),
                       0.01 * jnp.ones((ch,), jnp.float32),
                       w_init(next(keys), (3, 3, ch, 2 * ch), 9 * ch),
                       0.01 * jnp.ones((2 * ch,), jnp.float32)))
    params["blocks"] = blocks

    chf = (2 ** nb_blocks) * start_channel
    params["final_conv"] = (w_init(next(keys), (3, 3, chf, chf), 9 * chf),
                            0.01 * jnp.ones((chf,), jnp.float32))
    feat = chf * 7 * 7
    params["fc1"] = (w_init(next(keys), (feat, chf), feat),     # rows in (c, h, w) order
                     0.01 * jnp.ones((chf,), jnp.float32))
    params["fc2"] = (w_init(next(keys), (chf, 1), chf),
                     0.01 * jnp.ones((1,), jnp.float32))
    return params


# Plain-JAX (non-Pallas) reference, used only for a structural self-check.
def _ref_conv3x3(x, w, b):
    n, h, wd, _ = x.shape
    xp = jnp.pad(x, ((0, 0), (1, 1), (1, 1), (0, 0)))
    acc = jnp.zeros((n, h, wd, w.shape[3]), jnp.float32)
    for dy in range(3):
        for dx in range(3):
            acc = acc + jnp.einsum('nhwc,cd->nhwd', xp[:, dy:dy + h, dx:dx + wd, :], w[dy, dx])
    return acc + b


def _ref_blur3(x):
    n, h, wd, _ = x.shape
    xp = jnp.pad(x, ((0, 0), (1, 1), (1, 1), (0, 0)))
    acc = jnp.zeros_like(x)
    for dy in range(3):
        for dx in range(3):
            acc = acc + _BLUR3[dy, dx] * xp[:, dy:dy + h, dx:dx + wd, :]
    return acc


def _ref_pool2(x):
    return 0.25 * (x[:, 0::2, 0::2, :] + x[:, 0::2, 1::2, :]
                   + x[:, 1::2, 0::2, :] + x[:, 1::2, 1::2, :])


def reference_forward(params, x_nchw):
    x = jnp.transpose(x_nchw.astype(jnp.float32), (0, 2, 3, 1))
    w0, b0 = params["init_conv"]
    x = jnp.einsum('nhwc,cd->nhwd', x, w0) + b0
    for (w1, b1, w2, b2) in params["blocks"]:
        x = _lrelu(_ref_conv3x3(x, w1, b1))
        x = _ref_blur3(x)
        x = _lrelu(_ref_pool2(_ref_conv3x3(x, w2, b2)))
    wf, bf = params["final_conv"]
    x = _lrelu(_ref_conv3x3(x, wf, bf))
    xf = jnp.transpose(x, (0, 3, 1, 2)).reshape(x.shape[0], -1)   # NCHW flatten
    w1f, b1f = params["fc1"]
    x = _lrelu(xf @ w1f + b1f)
    w2f, b2f = params["fc2"]
    return x @ w2f + b2f


if __name__ == "__main__":
    key = jax.random.PRNGKey(0)
    k_x, k_p = jax.random.split(key)
    img_channel, start_channel, nb_blocks = 3, 4, 2
    # spatial must be 7 * 2**nb_blocks = 28 so fc1's (2*ch*7*7) input matches
    x = jax.random.normal(k_x, (2, img_channel, 28, 28), jnp.float32)
    params = init_params(k_p, img_channel, start_channel, nb_blocks)

    ops = pack_operands(params, 2, 28, 28)   # weight folding: done once, host side
    out = jax.jit(fused_apply)(ops, x)
    jax.block_until_ready(out)

    assert out.shape == (2, 1), out.shape
    assert bool(jnp.all(jnp.isfinite(out)))

    # Structural self-check against a plain-JAX reference.  Tolerance is loose
    # because both paths use default (reduced) TPU matmul precision with very
    # different op structure; structural bugs give O(1) relative differences.
    ref = jax.jit(reference_forward)(params, x)
    np.testing.assert_allclose(np.asarray(out), np.asarray(ref), rtol=0.3, atol=0.1)

    print("KERNEL_OK")
</pallas_src>

<mosaic_0001>
module attributes {stable_mosaic.version = 11 : i64} {
  func.func @_fused_kernel(%arg0: memref<56x84xf32, #tpu.memory_space<vmem>>, %arg1: memref<84x112xf32, #tpu.memory_space<vmem>>, %arg2: memref<1x112xf32, #tpu.memory_space<vmem>>, %arg3: memref<2x56x56xf32, #tpu.memory_space<vmem>>, %arg4: memref<3x112x112xf32, #tpu.memory_space<vmem>>, %arg5: memref<1x112xf32, #tpu.memory_space<vmem>>, %arg6: memref<3x112x112xf32, #tpu.memory_space<vmem>>, %arg7: memref<3x28x56xf32, #tpu.memory_space<vmem>>, %arg8: memref<3x112x112xf32, #tpu.memory_space<vmem>>, %arg9: memref<1x112xf32, #tpu.memory_space<vmem>>, %arg10: memref<2x28x28xf32, #tpu.memory_space<vmem>>, %arg11: memref<3x112x112xf32, #tpu.memory_space<vmem>>, %arg12: memref<1x112xf32, #tpu.memory_space<vmem>>, %arg13: memref<3x112x112xf32, #tpu.memory_space<vmem>>, %arg14: memref<3x14x28xf32, #tpu.memory_space<vmem>>, %arg15: memref<3x112x112xf32, #tpu.memory_space<vmem>>, %arg16: memref<1x112xf32, #tpu.memory_space<vmem>>, %arg17: memref<2x14x14xf32, #tpu.memory_space<vmem>>, %arg18: memref<3x112x112xf32, #tpu.memory_space<vmem>>, %arg19: memref<1x112xf32, #tpu.memory_space<vmem>>, %arg20: memref<112x112xf32, #tpu.memory_space<vmem>>, %arg21: memref<14x112xf32, #tpu.memory_space<vmem>>, %arg22: memref<112x16xf32, #tpu.memory_space<vmem>>, %arg23: memref<2x14xf32, #tpu.memory_space<vmem>>, %arg24: memref<1x16xf32, #tpu.memory_space<vmem>>, %arg25: memref<1x16xf32, #tpu.memory_space<vmem>>, %arg26: memref<1x1xf32, #tpu.memory_space<vmem>>, %arg27: memref<2x1xf32, #tpu.memory_space<vmem>>) attributes {dimension_semantics = [], scalar_prefetch = 0 : i64, scratch_operands = 0 : i64, tpu.core_type = #tpu.core_type<tc>} {
    %c0 = arith.constant 0 : index
    %c0_0 = arith.constant 0 : index
    %0 = vector.load %arg0[%c0, %c0_0] : memref<56x84xf32, #tpu.memory_space<vmem>>, vector<56x84xf32>
    %c0_1 = arith.constant 0 : index
    %c0_2 = arith.constant 0 : index
    %1 = vector.load %arg1[%c0_1, %c0_2] : memref<84x112xf32, #tpu.memory_space<vmem>>, vector<84x112xf32>
    %cst = arith.constant dense<0.000000e+00> : vector<56x112xf32>
    %2 = tpu.matmul %0, %1, %cst {dimension_numbers = #tpu.dot_dimension_numbers<[1], [0], [0], [1], [0, 0, 1, 1], [], []>} : vector<56x84xf32>, vector<84x112xf32>, vector<56x112xf32> -> vector<56x112xf32>
    %c0_3 = arith.constant 0 : index
    %c0_4 = arith.constant 0 : index
    %3 = vector.load %arg2[%c0_3, %c0_4] : memref<1x112xf32, #tpu.memory_space<vmem>>, vector<1x112xf32>
    %4 = vector.broadcast %3 : vector<1x112xf32> to vector<56x112xf32>
    %5 = arith.addf %2, %4 : vector<56x112xf32>
    %c1 = arith.constant 1 : index
    %c0_5 = arith.constant 0 : index
    %c0_6 = arith.constant 0 : index
    %6 = vector.load %arg4[%c1, %c0_5, %c0_6] : memref<3x112x112xf32, #tpu.memory_space<vmem>>, vector<1x112x112xf32>
    %7 = vector.shape_cast %6 : vector<1x112x112xf32> to vector<112x112xf32>
    %cst_7 = arith.constant dense<0.000000e+00> : vector<56x112xf32>
    %8 = tpu.matmul %5, %7, %cst_7 {dimension_numbers = #tpu.dot_dimension_numbers<[1], [0], [0], [1], [0, 0, 1, 1], [], []>} : vector<56x112xf32>, vector<112x112xf32>, vector<56x112xf32> -> vector<56x112xf32>
    %c0_8 = arith.constant 0 : index
    %c0_9 = arith.constant 0 : index
    %c0_10 = arith.constant 0 : index
    %9 = vector.load %arg3[%c0_8, %c0_9, %c0_10] : memref<2x56x56xf32, #tpu.memory_space<vmem>>, vector<1x56x56xf32>
    %10 = vector.shape_cast %9 : vector<1x56x56xf32> to vector<56x56xf32>
    %cst_11 = arith.constant dense<0.000000e+00> : vector<56x112xf32>
    %11 = tpu.matmul %10, %5, %cst_11 {dimension_numbers = #tpu.dot_dimension_numbers<[1], [0], [0], [1], [0, 0, 1, 1], [], []>} : vector<56x56xf32>, vector<56x112xf32>, vector<56x112xf32> -> vector<56x112xf32>
    %c0_12 = arith.constant 0 : index
    %c0_13 = arith.constant 0 : index
    %c0_14 = arith.constant 0 : index
    %12 = vector.load %arg4[%c0_12, %c0_13, %c0_14] : memref<3x112x112xf32, #tpu.memory_space<vmem>>, vector<1x112x112xf32>
    %13 = vector.shape_cast %12 : vector<1x112x112xf32> to vector<112x112xf32>
    %cst_15 = arith.constant dense<0.000000e+00> : vector<56x112xf32>
    %14 = tpu.matmul %11, %13, %cst_15 {dimension_numbers = #tpu.dot_dimension_numbers<[1], [0], [0], [1], [0, 0, 1, 1], [], []>} : vector<56x112xf32>, vector<112x112xf32>, vector<56x112xf32> -> vector<56x112xf32>
    %15 = arith.addf %8, %14 : vector<56x112xf32>
    %c1_16 = arith.constant 1 : index
    %c0_17 = arith.constant 0 : index
    %c0_18 = arith.constant 0 : index
    %16 = vector.load %arg3[%c1_16, %c0_17, %c0_18] : memref<2x56x56xf32, #tpu.memory_space<vmem>>, vector<1x56x56xf32>
    %17 = vector.shape_cast %16 : vector<1x56x56xf32> to vector<56x56xf32>
    %cst_19 = arith.constant dense<0.000000e+00> : vector<56x112xf32>
    %18 = tpu.matmul %17, %5, %cst_19 {dimension_numbers = #tpu.dot_dimension_numbers<[1], [0], [0], [1], [0, 0, 1, 1], [], []>} : vector<56x56xf32>, vector<56x112xf32>, vector<56x112xf32> -> vector<56x112xf32>
    %c2 = arith.constant 2 : index
    %c0_20 = arith.constant 0 : index
    %c0_21 = arith.constant 0 : index
    %19 = vector.load %arg4[%c2, %c0_20, %c0_21] : memref<3x112x112xf32, #tpu.memory_space<vmem>>, vector<1x112x112xf32>
    %20 = vector.shape_cast %19 : vector<1x112x112xf32> to vector<112x112xf32>
    %cst_22 = arith.constant dense<0.000000e+00> : vector<56x112xf32>
    %21 = tpu.matmul %18, %20, %cst_22 {dimension_numbers = #tpu.dot_dimension_numbers<[1], [0], [0], [1], [0, 0, 1, 1], [], []>} : vector<56x112xf32>, vector<112x112xf32>, vector<56x112xf32> -> vector<56x112xf32>
    %22 = arith.addf %15, %21 : vector<56x112xf32>
    %c0_23 = arith.constant 0 : index
    %c0_24 = arith.constant 0 : index
    %23 = vector.load %arg5[%c0_23, %c0_24] : memref<1x112xf32, #tpu.memory_space<vmem>>, vector<1x112xf32>
    %24 = vector.broadcast %23 : vector<1x112xf32> to vector<56x112xf32>
    %25 = arith.addf %22, %24 : vector<56x112xf32>
    %cst_25 = arith.constant 0.000000e+00 : f32
    %26 = vector.broadcast %cst_25 : f32 to vector<56x112xf32>
    %27 = arith.cmpf ogt, %25, %26 : vector<56x112xf32>
    %cst_26 = arith.constant 2.000000e-01 : f32
    %28 = vector.broadcast %cst_26 : f32 to vector<56x112xf32>
    %29 = arith.mulf %28, %25 : vector<56x112xf32>
    %30 = arith.select %27, %25, %29 : vector<56x112xi1>, vector<56x112xf32>
    %c1_27 = arith.constant 1 : index
    %c0_28 = arith.constant 0 : index
    %c0_29 = arith.constant 0 : index
    %31 = vector.load %arg6[%c1_27, %c0_28, %c0_29] : memref<3x112x112xf32, #tpu.memory_space<vmem>>, vector<1x112x112xf32>
    %32 = vector.shape_cast %31 : vector<1x112x112xf32> to vector<112x112xf32>
    %cst_30 = arith.constant dense<0.000000e+00> : vector<56x112xf32>
    %33 = tpu.matmul %30, %32, %cst_30 {dimension_numbers = #tpu.dot_dimension_numbers<[1], [0], [0], [1], [0, 0, 1, 1], [], []>} : vector<56x112xf32>, vector<112x112xf32>, vector<56x112xf32> -> vector<56x112xf32>
    %c0_31 = arith.constant 0 : index
    %c0_32 = arith.constant 0 : index
    %c0_33 = arith.constant 0 : index
    %34 = vector.load %arg3[%c0_31, %c0_32, %c0_33] : memref<2x56x56xf32, #tpu.memory_space<vmem>>, vector<1x56x56xf32>
    %35 = vector.shape_cast %34 : vector<1x56x56xf32> to vector<56x56xf32>
    %cst_34 = arith.constant dense<0.000000e+00> : vector<56x112xf32>
    %36 = tpu.matmul %35, %30, %cst_34 {dimension_numbers = #tpu.dot_dimension_numbers<[1], [0], [0], [1], [0, 0, 1, 1], [], []>} : vector<56x56xf32>, vector<56x112xf32>, vector<56x112xf32> -> vector<56x112xf32>
    %c0_35 = arith.constant 0 : index
    %c0_36 = arith.constant 0 : index
    %c0_37 = arith.constant 0 : index
    %37 = vector.load %arg6[%c0_35, %c0_36, %c0_37] : memref<3x112x112xf32, #tpu.memory_space<vmem>>, vector<1x112x112xf32>
    %38 = vector.shape_cast %37 : vector<1x112x112xf32> to vector<112x112xf32>
    %cst_38 = arith.constant dense<0.000000e+00> : vector<56x112xf32>
    %39 = tpu.matmul %36, %38, %cst_38 {dimension_numbers = #tpu.dot_dimension_numbers<[1], [0], [0], [1], [0, 0, 1, 1], [], []>} : vector<56x112xf32>, vector<112x112xf32>, vector<56x112xf32> -> vector<56x112xf32>
    %40 = arith.addf %33, %39 : vector<56x112xf32>
    %c1_39 = arith.constant 1 : index
    %c0_40 = arith.constant 0 : index
    %c0_41 = arith.constant 0 : index
    %41 = vector.load %arg3[%c1_39, %c0_40, %c0_41] : memref<2x56x56xf32, #tpu.memory_space<vmem>>, vector<1x56x56xf32>
    %42 = vector.shape_cast %41 : vector<1x56x56xf32> to vector<56x56xf32>
    %cst_42 = arith.constant dense<0.000000e+00> : vector<56x112xf32>
    %43 = tpu.matmul %42, %30, %cst_42 {dimension_numbers = #tpu.dot_dimension_numbers<[1], [0], [0], [1], [0, 0, 1, 1], [], []>} : vector<56x56xf32>, vector<56x112xf32>, vector<56x112xf32> -> vector<56x112xf32>
    %c2_43 = arith.constant 2 : index
    %c0_44 = arith.constant 0 : index
    %c0_45 = arith.constant 0 : index
    %44 = vector.load %arg6[%c2_43, %c0_44, %c0_45] : memref<3x112x112xf32, #tpu.memory_space<vmem>>, vector<1x112x112xf32>
    %45 = vector.shape_cast %44 : vector<1x112x112xf32> to vector<112x112xf32>
    %cst_46 = arith.constant dense<0.000000e+00> : vector<56x112xf32>
    %46 = tpu.matmul %43, %45, %cst_46 {dimension_numbers = #tpu.dot_dimension_numbers<[1], [0], [0], [1], [0, 0, 1, 1], [], []>} : vector<56x112xf32>, vector<112x112xf32>, vector<56x112xf32> -> vector<56x112xf32>
    %47 = arith.addf %40, %46 : vector<56x112xf32>
    %c0_47 = arith.constant 0 : index
    %c0_48 = arith.constant 0 : index
    %c0_49 = arith.constant 0 : index
    %48 = vector.load %arg7[%c0_47, %c0_48, %c0_49] : memref<3x28x56xf32, #tpu.memory_space<vmem>>, vector<1x28x56xf32>
    %49 = vector.shape_cast %48 : vector<1x28x56xf32> to vector<28x56xf32>
    %cst_50 = arith.constant dense<0.000000e+00> : vector<28x112xf32>
    %50 = tpu.matmul %49, %47, %cst_50 {dimension_numbers = #tpu.dot_dimension_numbers<[1], [0], [0], [1], [0, 0, 1, 1], [], []>} : vector<28x56xf32>, vector<56x112xf32>, vector<28x112xf32> -> vector<28x112xf32>
    %c0_51 = arith.constant 0 : index
    %c0_52 = arith.constant 0 : index
    %c0_53 = arith.constant 0 : index
    %51 = vector.load %arg8[%c0_51, %c0_52, %c0_53] : memref<3x112x112xf32, #tpu.memory_space<vmem>>, vector<1x112x112xf32>
    %52 = vector.shape_cast %51 : vector<1x112x112xf32> to vector<112x112xf32>
    %cst_54 = arith.constant dense<0.000000e+00> : vector<28x112xf32>
    %53 = tpu.matmul %50, %52, %cst_54 {dimension_numbers = #tpu.dot_dimension_numbers<[1], [0], [0], [1], [0, 0, 1, 1], [], []>} : vector<28x112xf32>, vector<112x112xf32>, vector<28x112xf32> -> vector<28x112xf32>
    %c1_55 = arith.constant 1 : index
    %c0_56 = arith.constant 0 : index
    %c0_57 = arith.constant 0 : index
    %54 = vector.load %arg7[%c1_55, %c0_56, %c0_57] : memref<3x28x56xf32, #tpu.memory_space<vmem>>, vector<1x28x56xf32>
    %55 = vector.shape_cast %54 : vector<1x28x56xf32> to vector<28x56xf32>
    %cst_58 = arith.constant dense<0.000000e+00> : vector<28x112xf32>
    %56 = tpu.matmul %55, %47, %cst_58 {dimension_numbers = #tpu.dot_dimension_numbers<[1], [0], [0], [1], [0, 0, 1, 1], [], []>} : vector<28x56xf32>, vector<56x112xf32>, vector<28x112xf32> -> vector<28x112xf32>
    %c1_59 = arith.constant 1 : index
    %c0_60 = arith.constant 0 : index
    %c0_61 = arith.constant 0 : index
    %57 = vector.load %arg8[%c1_59, %c0_60, %c0_61] : memref<3x112x112xf32, #tpu.memory_space<vmem>>, vector<1x112x112xf32>
    %58 = vector.shape_cast %57 : vector<1x112x112xf32> to vector<112x112xf32>
    %cst_62 = arith.constant dense<0.000000e+00> : vector<28x112xf32>
    %59 = tpu.matmul %56, %58, %cst_62 {dimension_numbers = #tpu.dot_dimension_numbers<[1], [0], [0], [1], [0, 0, 1, 1], [], []>} : vector<28x112xf32>, vector<112x112xf32>, vector<28x112xf32> -> vector<28x112xf32>
    %60 = arith.addf %53, %59 : vector<28x112xf32>
    %c2_63 = arith.constant 2 : index
    %c0_64 = arith.constant 0 : index
    %c0_65 = arith.constant 0 : index
    %61 = vector.load %arg7[%c2_63, %c0_64, %c0_65] : memref<3x28x56xf32, #tpu.memory_space<vmem>>, vector<1x28x56xf32>
    %62 = vector.shape_cast %61 : vector<1x28x56xf32> to vector<28x56xf32>
    %cst_66 = arith.constant dense<0.000000e+00> : vector<28x112xf32>
    %63 = tpu.matmul %62, %47, %cst_66 {dimension_numbers = #tpu.dot_dimension_numbers<[1], [0], [0], [1], [0, 0, 1, 1], [], []>} : vector<28x56xf32>, vector<56x112xf32>, vector<28x112xf32> -> vector<28x112xf32>
    %c2_67 = arith.constant 2 : index
    %c0_68 = arith.constant 0 : index
    %c0_69 = arith.constant 0 : index
    %64 = vector.load %arg8[%c2_67, %c0_68, %c0_69] : memref<3x112x112xf32, #tpu.memory_space<vmem>>, vector<1x112x112xf32>
    %65 = vector.shape_cast %64 : vector<1x112x112xf32> to vector<112x112xf32>
    %cst_70 = arith.constant dense<0.000000e+00> : vector<28x112xf32>
    %66 = tpu.matmul %63, %65, %cst_70 {dimension_numbers = #tpu.dot_dimension_numbers<[1], [0], [0], [1], [0, 0, 1, 1], [], []>} : vector<28x112xf32>, vector<112x112xf32>, vector<28x112xf32> -> vector<28x112xf32>
    %67 = arith.addf %60, %66 : vector<28x112xf32>
    %c0_71 = arith.constant 0 : index
    %c0_72 = arith.constant 0 : index
    %68 = vector.load %arg9[%c0_71, %c0_72] : memref<1x112xf32, #tpu.memory_space<vmem>>, vector<1x112xf32>
    %69 = vector.broadcast %68 : vector<1x112xf32> to vector<28x112xf32>
    %70 = arith.addf %67, %69 : vector<28x112xf32>
    %cst_73 = arith.constant 0.000000e+00 : f32
    %71 = vector.broadcast %cst_73 : f32 to vector<28x112xf32>
    %72 = arith.cmpf ogt, %70, %71 : vector<28x112xf32>
    %cst_74 = arith.constant 2.000000e-01 : f32
    %73 = vector.broadcast %cst_74 : f32 to vector<28x112xf32>
    %74 = arith.mulf %73, %70 : vector<28x112xf32>
    %75 = arith.select %72, %70, %74 : vector<28x112xi1>, vector<28x112xf32>
    %c1_75 = arith.constant 1 : index
    %c0_76 = arith.constant 0 : index
    %c0_77 = arith.constant 0 : index
    %76 = vector.load %arg11[%c1_75, %c0_76, %c0_77] : memref<3x112x112xf32, #tpu.memory_space<vmem>>, vector<1x112x112xf32>
    %77 = vector.shape_cast %76 : vector<1x112x112xf32> to vector<112x112xf32>
    %cst_78 = arith.constant dense<0.000000e+00> : vector<28x112xf32>
    %78 = tpu.matmul %75, %77, %cst_78 {dimension_numbers = #tpu.dot_dimension_numbers<[1], [0], [0], [1], [0, 0, 1, 1], [], []>} : vector<28x112xf32>, vector<112x112xf32>, vector<28x112xf32> -> vector<28x112xf32>
    %c0_79 = arith.constant 0 : index
    %c0_80 = arith.constant 0 : index
    %c0_81 = arith.constant 0 : index
    %79 = vector.load %arg10[%c0_79, %c0_80, %c0_81] : memref<2x28x28xf32, #tpu.memory_space<vmem>>, vector<1x28x28xf32>
    %80 = vector.shape_cast %79 : vector<1x28x28xf32> to vector<28x28xf32>
    %cst_82 = arith.constant dense<0.000000e+00> : vector<28x112xf32>
    %81 = tpu.matmul %80, %75, %cst_82 {dimension_numbers = #tpu.dot_dimension_numbers<[1], [0], [0], [1], [0, 0, 1, 1], [], []>} : vector<28x28xf32>, vector<28x112xf32>, vector<28x112xf32> -> vector<28x112xf32>
    %c0_83 = arith.constant 0 : index
    %c0_84 = arith.constant 0 : index
    %c0_85 = arith.constant 0 : index
    %82 = vector.load %arg11[%c0_83, %c0_84, %c0_85] : memref<3x112x112xf32, #tpu.memory_space<vmem>>, vector<1x112x112xf32>
    %83 = vector.shape_cast %82 : vector<1x112x112xf32> to vector<112x112xf32>
    %cst_86 = arith.constant dense<0.000000e+00> : vector<28x112xf32>
    %84 = tpu.matmul %81, %83, %cst_86 {dimension_numbers = #tpu.dot_dimension_numbers<[1], [0], [0], [1], [0, 0, 1, 1], [], []>} : vector<28x112xf32>, vector<112x112xf32>, vector<28x112xf32> -> vector<28x112xf32>
    %85 = arith.addf %78, %84 : vector<28x112xf32>
    %c1_87 = arith.constant 1 : index
    %c0_88 = arith.constant 0 : index
    %c0_89 = arith.constant 0 : index
    %86 = vector.load %arg10[%c1_87, %c0_88, %c0_89] : memref<2x28x28xf32, #tpu.memory_space<vmem>>, vector<1x28x28xf32>
    %87 = vector.shape_cast %86 : vector<1x28x28xf32> to vector<28x28xf32>
    %cst_90 = arith.constant dense<0.000000e+00> : vector<28x112xf32>
    %88 = tpu.matmul %87, %75, %cst_90 {dimension_numbers = #tpu.dot_dimension_numbers<[1], [0], [0], [1], [0, 0, 1, 1], [], []>} : vector<28x28xf32>, vector<28x112xf32>, vector<28x112xf32> -> vector<28x112xf32>
    %c2_91 = arith.constant 2 : index
    %c0_92 = arith.constant 0 : index
    %c0_93 = arith.constant 0 : index
    %89 = vector.load %arg11[%c2_91, %c0_92, %c0_93] : memref<3x112x112xf32, #tpu.memory_space<vmem>>, vector<1x112x112xf32>
    %90 = vector.shape_cast %89 : vector<1x112x112xf32> to vector<112x112xf32>
    %cst_94 = arith.constant dense<0.000000e+00> : vector<28x112xf32>
    %91 = tpu.matmul %88, %90, %cst_94 {dimension_numbers = #tpu.dot_dimension_numbers<[1], [0], [0], [1], [0, 0, 1, 1], [], []>} : vector<28x112xf32>, vector<112x112xf32>, vector<28x112xf32> -> vector<28x112xf32>
    %92 = arith.addf %85, %91 : vector<28x112xf32>
    %c0_95 = arith.constant 0 : index
    %c0_96 = arith.constant 0 : index
    %93 = vector.load %arg12[%c0_95, %c0_96] : memref<1x112xf32, #tpu.memory_space<vmem>>, vector<1x112xf32>
    %94 = vector.broadcast %93 : vector<1x112xf32> to vector<28x112xf32>
    %95 = arith.addf %92, %94 : vector<28x112xf32>
    %cst_97 = arith.constant 0.000000e+00 : f32
    %96 = vector.broadcast %cst_97 : f32 to vector<28x112xf32>
    %97 = arith.cmpf ogt, %95, %96 : vector<28x112xf32>
    %cst_98 = arith.constant 2.000000e-01 : f32
    %98 = vector.broadcast %cst_98 : f32 to vector<28x112xf32>
    %99 = arith.mulf %98, %95 : vector<28x112xf32>
    %100 = arith.select %97, %95, %99 : vector<28x112xi1>, vector<28x112xf32>
    %c1_99 = arith.constant 1 : index
    %c0_100 = arith.constant 0 : index
    %c0_101 = arith.constant 0 : index
    %101 = vector.load %arg13[%c1_99, %c0_100, %c0_101] : memref<3x112x112xf32, #tpu.memory_space<vmem>>, vector<1x112x112xf32>
    %102 = vector.shape_cast %101 : vector<1x112x112xf32> to vector<112x112xf32>
    %cst_102 = arith.constant dense<0.000000e+00> : vector<28x112xf32>
    %103 = tpu.matmul %100, %102, %cst_102 {dimension_numbers = #tpu.dot_dimension_numbers<[1], [0], [0], [1], [0, 0, 1, 1], [], []>} : vector<28x112xf32>, vector<112x112xf32>, vector<28x112xf32> -> vector<28x112xf32>
    %c0_103 = arith.constant 0 : index
    %c0_104 = arith.constant 0 : index
    %c0_105 = arith.constant 0 : index
    %104 = vector.load %arg10[%c0_103, %c0_104, %c0_105] : memref<2x28x28xf32, #tpu.memory_space<vmem>>, vector<1x28x28xf32>
    %105 = vector.shape_cast %104 : vector<1x28x28xf32> to vector<28x28xf32>
    %cst_106 = arith.constant dense<0.000000e+00> : vector<28x112xf32>
    %106 = tpu.matmul %105, %100, %cst_106 {dimension_numbers = #tpu.dot_dimension_numbers<[1], [0], [0], [1], [0, 0, 1, 1], [], []>} : vector<28x28xf32>, vector<28x112xf32>, vector<28x112xf32> -> vector<28x112xf32>
    %c0_107 = arith.constant 0 : index
    %c0_108 = arith.constant 0 : index
    %c0_109 = arith.constant 0 : index
    %107 = vector.load %arg13[%c0_107, %c0_108, %c0_109] : memref<3x112x112xf32, #tpu.memory_space<vmem>>, vector<1x112x112xf32>
    %108 = vector.shape_cast %107 : vector<1x112x112xf32> to vector<112x112xf32>
    %cst_110 = arith.constant dense<0.000000e+00> : vector<28x112xf32>
    %109 = tpu.matmul %106, %108, %cst_110 {dimension_numbers = #tpu.dot_dimension_numbers<[1], [0], [0], [1], [0, 0, 1, 1], [], []>} : vector<28x112xf32>, vector<112x112xf32>, vector<28x112xf32> -> vector<28x112xf32>
    %110 = arith.addf %103, %109 : vector<28x112xf32>
    %c1_111 = arith.constant 1 : index
    %c0_112 = arith.constant 0 : index
    %c0_113 = arith.constant 0 : index
    %111 = vector.load %arg10[%c1_111, %c0_112, %c0_113] : memref<2x28x28xf32, #tpu.memory_space<vmem>>, vector<1x28x28xf32>
    %112 = vector.shape_cast %111 : vector<1x28x28xf32> to vector<28x28xf32>
    %cst_114 = arith.constant dense<0.000000e+00> : vector<28x112xf32>
    %113 = tpu.matmul %112, %100, %cst_114 {dimension_numbers = #tpu.dot_dimension_numbers<[1], [0], [0], [1], [0, 0, 1, 1], [], []>} : vector<28x28xf32>, vector<28x112xf32>, vector<28x112xf32> -> vector<28x112xf32>
    %c2_115 = arith.constant 2 : index
    %c0_116 = arith.constant 0 : index
    %c0_117 = arith.constant 0 : index
    %114 = vector.load %arg13[%c2_115, %c0_116, %c0_117] : memref<3x112x112xf32, #tpu.memory_space<vmem>>, vector<1x112x112xf32>
    %115 = vector.shape_cast %114 : vector<1x112x112xf32> to vector<112x112xf32>
    %cst_118 = arith.constant dense<0.000000e+00> : vector<28x112xf32>
    %116 = tpu.matmul %113, %115, %cst_118 {dimension_numbers = #tpu.dot_dimension_numbers<[1], [0], [0], [1], [0, 0, 1, 1], [], []>} : vector<28x112xf32>, vector<112x112xf32>, vector<28x112xf32> -> vector<28x112xf32>
    %117 = arith.addf %110, %116 : vector<28x112xf32>
    %c0_119 = arith.constant 0 : index
    %c0_120 = arith.constant 0 : index
    %c0_121 = arith.constant 0 : index
    %118 = vector.load %arg14[%c0_119, %c0_120, %c0_121] : memref<3x14x28xf32, #tpu.memory_space<vmem>>, vector<1x14x28xf32>
    %119 = vector.shape_cast %118 : vector<1x14x28xf32> to vector<14x28xf32>
    %cst_122 = arith.constant dense<0.000000e+00> : vector<14x112xf32>
    %120 = tpu.matmul %119, %117, %cst_122 {dimension_numbers = #tpu.dot_dimension_numbers<[1], [0], [0], [1], [0, 0, 1, 1], [], []>} : vector<14x28xf32>, vector<28x112xf32>, vector<14x112xf32> -> vector<14x112xf32>
    %c0_123 = arith.constant 0 : index
    %c0_124 = arith.constant 0 : index
    %c0_125 = arith.constant 0 : index
    %121 = vector.load %arg15[%c0_123, %c0_124, %c0_125] : memref<3x112x112xf32, #tpu.memory_space<vmem>>, vector<1x112x112xf32>
    %122 = vector.shape_cast %121 : vector<1x112x112xf32> to vector<112x112xf32>
    %cst_126 = arith.constant dense<0.000000e+00> : vector<14x112xf32>
    %123 = tpu.matmul %120, %122, %cst_126 {dimension_numbers = #tpu.dot_dimension_numbers<[1], [0], [0], [1], [0, 0, 1, 1], [], []>} : vector<14x112xf32>, vector<112x112xf32>, vector<14x112xf32> -> vector<14x112xf32>
    %c1_127 = arith.constant 1 : index
    %c0_128 = arith.constant 0 : index
    %c0_129 = arith.constant 0 : index
    %124 = vector.load %arg14[%c1_127, %c0_128, %c0_129] : memref<3x14x28xf32, #tpu.memory_space<vmem>>, vector<1x14x28xf32>
    %125 = vector.shape_cast %124 : vector<1x14x28xf32> to vector<14x28xf32>
    %cst_130 = arith.constant dense<0.000000e+00> : vector<14x112xf32>
    %126 = tpu.matmul %125, %117, %cst_130 {dimension_numbers = #tpu.dot_dimension_numbers<[1], [0], [0], [1], [0, 0, 1, 1], [], []>} : vector<14x28xf32>, vector<28x112xf32>, vector<14x112xf32> -> vector<14x112xf32>
    %c1_131 = arith.constant 1 : index
    %c0_132 = arith.constant 0 : index
    %c0_133 = arith.constant 0 : index
    %127 = vector.load %arg15[%c1_131, %c0_132, %c0_133] : memref<3x112x112xf32, #tpu.memory_space<vmem>>, vector<1x112x112xf32>
    %128 = vector.shape_cast %127 : vector<1x112x112xf32> to vector<112x112xf32>
    %cst_134 = arith.constant dense<0.000000e+00> : vector<14x112xf32>
    %129 = tpu.matmul %126, %128, %cst_134 {dimension_numbers = #tpu.dot_dimension_numbers<[1], [0], [0], [1], [0, 0, 1, 1], [], []>} : vector<14x112xf32>, vector<112x112xf32>, vector<14x112xf32> -> vector<14x112xf32>
    %130 = arith.addf %123, %129 : vector<14x112xf32>
    %c2_135 = arith.constant 2 : index
    %c0_136 = arith.constant 0 : index
    %c0_137 = arith.constant 0 : index
    %131 = vector.load %arg14[%c2_135, %c0_136, %c0_137] : memref<3x14x28xf32, #tpu.memory_space<vmem>>, vector<1x14x28xf32>
    %132 = vector.shape_cast %131 : vector<1x14x28xf32> to vector<14x28xf32>
    %cst_138 = arith.constant dense<0.000000e+00> : vector<14x112xf32>
    %133 = tpu.matmul %132, %117, %cst_138 {dimension_numbers = #tpu.dot_dimension_numbers<[1], [0], [0], [1], [0, 0, 1, 1], [], []>} : vector<14x28xf32>, vector<28x112xf32>, vector<14x112xf32> -> vector<14x112xf32>
    %c2_139 = arith.constant 2 : index
    %c0_140 = arith.constant 0 : index
    %c0_141 = arith.constant 0 : index
    %134 = vector.load %arg15[%c2_139, %c0_140, %c0_141] : memref<3x112x112xf32, #tpu.memory_space<vmem>>, vector<1x112x112xf32>
    %135 = vector.shape_cast %134 : vector<1x112x112xf32> to vector<112x112xf32>
    %cst_142 = arith.constant dense<0.000000e+00> : vector<14x112xf32>
    %136 = tpu.matmul %133, %135, %cst_142 {dimension_numbers = #tpu.dot_dimension_numbers<[1], [0], [0], [1], [0, 0, 1, 1], [], []>} : vector<14x112xf32>, vector<112x112xf32>, vector<14x112xf32> -> vector<14x112xf32>
    %137 = arith.addf %130, %136 : vector<14x112xf32>
    %c0_143 = arith.constant 0 : index
    %c0_144 = arith.constant 0 : index
    %138 = vector.load %arg16[%c0_143, %c0_144] : memref<1x112xf32, #tpu.memory_space<vmem>>, vector<1x112xf32>
    %139 = vector.broadcast %138 : vector<1x112xf32> to vector<14x112xf32>
    %140 = arith.addf %137, %139 : vector<14x112xf32>
    %cst_145 = arith.constant 0.000000e+00 : f32
    %141 = vector.broadcast %cst_145 : f32 to vector<14x112xf32>
    %142 = arith.cmpf ogt, %140, %141 : vector<14x112xf32>
    %cst_146 = arith.constant 2.000000e-01 : f32
    %143 = vector.broadcast %cst_146 : f32 to vector<14x112xf32>
    %144 = arith.mulf %143, %140 : vector<14x112xf32>
    %145 = arith.select %142, %140, %144 : vector<14x112xi1>, vector<14x112xf32>
    %c1_147 = arith.constant 1 : index
    %c0_148 = arith.constant 0 : index
    %c0_149 = arith.constant 0 : index
    %146 = vector.load %arg18[%c1_147, %c0_148, %c0_149] : memref<3x112x112xf32, #tpu.memory_space<vmem>>, vector<1x112x112xf32>
    %147 = vector.shape_cast %146 : vector<1x112x112xf32> to vector<112x112xf32>
    %cst_150 = arith.constant dense<0.000000e+00> : vector<14x112xf32>
    %148 = tpu.matmul %145, %147, %cst_150 {dimension_numbers = #tpu.dot_dimension_numbers<[1], [0], [0], [1], [0, 0, 1, 1], [], []>} : vector<14x112xf32>, vector<112x112xf32>, vector<14x112xf32> -> vector<14x112xf32>
    %c0_151 = arith.constant 0 : index
    %c0_152 = arith.constant 0 : index
    %c0_153 = arith.constant 0 : index
    %149 = vector.load %arg17[%c0_151, %c0_152, %c0_153] : memref<2x14x14xf32, #tpu.memory_space<vmem>>, vector<1x14x14xf32>
    %150 = vector.shape_cast %149 : vector<1x14x14xf32> to vector<14x14xf32>
    %cst_154 = arith.constant dense<0.000000e+00> : vector<14x112xf32>
    %151 = tpu.matmul %150, %145, %cst_154 {dimension_numbers = #tpu.dot_dimension_numbers<[1], [0], [0], [1], [0, 0, 1, 1], [], []>} : vector<14x14xf32>, vector<14x112xf32>, vector<14x112xf32> -> vector<14x112xf32>
    %c0_155 = arith.constant 0 : index
    %c0_156 = arith.constant 0 : index
    %c0_157 = arith.constant 0 : index
    %152 = vector.load %arg18[%c0_155, %c0_156, %c0_157] : memref<3x112x112xf32, #tpu.memory_space<vmem>>, vector<1x112x112xf32>
    %153 = vector.shape_cast %152 : vector<1x112x112xf32> to vector<112x112xf32>
    %cst_158 = arith.constant dense<0.000000e+00> : vector<14x112xf32>
    %154 = tpu.matmul %151, %153, %cst_158 {dimension_numbers = #tpu.dot_dimension_numbers<[1], [0], [0], [1], [0, 0, 1, 1], [], []>} : vector<14x112xf32>, vector<112x112xf32>, vector<14x112xf32> -> vector<14x112xf32>
    %155 = arith.addf %148, %154 : vector<14x112xf32>
    %c1_159 = arith.constant 1 : index
    %c0_160 = arith.constant 0 : index
    %c0_161 = arith.constant 0 : index
    %156 = vector.load %arg17[%c1_159, %c0_160, %c0_161] : memref<2x14x14xf32, #tpu.memory_space<vmem>>, vector<1x14x14xf32>
    %157 = vector.shape_cast %156 : vector<1x14x14xf32> to vector<14x14xf32>
    %cst_162 = arith.constant dense<0.000000e+00> : vector<14x112xf32>
    %158 = tpu.matmul %157, %145, %cst_162 {dimension_numbers = #tpu.dot_dimension_numbers<[1], [0], [0], [1], [0, 0, 1, 1], [], []>} : vector<14x14xf32>, vector<14x112xf32>, vector<14x112xf32> -> vector<14x112xf32>
    %c2_163 = arith.constant 2 : index
    %c0_164 = arith.constant 0 : index
    %c0_165 = arith.constant 0 : index
    %159 = vector.load %arg18[%c2_163, %c0_164, %c0_165] : memref<3x112x112xf32, #tpu.memory_space<vmem>>, vector<1x112x112xf32>
    %160 = vector.shape_cast %159 : vector<1x112x112xf32> to vector<112x112xf32>
    %cst_166 = arith.constant dense<0.000000e+00> : vector<14x112xf32>
    %161 = tpu.matmul %158, %160, %cst_166 {dimension_numbers = #tpu.dot_dimension_numbers<[1], [0], [0], [1], [0, 0, 1, 1], [], []>} : vector<14x112xf32>, vector<112x112xf32>, vector<14x112xf32> -> vector<14x112xf32>
    %162 = arith.addf %155, %161 : vector<14x112xf32>
    %c0_167 = arith.constant 0 : index
    %c0_168 = arith.constant 0 : index
    %163 = vector.load %arg19[%c0_167, %c0_168] : memref<1x112xf32, #tpu.memory_space<vmem>>, vector<1x112xf32>
    %164 = vector.broadcast %163 : vector<1x112xf32> to vector<14x112xf32>
    %165 = arith.addf %162, %164 : vector<14x112xf32>
    %cst_169 = arith.constant 0.000000e+00 : f32
    %166 = vector.broadcast %cst_169 : f32 to vector<14x112xf32>
    %167 = arith.cmpf ogt, %165, %166 : vector<14x112xf32>
    %cst_170 = arith.constant 2.000000e-01 : f32
    %168 = vector.broadcast %cst_170 : f32 to vector<14x112xf32>
    %169 = arith.mulf %168, %165 : vector<14x112xf32>
    %170 = arith.select %167, %165, %169 : vector<14x112xi1>, vector<14x112xf32>
    %c0_171 = arith.constant 0 : index
    %c0_172 = arith.constant 0 : index
    %171 = vector.load %arg20[%c0_171, %c0_172] : memref<112x112xf32, #tpu.memory_space<vmem>>, vector<112x112xf32>
    %cst_173 = arith.constant dense<0.000000e+00> : vector<14x112xf32>
    %172 = tpu.matmul %170, %171, %cst_173 {dimension_numbers = #tpu.dot_dimension_numbers<[1], [0], [0], [1], [0, 0, 1, 1], [], []>} : vector<14x112xf32>, vector<112x112xf32>, vector<14x112xf32> -> vector<14x112xf32>
    %c0_174 = arith.constant 0 : index
    %c0_175 = arith.constant 0 : index
    %173 = vector.load %arg21[%c0_174, %c0_175] : memref<14x112xf32, #tpu.memory_space<vmem>>, vector<14x112xf32>
    %174 = arith.mulf %172, %173 : vector<14x112xf32>
    %c0_176 = arith.constant 0 : index
    %c0_177 = arith.constant 0 : index
    %175 = vector.load %arg23[%c0_176, %c0_177] : memref<2x14xf32, #tpu.memory_space<vmem>>, vector<2x14xf32>
    %cst_178 = arith.constant dense<0.000000e+00> : vector<2x112xf32>
    %176 = tpu.matmul %175, %174, %cst_178 {dimension_numbers = #tpu.dot_dimension_numbers<[1], [0], [0], [1], [0, 0, 1, 1], [], []>} : vector<2x14xf32>, vector<14x112xf32>, vector<2x112xf32> -> vector<2x112xf32>
    %c0_179 = arith.constant 0 : index
    %c0_180 = arith.constant 0 : index
    %177 = vector.load %arg22[%c0_179, %c0_180] : memref<112x16xf32, #tpu.memory_space<vmem>>, vector<112x16xf32>
    %cst_181 = arith.constant dense<0.000000e+00> : vector<2x16xf32>
    %178 = tpu.matmul %176, %177, %cst_181 {dimension_numbers = #tpu.dot_dimension_numbers<[1], [0], [0], [1], [0, 0, 1, 1], [], []>} : vector<2x112xf32>, vector<112x16xf32>, vector<2x16xf32> -> vector<2x16xf32>
    %c0_182 = arith.constant 0 : index
    %c0_183 = arith.constant 0 : index
    %179 = vector.load %arg24[%c0_182, %c0_183] : memref<1x16xf32, #tpu.memory_space<vmem>>, vector<1x16xf32>
    %180 = vector.broadcast %179 : vector<1x16xf32> to vector<2x16xf32>
    %181 = arith.addf %178, %180 : vector<2x16xf32>
    %cst_184 = arith.constant 0.000000e+00 : f32
    %182 = vector.broadcast %cst_184 : f32 to vector<2x16xf32>
    %183 = arith.cmpf ogt, %181, %182 : vector<2x16xf32>
    %cst_185 = arith.constant 2.000000e-01 : f32
    %184 = vector.broadcast %cst_185 : f32 to vector<2x16xf32>
    %185 = arith.mulf %184, %181 : vector<2x16xf32>
    %186 = arith.select %183, %181, %185 : vector<2x16xi1>, vector<2x16xf32>
    %c0_186 = arith.constant 0 : index
    %c0_187 = arith.constant 0 : index
    %187 = vector.load %arg25[%c0_186, %c0_187] : memref<1x16xf32, #tpu.memory_space<vmem>>, vector<1x16xf32>
    %188 = vector.broadcast %187 : vector<1x16xf32> to vector<2x16xf32>
    %189 = arith.mulf %186, %188 : vector<2x16xf32>
    %cst_188 = arith.constant dense<0.000000e+00> : vector<2xf32>
    %190 = vector.multi_reduction <add>, %189, %cst_188 [1] : vector<2x16xf32> to vector<2xf32>
    %191 = vector.shape_cast %190 : vector<2xf32> to vector<2x1xf32>
    %c0_189 = arith.constant 0 : index
    %c0_190 = arith.constant 0 : index
    %192 = vector.load %arg26[%c0_189, %c0_190] : memref<1x1xf32, #tpu.memory_space<vmem>>, vector<1x1xf32>
    %193 = vector.broadcast %192 : vector<1x1xf32> to vector<2x1xf32>
    %194 = arith.addf %191, %193 : vector<2x1xf32>
    %c0_191 = arith.constant 0 : index
    %c0_192 = arith.constant 0 : index
    %195 = vector.load %arg27[%c0_191, %c0_192] : memref<2x1xf32, #tpu.memory_space<vmem>>, vector<2x1xf32>
    tpu.vector_store %arg27[%c0_191, %c0_192], %194 {strides = array<i32>} : memref<2x1xf32, #tpu.memory_space<vmem>>, vector<2x1xf32>,
    return
  }
}

</mosaic_0001>

<bundles_post_ra>
// kernel: fused_apply.1
= control target key start
LH: loop header
LB: loop body
LE: loop exit
PB: predicated region body
PF: predicated region fallthrough
CT: control target
= control target key end

     0   :  { %s8901_s0 = inlined_call_operand.vmem [shape: f32[56,84], index: 0, kind: input, shape index: {}]   ;;  %s8902_s1 = inlined_call_operand.hbm [shape: f32[84,112], index: 1, kind: input, shape index: {}]   ;;  %s8903_s2 = inlined_call_operand.vmem [shape: f32[1,112], index: 2, kind: input, shape index: {}]   ;;  %s8904_s3 = inlined_call_operand.hbm [shape: f32[2,56,56], index: 3, kind: input, shape index: {}]   ;;  %s8905_s4 = inlined_call_operand.vmem [shape: f32[3,112,112], index: 4, kind: input, shape index: {}]   ;;  %s8906_s5 = inlined_call_operand.hbm [shape: f32[1,112], index: 5, kind: input, shape index: {}]   ;;  %s8907_s6 = inlined_call_operand.vmem [shape: f32[3,112,112], index: 6, kind: input, shape index: {}]   ;;  %s8908_s7 = inlined_call_operand.hbm [shape: f32[3,28,56], index: 7, kind: input, shape index: {}]   ;;  %s8909_s8 = inlined_call_operand.vmem [shape: f32[3,112,112], index: 8, kind: input, shape index: {}]   ;;  %s8910_s9 = inlined_call_operand.hbm [shape: f32[1,112], index: 9, kind: input, shape index: {}]   ;;  %s8911_s10 = inlined_call_operand.vmem [shape: f32[2,28,28], index: 10, kind: input, shape index: {}]   ;;  %s8912_s11 = inlined_call_operand.hbm [shape: f32[3,112,112], index: 11, kind: input, shape index: {}]   ;;  %s8913_s12 = inlined_call_operand.vmem [shape: f32[1,112], index: 12, kind: input, shape index: {}]   ;;  %s8914_s13 = inlined_call_operand.hbm [shape: f32[3,112,112], index: 13, kind: input, shape index: {}]   ;;  %s8915_s14 = inlined_call_operand.hbm [shape: f32[3,14,28], index: 14, kind: input, shape index: {}]   ;;  %s8916_s15 = inlined_call_operand.hbm [shape: f32[3,112,112], index: 15, kind: input, shape index: {}]   ;;  %s8917_s16 = inlined_call_operand.hbm [shape: f32[1,112], index: 16, kind: input, shape index: {}]   ;;  %s8918_s17 = inlined_call_operand.vmem [shape: f32[2,14,14], index: 17, kind: input, shape index: {}]   ;;  %s8919_s18 = inlined_call_operand.hbm [shape: f32[3,112,112], index: 18, kind: input, shape index: {}]   ;;  %s8920_s19 = inlined_call_operand.hbm [shape: f32[1,112], index: 19, kind: input, shape index: {}]   ;;  %s8921_s20 = inlined_call_operand.hbm [shape: f32[112,112], index: 20, kind: input, shape index: {}]   ;;  %s8922_s21 = inlined_call_operand.hbm [shape: f32[14,112], index: 21, kind: input, shape index: {}]   ;;  %s8923_s22 = inlined_call_operand.vmem [shape: f32[112,16], index: 22, kind: input, shape index: {}]   ;;  %s8924_s23 = inlined_call_operand.hbm [shape: f32[2,14], index: 23, kind: input, shape index: {}]   ;;  %s8925_s24 = inlined_call_operand.hbm [shape: f32[1,16], index: 24, kind: input, shape index: {}]   ;;  %s8926_s25 = inlined_call_operand.hbm [shape: f32[1,16], index: 25, kind: input, shape index: {}]   ;;  %s8927_s26 = inlined_call_operand.<no memory space> [shape: f32[1,1], index: 26, kind: input, shape index: {}]   ;;  %s8928_s27 = inlined_call_operand.vmem [shape: f32[2,1], index: 27, kind: output, shape index: {}]  }
   0x1   :  { %8934 = sst [smem:[#allocation38_spill]] %s8901_s0  ;;  %v32_v0 = vstv %s8927_s26 }
   0x2   :  { %8935 = sst [smem:[#allocation39_spill]] %s8902_s1  ;;  %33 = vst [vmem:[#allocation2] sm:$0x1] %v32_v0 }
   0x3   :  { %8936 = sst [smem:[#allocation40_spill]] %s8903_s2 }
   0x4   :  { %8937 = sst [smem:[#allocation41_spill]] %s8904_s3 }
   0x5   :  { %8938 = sst [smem:[#allocation42_spill]] %s8905_s4 }
   0x6   :  { %8939 = sst [smem:[#allocation43_spill]] %s8906_s5 }
   0x7   :  { %8940 = sst [smem:[#allocation44_spill]] %s8907_s6 }
   0x8   :  { %8941 = sst [smem:[#allocation45_spill]] %s8908_s7 }
   0x9   :  { %8942 = sst [smem:[#allocation46_spill]] %s8909_s8 }
   0xa   :  { %8943 = sst [smem:[#allocation47_spill]] %s8910_s9 }
   0xb   :  { %8944 = sst [smem:[#allocation48_spill]] %s8911_s10 }
   0xc   :  { %8945 = sst [smem:[#allocation49_spill]] %s8912_s11 }
   0xd   :  { %34 = vsyncpa [#allocation4], 0 }
   0xe   :  { %35 = vsyncpa [#allocation6], 0 }
   0xf   :  { %36 = vsyncpa [#allocation9], 0 }
  0x10   :  { %37 = vsyncpa [#allocation12], 0 }
  0x11   :  { %38 = vsyncpa [#allocation15], 0 }
  0x12   :  { %39 = vsyncpa [#allocation18], 0 }
  0x13   :  { %40 = vsyncpa [#allocation21], 0 }
  0x14   :  { %41 = vsyncpa [#allocation24], 0 }
  0x15   :  { %42 = vsyncpa [#allocation27], 0  ;;  %s7304_s8 = smov [#allocation5]   ;;  %s7305_s9 = smov [#allocation8]  }
  0x16   :  { %s64_s30 = sshll.u32 %s7304_s8, 4  ;;  %s90_s5 = sshll.u32 %s7305_s9, 4  ;;  %s65_s30 = int_to_ptr.vmem [resolvable:$true] %s64_s30  ;;  %s91_s5 = int_to_ptr.vmem [resolvable:$true] %s90_s5 }
  0x17   :  { %s6954_s28 = scalar_lea.vmem %s65_s30, 1792  ;;  %p6959_p1 = scmp.lt.s32.totalorder %s65_s30, %s65_s30 }
  0x18   :  { %p6955_p0 = scmp.ne.s32.totalorder %s65_s30, %s6954_s28  ;;  %p6960_p2 = scmp.lt.s32.totalorder %s6954_s28, %s6954_s28 }
  0x1a   :  { %p6961_p3 = por %p6960_p2, %p6959_p1 }
  0x1c   :  { %p6962_p4 = pnand %p6961_p3, %p6955_p0 }
  0x1e   :  { %6965 = shalt.err (!%p6962_p4)
}
  0x1f   :  { %s7306_s26 = smov 128   ;;  %s7307_s0 = smov 8  }
  0x20   :  { %s8946_s1 = sld [smem:[#allocation41_spill]]  ;;  %s6974_s6 = scalar_lea.vmem %s91_s5, 1536 }
  0x21   :  { %p6975_p5 = scmp.ne.s32.totalorder %s91_s5, %s6974_s6  ;;  %p6979_p6 = scmp.lt.s32.totalorder %s91_s5, %s91_s5 }
  0x22   :  { %p6980_p7 = scmp.lt.s32.totalorder %s6974_s6, %s6974_s6 }
  0x24   :  { %p6981_p8 = por %p6980_p7, %p6979_p6 }
  0x26   :  { %70 = dma.hbm_to_vmem [thread:$0]  %s8946_s1, 1792, %s65_s30, [#allocation6], %s7306_s26, %s7306_s26, %s7307_s0  }
  0x27   :  { %p6982_p9 = pnand %p6981_p8, %p6975_p5 }
  0x29   :  { %6985 = shalt.err (!%p6982_p9)
}
  0x2a   :  { %s8947_s3 = sld [smem:[#allocation45_spill]]  ;;  %s7308_s7 = smov [#allocation11]  }
  0x2b   :  { %s116_s4 = sshll.u32 %s7308_s7, 4  ;;  %s7309_s8 = smov [#allocation14]   ;;  %s117_s4 = int_to_ptr.vmem [resolvable:$true] %s116_s4 }
  0x2c   :  { %s142_s9 = sshll.u32 %s7309_s8, 4  ;;  %s6994_s30 = scalar_lea.vmem %s117_s4, 5376  ;;  %s143_s9 = int_to_ptr.vmem [resolvable:$true] %s142_s9 }
  0x2d   :  { %p6995_p10 = scmp.ne.s32.totalorder %s117_s4, %s6994_s30  ;;  %p6999_p11 = scmp.lt.s32.totalorder %s117_s4, %s117_s4 }
  0x2e   :  { %p7000_p12 = scmp.lt.s32.totalorder %s6994_s30, %s6994_s30 }
  0x30   :  { %96 = dma.hbm_to_vmem [thread:$0]  %s8947_s3, 1536, %s91_s5, [#allocation9], %s7306_s26, %s7306_s26, %s7307_s0  }
  0x31   :  { %p7001_p13 = por %p7000_p12, %p6999_p11 }
  0x33   :  { %p7002_p0 = pnand %p7001_p13, %p6995_p10 }
  0x35   :  { %7005 = shalt.err (!%p7002_p0)
}
  0x36   :  { %s8948_s29 = sld [smem:[#allocation49_spill]]  ;;  %s7014_s5 = scalar_lea.vmem %s143_s9, 768 }
  0x37   :  { %p7015_p1 = scmp.ne.s32.totalorder %s143_s9, %s7014_s5  ;;  %p7019_p2 = scmp.lt.s32.totalorder %s143_s9, %s143_s9 }
  0x38   :  { %p7020_p3 = scmp.lt.s32.totalorder %s7014_s5, %s7014_s5 }
  0x3a   :  { %p7021_p4 = por %p7020_p3, %p7019_p2 }
  0x3c   :  { %122 = dma.hbm_to_vmem [thread:$0]  %s8948_s29, 5376, %s117_s4, [#allocation12], %s7306_s26, %s7306_s26, %s7307_s0  }
  0x3d   :  { %p7022_p5 = pnand %p7021_p4, %p7015_p1 }
  0x3f   :  { %7025 = shalt.err (!%p7022_p5)
}
  0x40   :  { %148 = dma.hbm_to_vmem [thread:$0]  %s8915_s14, 768, %s143_s9, [#allocation15], %s7306_s26, %s7306_s26, %s7307_s0  }
  0x41   :  { %s7310_s11 = smov [#allocation17]   ;;  %s7311_s3 = smov [#allocation20]  }
  0x42   :  { %s167_s2 = sshll.u32 %s7310_s11, 4  ;;  %s191_s7 = sshll.u32 %s7311_s3, 4  ;;  %s168_s2 = int_to_ptr.vmem [resolvable:$true] %s167_s2  ;;  %s192_s7 = int_to_ptr.vmem [resolvable:$true] %s191_s7 }
  0x43   :  { %s7034_s4 = scalar_lea.vmem %s168_s2, 16  ;;  %s7038_s8 = scalar_lea.vmem %s168_s2, 32 }
  0x44   :  { %p7035_p6 = scmp.ne.s32.totalorder %s168_s2, %s7034_s4  ;;  %p7039_p7 = scmp.lt.s32.totalorder %s168_s2, %s168_s2 }
  0x45   :  { %p7040_p8 = scmp.lt.s32.totalorder %s7038_s8, %s7034_s4 }
  0x47   :  { %p7041_p9 = por %p7040_p8, %p7039_p7 }
  0x49   :  { %p7042_p10 = pnand %p7041_p9, %p7035_p6 }
  0x4b   :  { %7045 = shalt.err (!%p7042_p10)
}
  0x4c   :  { %170 = dma.hbm_to_vmem [thread:$0]  %s8917_s16, 16, %s168_s2, [#allocation18]  }
  0x4d   :  { %s7054_s10 = scalar_lea.vmem %s192_s7, 16  ;;  %s7058_s14 = scalar_lea.vmem %s192_s7, 32 }
  0x4e   :  { %p7055_p11 = scmp.ne.s32.totalorder %s192_s7, %s7054_s10  ;;  %p7059_p12 = scmp.lt.s32.totalorder %s192_s7, %s192_s7 }
  0x4f   :  { %p7060_p13 = scmp.lt.s32.totalorder %s7058_s14, %s7054_s10 }
  0x51   :  { %p7061_p0 = por %p7060_p13, %p7059_p12 }
  0x53   :  { %p7062_p1 = pnand %p7061_p0, %p7055_p11 }
  0x55   :  { %7065 = shalt.err (!%p7062_p1)
}
  0x56   :  { %194 = dma.hbm_to_vmem [thread:$0]  %s8920_s19, 16, %s192_s7, [#allocation21]  }
  0x57   :  { %s7312_s5 = smov [#allocation23]   ;;  %s7313_s6 = smov [#allocation26]  }
  0x58   :  { %s212_s1 = sshll.u32 %s7312_s5, 4  ;;  %s237_s11 = sshll.u32 %s7313_s6, 4  ;;  %s213_s1 = int_to_ptr.vmem [resolvable:$true] %s212_s1  ;;  %s238_s11 = int_to_ptr.vmem [resolvable:$true] %s237_s11 }
  0x59   :  { %s7074_s3 = scalar_lea.vmem %s213_s1, 256  ;;  %p7079_p3 = scmp.lt.s32.totalorder %s213_s1, %s213_s1 }
  0x5a   :  { %p7075_p2 = scmp.ne.s32.totalorder %s213_s1, %s7074_s3  ;;  %p7080_p4 = scmp.lt.s32.totalorder %s7074_s3, %s7074_s3 }
  0x5c   :  { %p7081_p5 = por %p7080_p4, %p7079_p3 }
  0x5e   :  { %p7082_p6 = pnand %p7081_p5, %p7075_p2 }
  0x60   :  { %7085 = shalt.err (!%p7082_p6)
}
  0x61   :  { %218 = dma.hbm_to_vmem [thread:$0]  %s8922_s21, 256, %s213_s1, [#allocation24], %s7306_s26, %s7306_s26, %s7307_s0  }
  0x62   :  { %s7094_s19 = scalar_lea.vmem %s238_s11, 16  ;;  %s7098_s7 = scalar_lea.vmem %s238_s11, 32 }
  0x63   :  { %p7095_p7 = scmp.ne.s32.totalorder %s238_s11, %s7094_s19  ;;  %p7099_p8 = scmp.lt.s32.totalorder %s238_s11, %s238_s11 }
  0x64   :  { %p7100_p9 = scmp.lt.s32.totalorder %s7098_s7, %s7094_s19 }
  0x66   :  { %p7101_p10 = por %p7100_p9, %p7099_p8 }
  0x68   :  { %p7102_p11 = pnand %p7101_p10, %p7095_p7 }
  0x6a   :  { %7105 = shalt.err (!%p7102_p11)
}
  0x6b   :  { %240 = dma.hbm_to_vmem [thread:$0]  %s8925_s24, 16, %s238_s11, [#allocation27]  }
  0x6c   :  { %s7314_s30 = smov [#allocation3]   ;;  %s7315_s10 = smov [#allocation7]  }
  0x6d   :  { %s50_s28 = sshll.u32 %s7314_s30, 4  ;;  %s79_s14 = sshll.u32 %s7315_s10, 4  ;;  %s51_s28 = int_to_ptr.vmem [resolvable:$true] %s50_s28  ;;  %s80_s14 = int_to_ptr.vmem [resolvable:$true] %s79_s14 }
  0x6e   :  { %s7114_s9 = scalar_lea.vmem %s51_s28, 1408  ;;  %p7119_p13 = scmp.lt.s32.totalorder %s51_s28, %s51_s28 }
  0x6f   :  { %p7115_p12 = scmp.ne.s32.totalorder %s51_s28, %s7114_s9  ;;  %p7120_p0 = scmp.lt.s32.totalorder %s7114_s9, %s7114_s9 }
  0x71   :  { %p7121_p1 = por %p7120_p0, %p7119_p13 }
  0x73   :  { %p7122_p2 = pnand %p7121_p1, %p7115_p12 }
  0x75   :  { %7125 = shalt.err (!%p7122_p2)
}
  0x76   :  { %s8949_s5 = sld [smem:[#allocation39_spill]]  ;;  %s7134_s24 = scalar_lea.vmem %s80_s14, 16 }
  0x77   :  { %p7135_p3 = scmp.ne.s32.totalorder %s80_s14, %s7134_s24  ;;  %s7138_s1 = scalar_lea.vmem %s80_s14, 32 }
  0x78   :  { %p7139_p4 = scmp.lt.s32.totalorder %s80_s14, %s80_s14  ;;  %p7140_p5 = scmp.lt.s32.totalorder %s7138_s1, %s7134_s24 }
  0x7a   :  { %p7141_p6 = por %p7140_p5, %p7139_p4 }
  0x7c   :  { %56 = dma.hbm_to_vmem [thread:$0]  %s8949_s5, 1408, %s51_s28, [#allocation4], %s7306_s26, %s7306_s26, %s7307_s0  }
  0x7d   :  { %p7142_p7 = pnand %p7141_p6, %p7135_p3 }
  0x7f   :  { %7145 = shalt.err (!%p7142_p7)
}
  0x80   :  { %s8950_s3 = sld [smem:[#allocation43_spill]]  ;;  %s7316_s16 = smov [#allocation10]  }
  0x81   :  { %s105_s2 = sshll.u32 %s7316_s16, 4  ;;  %s7317_s19 = smov [#allocation13]   ;;  %s106_s2 = int_to_ptr.vmem [resolvable:$true] %s105_s2 }
  0x82   :  { %s130_s7 = sshll.u32 %s7317_s19, 4  ;;  %s7154_s4 = scalar_lea.vmem %s106_s2, 16  ;;  %s131_s7 = int_to_ptr.vmem [resolvable:$true] %s130_s7 }
  0x83   :  { %p7155_p8 = scmp.ne.s32.totalorder %s106_s2, %s7154_s4  ;;  %s7158_s8 = scalar_lea.vmem %s106_s2, 32 }
  0x84   :  { %p7159_p9 = scmp.lt.s32.totalorder %s106_s2, %s106_s2  ;;  %p7160_p10 = scmp.lt.s32.totalorder %s7158_s8, %s7154_s4 }
  0x86   :  { %82 = dma.hbm_to_vmem [thread:$0]  %s8950_s3, 16, %s80_s14, [#allocation6]  }
  0x87   :  { %p7161_p11 = por %p7160_p10, %p7159_p9 }
  0x89   :  { %p7162_p12 = pnand %p7161_p11, %p7155_p8 }
  0x8b   :  { %7165 = shalt.err (!%p7162_p12)
}
  0x8c   :  { %s8951_s10 = sld [smem:[#allocation47_spill]]  ;;  %s7174_s9 = scalar_lea.vmem %s131_s7, 5376 }
  0x8d   :  { %p7175_p13 = scmp.ne.s32.totalorder %s131_s7, %s7174_s9  ;;  %p7179_p0 = scmp.lt.s32.totalorder %s131_s7, %s131_s7 }
  0x8e   :  { %p7180_p1 = scmp.lt.s32.totalorder %s7174_s9, %s7174_s9 }
  0x90   :  { %p7181_p2 = por %p7180_p1, %p7179_p0 }
  0x92   :  { %108 = dma.hbm_to_vmem [thread:$0]  %s8951_s10, 16, %s106_s2, [#allocation9]  }
  0x93   :  { %p7182_p3 = pnand %p7181_p2, %p7175_p13 }
  0x95   :  { %7185 = shalt.err (!%p7182_p3)
}
  0x96   :  { %136 = dma.hbm_to_vmem [thread:$0]  %s8914_s13, 5376, %s131_s7, [#allocation12], %s7306_s26, %s7306_s26, %s7307_s0  }
  0x97   :  { %s7318_s29 = smov [#allocation16]   ;;  %s7319_s24 = smov [#allocation19]  }
  0x98   :  { %s154_s5 = sshll.u32 %s7318_s29, 4  ;;  %s178_s1 = sshll.u32 %s7319_s24, 4  ;;  %s155_s5 = int_to_ptr.vmem [resolvable:$true] %s154_s5  ;;  %s179_s1 = int_to_ptr.vmem [resolvable:$true] %s178_s1 }
  0x99   :  { %s7194_s6 = scalar_lea.vmem %s155_s5, 5376  ;;  %p7199_p5 = scmp.lt.s32.totalorder %s155_s5, %s155_s5 }
  0x9a   :  { %p7195_p4 = scmp.ne.s32.totalorder %s155_s5, %s7194_s6  ;;  %p7200_p6 = scmp.lt.s32.totalorder %s7194_s6, %s7194_s6 }
  0x9c   :  { %p7201_p7 = por %p7200_p6, %p7199_p5 }
  0x9e   :  { %p7202_p8 = pnand %p7201_p7, %p7195_p4 }
  0xa0   :  { %7205 = shalt.err (!%p7202_p8)
}
  0xa1   :  { %160 = dma.hbm_to_vmem [thread:$0]  %s8916_s15, 5376, %s155_s5, [#allocation15], %s7306_s26, %s7306_s26, %s7307_s0  }
  0xa2   :  { %s7214_s13 = scalar_lea.vmem %s179_s1, 5376  ;;  %p7219_p10 = scmp.lt.s32.totalorder %s179_s1, %s179_s1 }
  0xa3   :  { %p7215_p9 = scmp.ne.s32.totalorder %s179_s1, %s7214_s13  ;;  %p7220_p11 = scmp.lt.s32.totalorder %s7214_s13, %s7214_s13 }
  0xa5   :  { %p7221_p12 = por %p7220_p11, %p7219_p10 }
  0xa7   :  { %p7222_p13 = pnand %p7221_p12, %p7215_p9 }
  0xa9   :  { %7225 = shalt.err (!%p7222_p13)
}
  0xaa   :  { %184 = dma.hbm_to_vmem [thread:$0]  %s8919_s18, 5376, %s179_s1, [#allocation18], %s7306_s26, %s7306_s26, %s7307_s0  }
  0xab   :  { %s7320_s19 = smov [#allocation22]   ;;  %s7321_s4 = smov [#allocation25]  }
  0xac   :  { %s200_s7 = sshll.u32 %s7320_s19, 4  ;;  %s227_s8 = sshll.u32 %s7321_s4, 4  ;;  %s201_s7 = int_to_ptr.vmem [resolvable:$true] %s200_s7  ;;  %s228_s8 = int_to_ptr.vmem [resolvable:$true] %s227_s8 }
  0xad   :  { %s7234_s15 = scalar_lea.vmem %s201_s7, 1792  ;;  %p7239_p1 = scmp.lt.s32.totalorder %s201_s7, %s201_s7 }
  0xae   :  { %p7235_p0 = scmp.ne.s32.totalorder %s201_s7, %s7234_s15  ;;  %p7240_p2 = scmp.lt.s32.totalorder %s7234_s15, %s7234_s15 }
  0xb0   :  { %p7241_p3 = por %p7240_p2, %p7239_p1 }
  0xb2   :  { %p7242_p4 = pnand %p7241_p3, %p7235_p0 }
  0xb4   :  { %7245 = shalt.err (!%p7242_p4)
}
  0xb5   :  { %206 = dma.hbm_to_vmem [thread:$0]  %s8921_s20, 1792, %s201_s7, [#allocation21], %s7306_s26, %s7306_s26, %s7307_s0  }
  0xb6   :  { %s7254_s18 = scalar_lea.vmem %s228_s8, 32  ;;  %p7259_p6 = scmp.lt.s32.totalorder %s228_s8, %s228_s8 }
  0xb7   :  { %p7255_p5 = scmp.ne.s32.totalorder %s228_s8, %s7254_s18  ;;  %p7260_p7 = scmp.lt.s32.totalorder %s7254_s18, %s7254_s18 }
  0xb9   :  { %p7261_p8 = por %p7260_p7, %p7259_p6 }
  0xbb   :  { %p7262_p9 = pnand %p7261_p8, %p7255_p5 }
  0xbd   :  { %7265 = shalt.err (!%p7262_p9)
}
  0xbe   :  { %230 = dma.hbm_to_vmem [thread:$0]  %s8924_s23, 32, %s228_s8, [#allocation24]  }
  0xbf   :  { %s7322_s14 = smov [#allocation28]  }
  0xc0   :  { %s247_s21 = sshll.u32 %s7322_s14, 4  ;;  %s248_s21 = int_to_ptr.vmem [resolvable:$true] %s247_s21 }
  0xc1   :  { %s7274_s29 = scalar_lea.vmem %s248_s21, 16  ;;  %s7278_s5 = scalar_lea.vmem %s248_s21, 32 }
  0xc2   :  { %p7275_p10 = scmp.ne.s32.totalorder %s248_s21, %s7274_s29  ;;  %p7279_p11 = scmp.lt.s32.totalorder %s248_s21, %s248_s21 }
  0xc3   :  { %p7280_p12 = scmp.lt.s32.totalorder %s7278_s5, %s7274_s29 }
  0xc5   :  { %p7281_p13 = por %p7280_p12, %p7279_p11 }
  0xc7   :  { %p7282_p0 = pnand %p7281_p13, %p7275_p10 }
  0xc9   :  { %7285 = shalt.err (!%p7282_p0)
}
  0xca   :  { %250 = dma.hbm_to_vmem [thread:$0]  %s8926_s25, 16, %s248_s21, [#allocation27]  }
  0xcb   :  { %7286 = dma.done.wait [#allocation4], 1408  }
  0xcc   :  { %7287 = vsyncadd [#allocation4], 4294965888 }
  0xcd   :  { %7288 = dma.done.wait [#allocation6], 1808  }
  0xce   :  { %7289 = vsyncadd [#allocation6], 4294965488 }
  0xcf   :  { %7290 = dma.done.wait [#allocation9], 1552  }
  0xd0   :  { %7291 = vsyncadd [#allocation9], 4294965744 }
  0xd1   :  { %7292 = dma.done.wait [#allocation12], 10752  }
  0xd2   :  { %7293 = vsyncadd [#allocation12], 4294956544 }
  0xd3   :  { %7294 = dma.done.wait [#allocation15], 6144  }
  0xd4   :  { %7295 = vsyncadd [#allocation15], 4294961152 }
  0xd5   :  { %7296 = dma.done.wait [#allocation18], 5392  }
  0xd6   :  { %7297 = vsyncadd [#allocation18], 4294961904 }
  0xd7   :  { %7298 = dma.done.wait [#allocation21], 1808  }
  0xd8   :  { %7299 = vsyncadd [#allocation21], 4294965488 }
  0xd9   :  { %7300 = dma.done.wait [#allocation24], 288  }
  0xda   :  { %7301 = vsyncadd [#allocation24], 4294967008 }
  0xdb   :  { %7302 = dma.done.wait [#allocation27], 32  }
  0xdc   :  { %7303 = vsyncadd [#allocation27], 4294967264  ;;  %v7323_v1 = vmov 0.0   ;;  %vm7324_vm0 = vmmov 0   ;;  %vm351_vm1 = vcmask 1043456   ;;  %v320_v3 = vld [vmem:[#allocation3 + $0x48] sm:$0xff] }
  0xdd   :  { %5724 = vmatprep.subr.mxu0 %v7323_v1  ;;  %5746 = vmatprep.mubr.msk.f32.mxu0 %vm7324_vm0, %v7323_v1  ;;  %v321_v2 = vld [vmem:[#allocation3 + $0x50] sm:$0xf]  ;;  %v319_v4 = vld [vmem:[#allocation3 + $0x40] sm:$0xff]  ;;  %v318_v5 = vld [vmem:[#allocation3 + $0x38] sm:$0xff]  ;;  %s8952_s0 = sld [smem:[#allocation38_spill]]  ;;  %vm329_vm2 = vcmask 687104  }
  0xde   :  { %5767 = vmatprep.subr.mxu1 %v7323_v1  ;;  %5781 = vmatprep.mubr.msk.f32.mxu1 %vm7324_vm0, %v7323_v1  ;;  %v317_v6 = vld [vmem:[#allocation3 + $0x30] sm:$0xff]  ;;  %v316_v7 = vld [vmem:[#allocation3 + $0x28] sm:$0xff]  ;;  %v315_v8 = vld [vmem:[#allocation3 + $0x20] sm:$0xff]  ;;  %s8953_s6 = sld [smem:[#allocation42_spill]]  ;;  %vm613_vm3 = vcmask 916480   ;;  %vm477_vm4 = vcmask 457728  }
  0xdf   :  { %5725 = vmatpush3.msk.msra.mxu0 %vm351_vm1, %v321_v2  ;;  %v314_v9 = vld [vmem:[#allocation3 + $0x18] sm:$0xff]  ;;  %v313_v10 = vld [vmem:[#allocation3 + $0x10] sm:$0xff]  ;;  %v312_v11 = vld [vmem:[#allocation3 + $0x8] sm:$0xff]  ;;  %s8954_s9 = sld [smem:[#allocation40_spill]]  ;;  %vm2463_vm12 = vcmask 228352  }
  0xe0   :  { %5726 = vmatprep.subr.mxu0 %v7323_v1  ;;  %v311_v12 = vld [vmem:[#allocation3] sm:$0xff]  ;;  %v7721_v56 = vld [vmem:[#allocation5] sm:$0xff]  ;;  %v7736_v58 = vld [vmem:[#allocation5 + $0x10] sm:$0xff]  ;;  %s8955_s26 = sld [smem:[#allocation44_spill]] }
  0xe1   :  { %5727 = vmatpush3.msra.mxu0 %v320_v3  ;;  %v7730_v57 = vld [vmem:[#allocation5 + $0x8] sm:$0xff]  ;;  %v7742_v59 = vld [vmem:[#allocation5 + $0x18] sm:$0xff]  ;;  %v7748_v60 = vld [vmem:[#allocation5 + $0x20] sm:$0xff]  ;;  %s8956_s13 = sld [smem:[#allocation46_spill]] }
  0xe2   :  { %5728 = vmatprep.subr.mxu0 %v7323_v1  ;;  %v7754_v61 = vld [vmem:[#allocation5 + $0x28] sm:$0xff]  ;;  %v7760_v62 = vld [vmem:[#allocation5 + $0x30] sm:$0xff]  ;;  %s8957_s4 = sld [smem:[#allocation48_spill]] }
  0xe3   :  { %5729 = vmatpush3.msra.mxu0 %v319_v4  ;;  %v304_v13 = vld [vmem:[%s8952_s0] sm:$0xff]  ;;  %v305_v16 = vld [vmem:[%s8952_s0 + $0x8] sm:$0xff]  ;;  %v306_v19 = vld [vmem:[%s8952_s0 + $0x10] sm:$0xff] }
  0xe4   :  { %5730 = vmatprep.subr.mxu0 %v7323_v1  ;;  %v4886_v14 = vld [vmem:[%s8953_s6 + $0xd8] sm:$0xff]  ;;  %v4885_v15 = vld [vmem:[%s8953_s6 + $0xd0] sm:$0xff]  ;;  %v4884_v17 = vld [vmem:[%s8953_s6 + $0xc8] sm:$0xff] }
  0xe5   :  { %5731 = vmatpush3.msra.mxu0 %v318_v5  ;;  %v4883_v18 = vld [vmem:[%s8953_s6 + $0xc0] sm:$0xff]  ;;  %v4882_v20 = vld [vmem:[%s8953_s6 + $0xb8] sm:$0xff]  ;;  %v4881_v21 = vld [vmem:[%s8953_s6 + $0xb0] sm:$0xff] }
  0xe6   :  { %5732 = vmatprep.subr.mxu0 %v7323_v1  ;;  %v307_v22 = vld [vmem:[%s8952_s0 + $0x18] sm:$0xff]  ;;  %v4880_v23 = vld [vmem:[%s8953_s6 + $0xa8] sm:$0xff]  ;;  %v4879_v24 = vld [vmem:[%s8953_s6 + $0xa0] sm:$0xff] }
  0xe7   :  { %5733 = vmatpush3.msra.mxu0 %v317_v6  ;;  %v308_v25 = vld [vmem:[%s8952_s0 + $0x20] sm:$0xff]  ;;  %v4878_v26 = vld [vmem:[%s8953_s6 + $0x98] sm:$0xff]  ;;  %v4877_v27 = vld [vmem:[%s8953_s6 + $0x90] sm:$0xff] }
  0xe8   :  { %5734 = vmatprep.subr.mxu0 %v7323_v1  ;;  %v309_v28 = vld [vmem:[%s8952_s0 + $0x28] sm:$0xff]  ;;  %v4875_v30 = vld [vmem:[%s8953_s6 + $0x80] sm:$0xff]  ;;  %v310_v31 = vld [vmem:[%s8952_s0 + $0x30] sm:$0xff] }
  0xe9   :  { %5735 = vmatpush3.msra.mxu0 %v316_v7  ;;  %v4876_v29 = vld [vmem:[%s8953_s6 + $0x88] sm:$0xff]  ;;  %v4874_v32 = vld [vmem:[%s8953_s6 + $0x78] sm:$0xff]  ;;  %v4873_v33 = vld [vmem:[%s8953_s6 + $0x70] sm:$0xff] }
  0xea   :  { %5736 = vmatprep.subr.mxu0 %v7323_v1  ;;  %v4864_v34 = vld [vmem:[%s8954_s9] ss:$0 sm:$0xff]  ;;  %v612_v63 = vld [vmem:[%s8953_s6 + $0x68] sm:$0xff]  ;;  %v610_v2 = vld [vmem:[%s8953_s6 + $0x58] sm:$0xff] }
  0xeb   :  { %5737 = vmatpush3.msra.mxu0 %v315_v8  ;;  %v611_v0 = vld [vmem:[%s8953_s6 + $0x60] sm:$0xff]  ;;  %v609_v3 = vld [vmem:[%s8953_s6 + $0x50] sm:$0xff]  ;;  %v608_v4 = vld [vmem:[%s8953_s6 + $0x48] sm:$0xff] }
  0xec   :  { %5738 = vmatprep.subr.mxu0 %v7323_v1  ;;  %v607_v5 = vld [vmem:[%s8953_s6 + $0x40] sm:$0xff]  ;;  %v606_v6 = vld [vmem:[%s8953_s6 + $0x38] sm:$0xff]  ;;  %v605_v7 = vld [vmem:[%s8953_s6 + $0x30] sm:$0xff] }
  0xed   :  { %5739 = vmatpush3.msra.mxu0 %v314_v9  ;;  %v604_v8 = vld [vmem:[%s8953_s6 + $0x28] sm:$0xff]  ;;  %v603_v9 = vld [vmem:[%s8953_s6 + $0x20] sm:$0xff] }
  0xee   :  { %5740 = vmatprep.subr.mxu0 %v7323_v1 }
  0xef   :  { %5741 = vmatpush3.msra.mxu0 %v313_v10  ;;  %v602_v10 = vld [vmem:[%s8953_s6 + $0x18] sm:$0xff] }
  0xf0   :  { %5742 = vmatprep.subr.mxu0 %v7323_v1 }
  0xf1   :  { %5743 = vmatpush3.msra.mxu0 %v312_v11  ;;  %v601_v11 = vld [vmem:[%s8953_s6 + $0x10] sm:$0xff] }
  0xf2   :  { %5744 = vmatprep.subr.mxu0 %v7323_v1 }
  0xf3   :  { %5745 = vmatpush3.msra.mxu0 %v311_v12  ;;  %v600_v12 = vld [vmem:[%s8953_s6 + $0x8] sm:$0xff] }
  0xf4   :  { %5747 = vmatmul.mubr.msk.f32.vlgmr.msra.gmra.mxu0 %vm329_vm2, %v304_v13  ;;  %5851 = vmatprep.subr.mxu0 %v7323_v1  ;;  %v599_v13 = vld [vmem:[%s8953_s6] sm:$0xff] }
  0xf5   :  { %5749 = vmatprep.mubr.msk.f32.mxu0 %vm7324_vm0, %v7323_v1  ;;  %5852 = vmatpush3.msra.mxu0 %v4886_v14 }
  0xf6   :  { %5853 = vmatprep.subr.mxu0 %v7323_v1 }
  0xf7   :  { %5854 = vmatpush3.msra.mxu0 %v4885_v15 }
  0xf8   :  { %5750 = vmatmul.mubr.msk.f32.gmra.mxu0 %vm329_vm2, %v305_v16  ;;  %5855 = vmatprep.subr.mxu0 %v7323_v1 }
  0xf9   :  { %5752 = vmatprep.mubr.msk.f32.mxu0 %vm7324_vm0, %v7323_v1  ;;  %5856 = vmatpush3.msra.mxu0 %v4884_v17 }
  0xfa   :  { %5857 = vmatprep.subr.mxu0 %v7323_v1 }
  0xfb   :  { %5858 = vmatpush3.msra.mxu0 %v4883_v18 }
  0xfc   :  { %5753 = vmatmul.mubr.msk.f32.gmra.mxu0 %vm329_vm2, %v306_v19  ;;  %5859 = vmatprep.subr.mxu0 %v7323_v1 }
  0xfd   :  { %5755 = vmatprep.mubr.msk.f32.mxu0 %vm7324_vm0, %v7323_v1  ;;  %5860 = vmatpush3.msra.mxu0 %v4882_v20 }
  0xfe   :  { %5861 = vmatprep.subr.mxu0 %v7323_v1 }
  0xff   :  { %5862 = vmatpush3.msra.mxu0 %v4881_v21 }
 0x100   :  { %5756 = vmatmul.mubr.msk.f32.gmra.mxu0 %vm329_vm2, %v307_v22  ;;  %5863 = vmatprep.subr.mxu0 %v7323_v1 }
 0x101   :  { %5758 = vmatprep.mubr.msk.f32.mxu0 %vm7324_vm0, %v7323_v1  ;;  %5864 = vmatpush3.msra.mxu0 %v4880_v23 }
 0x102   :  { %5865 = vmatprep.subr.mxu0 %v7323_v1 }
 0x103   :  { %5866 = vmatpush3.msra.mxu0 %v4879_v24 }
 0x104   :  { %5759 = vmatmul.mubr.msk.f32.gmra.mxu0 %vm329_vm2, %v308_v25  ;;  %5867 = vmatprep.subr.mxu0 %v7323_v1 }
 0x105   :  { %5761 = vmatprep.mubr.msk.f32.mxu0 %vm7324_vm0, %v7323_v1  ;;  %5868 = vmatpush3.msra.mxu0 %v4878_v26 }
 0x106   :  { %5869 = vmatprep.subr.mxu0 %v7323_v1 }
 0x107   :  { %5870 = vmatpush3.msra.mxu0 %v4877_v27 }
 0x108   :  { %5762 = vmatmul.mubr.msk.f32.gmra.mxu0 %vm329_vm2, %v309_v28  ;;  %5871 = vmatprep.subr.mxu0 %v7323_v1 }
 0x109   :  { %5764 = vmatprep.mubr.msk.f32.mxu0 %vm7324_vm0, %v7323_v1  ;;  %5872 = vmatpush3.msra.mxu0 %v4876_v29 }
 0x10a   :  { %5873 = vmatprep.subr.mxu0 %v7323_v1 }
 0x10b   :  { %5874 = vmatpush3.msra.mxu0 %v4875_v30 }
 0x10c   :  { %5765 = vmatmul.mubr.msk.f32.gmra.mxu0 %vm329_vm2, %v310_v31  ;;  %5875 = vmatprep.subr.mxu0 %v7323_v1 }
 0x10d   :  { %5879 = vmatprep.mubr.msk.f32.mxu0 %vm7324_vm0, %v7323_v1  ;;  %5876 = vmatpush3.msra.mxu0 %v4874_v32 }
 0x10e   :  { %5877 = vmatprep.subr.mxu0 %v7323_v1 }
 0x10f   :  { %5878 = vmatpush3.msra.mxu0 %v4873_v33 }
 0x110   :  { %5935 = vmatprep.subr.mxu0 %v7323_v1 }
 0x1b4   :  { %v421_v35 = vpop.f32.mrf.mxu0 }
 0x1b5   :  { %v7668_v36 = vadd.f32 %v4864_v34, %v421_v35 }
 0x1b6   :  { %v5748_v37 = vpop.f32.mrf.mxu0 }
 0x1b7   :  { %5880 = vmatmul.mubr.msk.f32.vlgmr.msra.gmra.mxu0 %vm613_vm3, %v7668_v36 }
 0x1b8   :  { %v426_v38 = vpop.f32.mrf.mxu0  ;;  %5882 = vmatprep.mubr.msk.f32.mxu0 %vm7324_vm0, %v7323_v1 }
 0x1b9   :  { %v7674_v39 = vadd.f32 %v4864_v34, %v426_v38 }
 0x1ba   :  { %v5751_v40 = vpop.f32.mrf.mxu0 }
 0x1bb   :  { %5883 = vmatmul.mubr.msk.f32.gmra.mxu0 %vm613_vm3, %v7674_v39 }
 0x1bc   :  { %v431_v41 = vpop.f32.mrf.mxu0  ;;  %5885 = vmatprep.mubr.msk.f32.mxu0 %vm7324_vm0, %v7323_v1 }
 0x1bd   :  { %v7680_v42 = vadd.f32 %v4864_v34, %v431_v41 }
 0x1be   :  { %v5754_v43 = vpop.f32.mrf.mxu0 }
 0x1bf   :  { %5886 = vmatmul.mubr.msk.f32.gmra.mxu0 %vm613_vm3, %v7680_v42  ;;  %v7877_v43 = vld [vmem:[#allocation5 + $0x40] sm:$0xff] }
 0x1c0   :  { %v436_v44 = vpop.f32.mrf.mxu0  ;;  %5888 = vmatprep.mubr.msk.f32.mxu0 %vm7324_vm0, %v7323_v1 }
 0x1c1   :  { %v7686_v45 = vadd.f32 %v4864_v34, %v436_v44  ;;  %v7883_v44 = vld [vmem:[#allocation5 + $0x48] sm:$0xff] }
 0x1c2   :  { %v5757_v46 = vpop.f32.mrf.mxu0 }
 0x1c3   :  { %5889 = vmatmul.mubr.msk.f32.gmra.mxu0 %vm613_vm3, %v7686_v45  ;;  %v7895_v46 = vld [vmem:[#allocation5 + $0x58] sm:$0xff] }
 0x1c4   :  { %v441_v47 = vpop.f32.mrf.mxu0  ;;  %5891 = vmatprep.mubr.msk.f32.mxu0 %vm7324_vm0, %v7323_v1 }
 0x1c5   :  { %v7692_v48 = vadd.f32 %v4864_v34, %v441_v47  ;;  %v7901_v47 = vld [vmem:[#allocation5 + $0x60] sm:$0xff] }
 0x1c6   :  { %v5760_v49 = vpop.f32.mrf.mxu0 }
 0x1c7   :  { %5892 = vmatmul.mubr.msk.f32.gmra.mxu0 %vm613_vm3, %v7692_v48  ;;  %v4928_v49 = vld [vmem:[%s8953_s6 + $0x148] sm:$0xff] }
 0x1c8   :  { %v446_v50 = vpop.f32.mrf.mxu0  ;;  %5894 = vmatprep.mubr.msk.f32.mxu0 %vm7324_vm0, %v7323_v1  ;;  %5936 = vmatpush3.msra.mxu0 %v4928_v49  ;;  %v1291_v49 = vld [vmem:[%s8955_s26 + $0x68] sm:$0xff] }
 0x1c9   :  { %v7698_v51 = vadd.f32 %v4864_v34, %v446_v50  ;;  %5937 = vmatprep.subr.mxu0 %v7323_v1  ;;  %v4927_v50 = vld [vmem:[%s8953_s6 + $0x140] sm:$0xff] }
 0x1ca   :  { %v5763_v52 = vpop.f32.mrf.mxu0  ;;  %5938 = vmatpush3.msra.mxu0 %v4927_v50  ;;  %v1290_v50 = vld [vmem:[%s8955_s26 + $0x60] sm:$0xff] }
 0x1cb   :  { %5895 = vmatmul.mubr.msk.f32.gmra.mxu0 %vm613_vm3, %v7698_v51  ;;  %5939 = vmatprep.subr.mxu0 %v7323_v1  ;;  %v4925_v52 = vld [vmem:[%s8953_s6 + $0x130] sm:$0xff] }
 0x1cc   :  { %v451_v53 = vpop.f32.mrf.mxu0  ;;  %5897 = vmatprep.mubr.msk.f32.mxu0 %vm7324_vm0, %v7323_v1 }
 0x1cd   :  { %v7704_v54 = vadd.f32 %v4864_v34, %v451_v53  ;;  %v4924_v53 = vld [vmem:[%s8953_s6 + $0x128] sm:$0xff] }
 0x1ce   :  { %v5766_v55 = vpop.f32.mrf.mxu0 }
 0x1cf   :  { %5768 = vmatpush3.msra.mxu1 %v7704_v54  ;;  %5898 = vmatmul.mubr.msk.f32.gmra.mxu0 %vm613_vm3, %v7704_v54  ;;  %v4922_v55 = vld [vmem:[%s8953_s6 + $0x118] sm:$0xff] }
 0x1d0   :  { %5769 = vmatprep.subr.mxu1 %v7323_v1  ;;  %5963 = vmatprep.mubr.msk.f32.mxu0 %vm7324_vm0, %v7323_v1 }
 0x1d1   :  { %5770 = vmatpush3.msra.mxu1 %v7698_v51 }
 0x1d2   :  { %5771 = vmatprep.subr.mxu1 %v7323_v1 }
 0x1d3   :  { %5772 = vmatpush3.msra.mxu1 %v7692_v48 }
 0x1d4   :  { %5773 = vmatprep.subr.mxu1 %v7323_v1 }
 0x1d5   :  { %5774 = vmatpush3.msra.mxu1 %v7686_v45 }
 0x1d6   :  { %5775 = vmatprep.subr.mxu1 %v7323_v1 }
 0x1d7   :  { %5776 = vmatpush3.msra.mxu1 %v7680_v42 }
 0x1d8   :  { %5777 = vmatprep.subr.mxu1 %v7323_v1 }
 0x1d9   :  { %5778 = vmatpush3.msra.mxu1 %v7674_v39 }
 0x1da   :  { %5779 = vmatprep.subr.mxu1 %v7323_v1 }
 0x1db   :  { %5780 = vmatpush3.msra.mxu1 %v7668_v36 }
 0x1dc   :  { %5782 = vmatmul.mubr.msk.f32.vlgmr.msra.gmra.mxu1 %vm477_vm4, %v7721_v56  ;;  %5802 = vmatprep.subr.mxu1 %v7323_v1 }
 0x1dd   :  { %5784 = vmatprep.mubr.msk.f32.mxu1 %vm7324_vm0, %v7323_v1  ;;  %5803 = vmatpush3.msra.mxu1 %v612_v63  ;;  %v4921_v63 = vld [vmem:[%s8953_s6 + $0x110] sm:$0xff] }
 0x1de   :  { %5804 = vmatprep.subr.mxu1 %v7323_v1 }
 0x1df   :  { %5805 = vmatpush3.msra.mxu1 %v611_v0  ;;  %v4920_v0 = vld [vmem:[%s8953_s6 + $0x108] sm:$0xff] }
 0x1e0   :  { %5785 = vmatmul.mubr.msk.f32.gmra.mxu1 %vm477_vm4, %v7730_v57  ;;  %5806 = vmatprep.subr.mxu1 %v7323_v1 }
 0x1e1   :  { %5787 = vmatprep.mubr.msk.f32.mxu1 %vm7324_vm0, %v7323_v1  ;;  %5807 = vmatpush3.msra.mxu1 %v610_v2  ;;  %v4919_v2 = vld [vmem:[%s8953_s6 + $0x100] sm:$0xff] }
 0x1e2   :  { %5808 = vmatprep.subr.mxu1 %v7323_v1 }
 0x1e3   :  { %5809 = vmatpush3.msra.mxu1 %v609_v3  ;;  %v4918_v3 = vld [vmem:[%s8953_s6 + $0xf8] sm:$0xff] }
 0x1e4   :  { %5788 = vmatmul.mubr.msk.f32.gmra.mxu1 %vm477_vm4, %v7736_v58  ;;  %5810 = vmatprep.subr.mxu1 %v7323_v1 }
 0x1e5   :  { %5790 = vmatprep.mubr.msk.f32.mxu1 %vm7324_vm0, %v7323_v1  ;;  %5811 = vmatpush3.msra.mxu1 %v608_v4  ;;  %v4917_v4 = vld [vmem:[%s8953_s6 + $0xf0] sm:$0xff] }
 0x1e6   :  { %5812 = vmatprep.subr.mxu1 %v7323_v1 }
 0x1e7   :  { %5813 = vmatpush3.msra.mxu1 %v607_v5  ;;  %v4916_v5 = vld [vmem:[%s8953_s6 + $0xe8] sm:$0xff] }
 0x1e8   :  { %5791 = vmatmul.mubr.msk.f32.gmra.mxu1 %vm477_vm4, %v7742_v59  ;;  %5814 = vmatprep.subr.mxu1 %v7323_v1 }
 0x1e9   :  { %5793 = vmatprep.mubr.msk.f32.mxu1 %vm7324_vm0, %v7323_v1  ;;  %5815 = vmatpush3.msra.mxu1 %v606_v6  ;;  %v4915_v6 = vld [vmem:[%s8953_s6 + $0xe0] sm:$0xff] }
 0x1ea   :  { %5816 = vmatprep.subr.mxu1 %v7323_v1 }
 0x1eb   :  { %5817 = vmatpush3.msra.mxu1 %v605_v7 }
 0x1ec   :  { %5794 = vmatmul.mubr.msk.f32.gmra.mxu1 %vm477_vm4, %v7748_v60  ;;  %5818 = vmatprep.subr.mxu1 %v7323_v1 }
 0x1ed   :  { %5796 = vmatprep.mubr.msk.f32.mxu1 %vm7324_vm0, %v7323_v1  ;;  %5819 = vmatpush3.msra.mxu1 %v604_v8 }
 0x1ee   :  { %5820 = vmatprep.subr.mxu1 %v7323_v1 }
 0x1ef   :  { %5821 = vmatpush3.msra.mxu1 %v603_v9 }
 0x1f0   :  { %5797 = vmatmul.mubr.msk.f32.gmra.mxu1 %vm477_vm4, %v7754_v61  ;;  %5822 = vmatprep.subr.mxu1 %v7323_v1 }
 0x1f1   :  { %5799 = vmatprep.mubr.msk.f32.mxu1 %vm7324_vm0, %v7323_v1  ;;  %5823 = vmatpush3.msra.mxu1 %v602_v10 }
 0x1f2   :  { %5824 = vmatprep.subr.mxu1 %v7323_v1 }
 0x1f3   :  { %5825 = vmatpush3.msra.mxu1 %v601_v11 }
 0x1f4   :  { %5800 = vmatmul.mubr.msk.f32.gmra.mxu1 %vm477_vm4, %v7760_v62  ;;  %5826 = vmatprep.subr.mxu1 %v7323_v1 }
 0x1f5   :  { %5830 = vmatprep.mubr.msk.f32.mxu1 %vm7324_vm0, %v7323_v1  ;;  %5827 = vmatpush3.msra.mxu1 %v600_v12 }
 0x1f6   :  { %5828 = vmatprep.subr.mxu1 %v7323_v1 }
 0x1f7   :  { %5829 = vmatpush3.msra.mxu1 %v599_v13 }
 0x1f8   :  { %5900 = vmatprep.subr.mxu1 %v7323_v1 }
 0x277   :  { %v7822_v14 = vpop.f32.mrf.mxu0 }
 0x279   :  { %v5881_v15 = vpop.f32.mrf.mxu0 }
 0x27b   :  { %v7824_v16 = vpop.f32.mrf.mxu0 }
 0x27d   :  { %v5884_v17 = vpop.f32.mrf.mxu0 }
 0x27f   :  { %v7826_v18 = vpop.f32.mrf.mxu0 }
 0x281   :  { %v5887_v19 = vpop.f32.mrf.mxu0 }
 0x283   :  { %v7828_v20 = vpop.f32.mrf.mxu0 }
 0x285   :  { %v5890_v21 = vpop.f32.mrf.mxu0 }
 0x287   :  { %v7830_v22 = vpop.f32.mrf.mxu0 }
 0x289   :  { %v5893_v23 = vpop.f32.mrf.mxu0 }
 0x28b   :  { %v7832_v24 = vpop.f32.mrf.mxu0 }
 0x28d   :  { %v5896_v25 = vpop.f32.mrf.mxu0 }
 0x28f   :  { %v7834_v26 = vpop.f32.mrf.mxu0 }
 0x291   :  { %v5899_v27 = vpop.f32.mrf.mxu0 }
 0x29c   :  { %v565_v28 = vpop.f32.mrf.mxu1 }
 0x29d   :  { %5831 = vmatmul.mubr.msk.f32.vlgmr.msra.gmra.mxu1 %vm613_vm3, %v565_v28 }
 0x29e   :  { %5901 = vmatpush3.msra.mxu1 %v7704_v54  ;;  %v5783_v29 = vpop.f32.mrf.mxu1  ;;  %5833 = vmatprep.mubr.msk.f32.mxu1 %vm7324_vm0, %v7323_v1  ;;  %v4923_v54 = vld [vmem:[%s8953_s6 + $0x120] sm:$0xff] }
 0x29f   :  { %5902 = vmatprep.subr.mxu1 %v7323_v1 }
 0x2a0   :  { %5903 = vmatpush3.msra.mxu1 %v7698_v51  ;;  %v570_v30 = vpop.f32.mrf.mxu1  ;;  %v4926_v51 = vld [vmem:[%s8953_s6 + $0x138] sm:$0xff] }
 0x2a1   :  { %5904 = vmatprep.subr.mxu1 %v7323_v1  ;;  %5834 = vmatmul.mubr.msk.f32.gmra.mxu1 %vm613_vm3, %v570_v30 }
 0x2a2   :  { %5905 = vmatpush3.msra.mxu1 %v7692_v48  ;;  %v5786_v31 = vpop.f32.mrf.mxu1  ;;  %5836 = vmatprep.mubr.msk.f32.mxu1 %vm7324_vm0, %v7323_v1  ;;  %v7907_v48 = vld [vmem:[#allocation5 + $0x68] sm:$0xff] }
 0x2a3   :  { %5906 = vmatprep.subr.mxu1 %v7323_v1  ;;  %5940 = vmatpush3.msra.mxu0 %v4926_v51  ;;  %v1289_v51 = vld [vmem:[%s8955_s26 + $0x58] sm:$0xff] }
 0x2a4   :  { %5907 = vmatpush3.msra.mxu1 %v7686_v45  ;;  %v575_v32 = vpop.f32.mrf.mxu1  ;;  %v7889_v45 = vld [vmem:[#allocation5 + $0x50] sm:$0xff]  ;;  %5941 = vmatprep.subr.mxu0 %v7323_v1 }
 0x2a5   :  { %5908 = vmatprep.subr.mxu1 %v7323_v1  ;;  %5837 = vmatmul.mubr.msk.f32.gmra.mxu1 %vm613_vm3, %v575_v32 }
 0x2a6   :  { %5909 = vmatpush3.msra.mxu1 %v7680_v42  ;;  %v5789_v33 = vpop.f32.mrf.mxu1  ;;  %5839 = vmatprep.mubr.msk.f32.mxu1 %vm7324_vm0, %v7323_v1  ;;  %v7871_v42 = vld [vmem:[#allocation5 + $0x38] sm:$0xff] }
 0x2a7   :  { %5910 = vmatprep.subr.mxu1 %v7323_v1  ;;  %5942 = vmatpush3.msra.mxu0 %v4925_v52  ;;  %v1288_v52 = vld [vmem:[%s8955_s26 + $0x50] sm:$0xff] }
 0x2a8   :  { %5911 = vmatpush3.msra.mxu1 %v7674_v39  ;;  %v580_v34 = vpop.f32.mrf.mxu1  ;;  %5943 = vmatprep.subr.mxu0 %v7323_v1 }
 0x2a9   :  { %5912 = vmatprep.subr.mxu1 %v7323_v1  ;;  %5840 = vmatmul.mubr.msk.f32.gmra.mxu1 %vm613_vm3, %v580_v34 }
 0x2aa   :  { %5913 = vmatpush3.msra.mxu1 %v7668_v36  ;;  %v5792_v35 = vpop.f32.mrf.mxu1  ;;  %5842 = vmatprep.mubr.msk.f32.mxu1 %vm7324_vm0, %v7323_v1 }
 0x2ab   :  { %5984 = vmatprep.subr.mxu1 %v7323_v1  ;;  %5944 = vmatpush3.msra.mxu0 %v4924_v53  ;;  %v1287_v53 = vld [vmem:[%s8955_s26 + $0x48] sm:$0xff] }
 0x2ac   :  { %v585_v37 = vpop.f32.mrf.mxu1  ;;  %5945 = vmatprep.subr.mxu0 %v7323_v1 }
 0x2ad   :  { %5843 = vmatmul.mubr.msk.f32.gmra.mxu1 %vm613_vm3, %v585_v37  ;;  %5946 = vmatpush3.msra.mxu0 %v4923_v54  ;;  %v1286_v54 = vld [vmem:[%s8955_s26 + $0x40] sm:$0xff] }
 0x2ae   :  { %v5795_v38 = vpop.f32.mrf.mxu1  ;;  %5845 = vmatprep.mubr.msk.f32.mxu1 %vm7324_vm0, %v7323_v1  ;;  %5947 = vmatprep.subr.mxu0 %v7323_v1 }
 0x2af   :  { %5948 = vmatpush3.msra.mxu0 %v4922_v55  ;;  %v1285_v55 = vld [vmem:[%s8955_s26 + $0x38] sm:$0xff] }
 0x2b0   :  { %v590_v39 = vpop.f32.mrf.mxu1  ;;  %5949 = vmatprep.subr.mxu0 %v7323_v1 }
 0x2b1   :  { %5846 = vmatmul.mubr.msk.f32.gmra.mxu1 %vm613_vm3, %v590_v39  ;;  %5950 = vmatpush3.msra.mxu0 %v4921_v63  ;;  %v1284_v63 = vld [vmem:[%s8955_s26 + $0x30] sm:$0xff] }
 0x2b2   :  { %v5798_v40 = vpop.f32.mrf.mxu1  ;;  %5848 = vmatprep.mubr.msk.f32.mxu1 %vm7324_vm0, %v7323_v1  ;;  %5951 = vmatprep.subr.mxu0 %v7323_v1 }
 0x2b3   :  { %5952 = vmatpush3.msra.mxu0 %v4920_v0  ;;  %v1283_v0 = vld [vmem:[%s8955_s26 + $0x28] sm:$0xff] }
 0x2b4   :  { %v595_v36 = vpop.f32.mrf.mxu1  ;;  %5953 = vmatprep.subr.mxu0 %v7323_v1 }
 0x2b5   :  { %5849 = vmatmul.mubr.msk.f32.gmra.mxu1 %vm613_vm3, %v595_v36  ;;  %5954 = vmatpush3.msra.mxu0 %v4919_v2  ;;  %v1282_v2 = vld [vmem:[%s8955_s26 + $0x20] sm:$0xff] }
 0x2b6   :  { %v5801_v41 = vpop.f32.mrf.mxu1  ;;  %5914 = vmatprep.mubr.msk.f32.mxu1 %vm7324_vm0, %v7323_v1  ;;  %5955 = vmatprep.subr.mxu0 %v7323_v1 }
 0x2b7   :  { %5956 = vmatpush3.msra.mxu0 %v4918_v3  ;;  %v1281_v3 = vld [vmem:[%s8955_s26 + $0x18] sm:$0xff] }
 0x2b8   :  { %5957 = vmatprep.subr.mxu0 %v7323_v1 }
 0x2b9   :  { %5915 = vmatmul.mubr.msk.f32.vlgmr.msra.gmra.mxu1 %vm477_vm4, %v7871_v42  ;;  %5958 = vmatpush3.msra.mxu0 %v4917_v4  ;;  %v1280_v4 = vld [vmem:[%s8955_s26 + $0x10] sm:$0xff] }
 0x2ba   :  { %5917 = vmatprep.mubr.msk.f32.mxu1 %vm7324_vm0, %v7323_v1  ;;  %5959 = vmatprep.subr.mxu0 %v7323_v1 }
 0x2bb   :  { %5960 = vmatpush3.msra.mxu0 %v4916_v5  ;;  %v1279_v5 = vld [vmem:[%s8955_s26 + $0x8] sm:$0xff] }
 0x2bc   :  { %5961 = vmatprep.subr.mxu0 %v7323_v1 }
 0x2bd   :  { %5918 = vmatmul.mubr.msk.f32.gmra.mxu1 %vm477_vm4, %v7877_v43  ;;  %5962 = vmatpush3.msra.mxu0 %v4915_v6  ;;  %v1278_v6 = vld [vmem:[%s8955_s26] sm:$0xff] }
 0x2be   :  { %5920 = vmatprep.mubr.msk.f32.mxu1 %vm7324_vm0, %v7323_v1  ;;  %6019 = vmatprep.subr.mxu0 %v7323_v1 }
 0x2c1   :  { %5921 = vmatmul.mubr.msk.f32.gmra.mxu1 %vm477_vm4, %v7883_v44 }
 0x2c2   :  { %5923 = vmatprep.mubr.msk.f32.mxu1 %vm7324_vm0, %v7323_v1 }
 0x2c5   :  { %5924 = vmatmul.mubr.msk.f32.gmra.mxu1 %vm477_vm4, %v7889_v45 }
 0x2c6   :  { %5926 = vmatprep.mubr.msk.f32.mxu1 %vm7324_vm0, %v7323_v1 }
 0x2c9   :  { %5927 = vmatmul.mubr.msk.f32.gmra.mxu1 %vm477_vm4, %v7895_v46 }
 0x2ca   :  { %5929 = vmatprep.mubr.msk.f32.mxu1 %vm7324_vm0, %v7323_v1 }
 0x2cd   :  { %5930 = vmatmul.mubr.msk.f32.gmra.mxu1 %vm477_vm4, %v7901_v47 }
 0x2ce   :  { %5932 = vmatprep.mubr.msk.f32.mxu1 %vm7324_vm0, %v7323_v1 }
 0x2d1   :  { %5933 = vmatmul.mubr.msk.f32.gmra.mxu1 %vm477_vm4, %v7907_v48 }
 0x2d2   :  { %5998 = vmatprep.mubr.msk.f32.mxu1 %vm7324_vm0, %v7323_v1 }
 0x35d   :  { %v7969_v7 = vpop.f32.mrf.mxu1 }
 0x35f   :  { %v5832_v8 = vpop.f32.mrf.mxu1 }
 0x361   :  { %v7971_v9 = vpop.f32.mrf.mxu1 }
 0x363   :  { %v5835_v10 = vpop.f32.mrf.mxu1 }
 0x365   :  { %v7973_v11 = vpop.f32.mrf.mxu1 }
 0x367   :  { %v5838_v12 = vpop.f32.mrf.mxu1 }
 0x369   :  { %v7975_v13 = vpop.f32.mrf.mxu1 }
 0x36b   :  { %v5841_v15 = vpop.f32.mrf.mxu1 }
 0x36d   :  { %v7977_v17 = vpop.f32.mrf.mxu1 }
 0x36f   :  { %v5844_v19 = vpop.f32.mrf.mxu1 }
 0x371   :  { %v7979_v21 = vpop.f32.mrf.mxu1 }
 0x373   :  { %v5847_v23 = vpop.f32.mrf.mxu1 }
 0x375   :  { %v7981_v25 = vpop.f32.mrf.mxu1 }
 0x377   :  { %v5850_v27 = vpop.f32.mrf.mxu1 }
 0x379   :  { %v951_v28 = vpop.f32.mrf.mxu1 }
 0x37a   :  { %5964 = vmatmul.mubr.msk.f32.vlgmr.msra.gmra.mxu0 %vm613_vm3, %v951_v28 }
 0x37b   :  { %v5916_v29 = vpop.f32.mrf.mxu1  ;;  %5966 = vmatprep.mubr.msk.f32.mxu0 %vm7324_vm0, %v7323_v1  ;;  %6020 = vmatpush3.msra.mxu0 %v1291_v49 }
 0x37c   :  { %6021 = vmatprep.subr.mxu0 %v7323_v1 }
 0x37d   :  { %v956_v30 = vpop.f32.mrf.mxu1  ;;  %6022 = vmatpush3.msra.mxu0 %v1290_v50 }
 0x37e   :  { %5967 = vmatmul.mubr.msk.f32.gmra.mxu0 %vm613_vm3, %v956_v30  ;;  %6023 = vmatprep.subr.mxu0 %v7323_v1 }
 0x37f   :  { %v5919_v31 = vpop.f32.mrf.mxu1  ;;  %5969 = vmatprep.mubr.msk.f32.mxu0 %vm7324_vm0, %v7323_v1  ;;  %6024 = vmatpush3.msra.mxu0 %v1289_v51 }
 0x380   :  { %6025 = vmatprep.subr.mxu0 %v7323_v1  ;;  %v848_v31 = vadd.f32 %v7832_v24, %v7979_v21 }
 0x381   :  { %v961_v32 = vpop.f32.mrf.mxu1  ;;  %6026 = vmatpush3.msra.mxu0 %v1288_v52 }
 0x382   :  { %5970 = vmatmul.mubr.msk.f32.gmra.mxu0 %vm613_vm3, %v961_v32  ;;  %6027 = vmatprep.subr.mxu0 %v7323_v1 }
 0x383   :  { %v5922_v33 = vpop.f32.mrf.mxu1  ;;  %5972 = vmatprep.mubr.msk.f32.mxu0 %vm7324_vm0, %v7323_v1  ;;  %6028 = vmatpush3.msra.mxu0 %v1287_v53 }
 0x384   :  { %6029 = vmatprep.subr.mxu0 %v7323_v1  ;;  %v843_v33 = vadd.f32 %v7830_v22, %v7977_v17  ;;  %v828_v22 = vadd.f32 %v7824_v16, %v7971_v9 }
 0x385   :  { %v966_v34 = vpop.f32.mrf.mxu1  ;;  %6030 = vmatpush3.msra.mxu0 %v1286_v54 }
 0x386   :  { %5973 = vmatmul.mubr.msk.f32.gmra.mxu0 %vm613_vm3, %v966_v34  ;;  %6031 = vmatprep.subr.mxu0 %v7323_v1 }
 0x387   :  { %v5925_v35 = vpop.f32.mrf.mxu1  ;;  %5975 = vmatprep.mubr.msk.f32.mxu0 %vm7324_vm0, %v7323_v1  ;;  %6032 = vmatpush3.msra.mxu0 %v1285_v55 }
 0x388   :  { %6033 = vmatprep.subr.mxu0 %v7323_v1 }
 0x389   :  { %v971_v37 = vpop.f32.mrf.mxu1  ;;  %6034 = vmatpush3.msra.mxu0 %v1284_v63 }
 0x38a   :  { %5976 = vmatmul.mubr.msk.f32.gmra.mxu0 %vm613_vm3, %v971_v37  ;;  %6035 = vmatprep.subr.mxu0 %v7323_v1  ;;  %v838_v37 = vadd.f32 %v7828_v20, %v7975_v13  ;;  %v823_v20 = vadd.f32 %v7822_v14, %v7969_v7 }
 0x38b   :  { %v5928_v38 = vpop.f32.mrf.mxu1  ;;  %5978 = vmatprep.mubr.msk.f32.mxu0 %vm7324_vm0, %v7323_v1  ;;  %6036 = vmatpush3.msra.mxu0 %v1283_v0 }
 0x38c   :  { %6037 = vmatprep.subr.mxu0 %v7323_v1  ;;  %v853_v38 = vadd.f32 %v7834_v26, %v7981_v25 }
 0x38d   :  { %v976_v39 = vpop.f32.mrf.mxu1  ;;  %6038 = vmatpush3.msra.mxu0 %v1282_v2 }
 0x38e   :  { %5979 = vmatmul.mubr.msk.f32.gmra.mxu0 %vm613_vm3, %v976_v39  ;;  %6039 = vmatprep.subr.mxu0 %v7323_v1 }
 0x38f   :  { %v5931_v40 = vpop.f32.mrf.mxu1  ;;  %5981 = vmatprep.mubr.msk.f32.mxu0 %vm7324_vm0, %v7323_v1  ;;  %6040 = vmatpush3.msra.mxu0 %v1281_v3 }
 0x390   :  { %6041 = vmatprep.subr.mxu0 %v7323_v1  ;;  %v4936_v40 = vld [vmem:[#allocation7] ss:$0 sm:$0xff] }
 0x391   :  { %v981_v36 = vpop.f32.mrf.mxu1  ;;  %6042 = vmatpush3.msra.mxu0 %v1280_v4 }
 0x392   :  { %5982 = vmatmul.mubr.msk.f32.gmra.mxu0 %vm613_vm3, %v981_v36  ;;  %6043 = vmatprep.subr.mxu0 %v7323_v1 }
 0x393   :  { %v5934_v41 = vpop.f32.mrf.mxu1  ;;  %6047 = vmatprep.mubr.msk.f32.mxu0 %vm7324_vm0, %v7323_v1  ;;  %6044 = vmatpush3.msra.mxu0 %v1279_v5 }
 0x394   :  { %6045 = vmatprep.subr.mxu0 %v7323_v1  ;;  %v833_v41 = vadd.f32 %v7826_v18, %v7973_v11 }
 0x395   :  { %6046 = vmatpush3.msra.mxu0 %v1278_v6 }
 0x396   :  { %6117 = vmatprep.subr.mxu0 %v7323_v1 }
 0x43a   :  { %v1087_v8 = vpop.f32.mrf.mxu0 }
 0x43b   :  { %v1121_v18 = vadd.f32 %v1087_v8, %v823_v20 }
 0x43c   :  { %v5965_v10 = vpop.f32.mrf.mxu0 }
 0x43d   :  { %v1135_v14 = vadd.f32 %v4936_v40, %v1121_v18  ;;  %v4950_v10 = vld [vmem:[%s8955_s26 + $0xd8] sm:$0xff]  ;;  %v4987_v18 = vld [vmem:[%s8955_s26 + $0x120] sm:$0xff] }
 0x43e   :  { %v1092_v12 = vpop.f32.mrf.mxu0 }
 0x43f   :  { %v1122_v26 = vadd.f32 %v1092_v12, %v828_v22  ;;  %v1149_v4 = vmul.f32 0.2, %v1135_v14  ;;  %vm1142_vm11 = vcmp.gt.f32.partialorder %v1135_v14, 0.0  ;;  %v4949_v12 = vld [vmem:[%s8955_s26 + $0xd0] sm:$0xff] }
 0x440   :  { %v5968_v15 = vpop.f32.mrf.mxu0 }
 0x441   :  { %v1136_v16 = vadd.f32 %v4936_v40, %v1122_v26  ;;  %v8098_v8 = vsel %vm1142_vm11, %v1135_v14, %v1149_v4  ;;  %v4948_v15 = vld [vmem:[%s8955_s26 + $0xc8] sm:$0xff] }
 0x442   :  { %v1097_v19 = vpop.f32.mrf.mxu0  ;;  %v4980_v14 = vld [vmem:[%s8955_s26 + $0xe8] sm:$0xff] }
 0x443   :  { %v1123_v50 = vadd.f32 %v1097_v19, %v833_v41  ;;  %v1150_v2 = vmul.f32 0.2, %v1136_v16  ;;  %vm1143_vm10 = vcmp.gt.f32.partialorder %v1136_v16, 0.0  ;;  %v4946_v19 = vld [vmem:[%s8955_s26 + $0xb8] sm:$0xff] }
 0x444   :  { %v5971_v23 = vpop.f32.mrf.mxu0 }
 0x445   :  { %v1137_v11 = vadd.f32 %v4936_v40, %v1123_v50  ;;  %v8094_v6 = vsel %vm1143_vm10, %v1136_v16, %v1150_v2  ;;  %v4944_v23 = vld [vmem:[%s8955_s26 + $0xa8] sm:$0xff]  ;;  %v4983_v16 = vld [vmem:[%s8955_s26 + $0x100] sm:$0xff] }
 0x446   :  { %v1102_v27 = vpop.f32.mrf.mxu0 }
 0x447   :  { %v1124_v49 = vadd.f32 %v1102_v27, %v838_v37  ;;  %v1151_v7 = vmul.f32 0.2, %v1137_v11  ;;  %vm1144_vm9 = vcmp.gt.f32.partialorder %v1137_v11, 0.0  ;;  %v4942_v27 = vld [vmem:[%s8955_s26 + $0x98] sm:$0xff] }
 0x448   :  { %v5974_v28 = vpop.f32.mrf.mxu0 }
 0x449   :  { %v1138_v13 = vadd.f32 %v4936_v40, %v1124_v49  ;;  %v8090_v5 = vsel %vm1144_vm9, %v1137_v11, %v1151_v7  ;;  %v4940_v28 = vld [vmem:[%s8955_s26 + $0x88] sm:$0xff]  ;;  %v4986_v11 = vld [vmem:[%s8955_s26 + $0x118] sm:$0xff]  ;;  %v4979_v7 = vld [vmem:[%s8955_s26 + $0xe0] sm:$0xff]  ;;  %vm4105_vm9 = vcmask 1045504  }
 0x44a   :  { %v1107_v29 = vpop.f32.mrf.mxu0 }
 0x44b   :  { %v1125_v39 = vadd.f32 %v1107_v29, %v843_v33  ;;  %v1152_v9 = vmul.f32 0.2, %v1138_v13  ;;  %vm1145_vm8 = vcmp.gt.f32.partialorder %v1138_v13, 0.0  ;;  %v4938_v29 = vld [vmem:[%s8955_s26 + $0x78] sm:$0xff] }
 0x44c   :  { %v5977_v30 = vpop.f32.mrf.mxu0 }
 0x44d   :  { %v1139_v51 = vadd.f32 %v4936_v40, %v1125_v39  ;;  %v8086_v3 = vsel %vm1145_vm8, %v1138_v13, %v1152_v9  ;;  %v4982_v9 = vld [vmem:[%s8955_s26 + $0xf8] sm:$0xff] }
 0x44e   :  { %v1112_v32 = vpop.f32.mrf.mxu0 }
 0x44f   :  { %v1126_v34 = vadd.f32 %v1112_v32, %v848_v31  ;;  %v1153_v54 = vmul.f32 0.2, %v1139_v51  ;;  %vm1146_vm7 = vcmp.gt.f32.partialorder %v1139_v51, 0.0 }
 0x450   :  { %v5980_v35 = vpop.f32.mrf.mxu0 }
 0x451   :  { %v1140_v24 = vadd.f32 %v4936_v40, %v1126_v34  ;;  %v8082_v0 = vsel %vm1146_vm7, %v1139_v51, %v1153_v54  ;;  %v4985_v54 = vld [vmem:[%s8955_s26 + $0x110] sm:$0xff] }
 0x452   :  { %v1117_v36 = vpop.f32.mrf.mxu0 }
 0x453   :  { %v1127_v21 = vadd.f32 %v1117_v36, %v853_v38  ;;  %v1154_v25 = vmul.f32 0.2, %v1140_v24  ;;  %vm1147_vm6 = vcmp.gt.f32.partialorder %v1140_v24, 0.0 }
 0x454   :  { %v5983_v17 = vpop.f32.mrf.mxu0 }
 0x455   :  { %v1141_v52 = vadd.f32 %v4936_v40, %v1127_v21  ;;  %v8078_v63 = vsel %vm1147_vm6, %v1140_v24, %v1154_v25  ;;  %v4990_v25 = vld [vmem:[%s8955_s26 + $0x138] sm:$0xff] }
 0x457   :  { %v1155_v53 = vmul.f32 0.2, %v1141_v52  ;;  %vm1148_vm5 = vcmp.gt.f32.partialorder %v1141_v52, 0.0 }
 0x459   :  { %v8074_v55 = vsel %vm1148_vm5, %v1141_v52, %v1155_v53  ;;  %v4988_v53 = vld [vmem:[%s8955_s26 + $0x128] sm:$0xff] }
 0x45a   :  { %5985 = vmatpush3.msra.mxu1 %v8074_v55 }
 0x45b   :  { %5986 = vmatprep.subr.mxu1 %v7323_v1 }
 0x45c   :  { %5987 = vmatpush3.msra.mxu1 %v8078_v63 }
 0x45d   :  { %5988 = vmatprep.subr.mxu1 %v7323_v1 }
 0x45e   :  { %5989 = vmatpush3.msra.mxu1 %v8082_v0 }
 0x45f   :  { %5990 = vmatprep.subr.mxu1 %v7323_v1 }
 0x460   :  { %5991 = vmatpush3.msra.mxu1 %v8086_v3 }
 0x461   :  { %5992 = vmatprep.subr.mxu1 %v7323_v1 }
 0x462   :  { %5993 = vmatpush3.msra.mxu1 %v8090_v5 }
 0x463   :  { %5994 = vmatprep.subr.mxu1 %v7323_v1 }
 0x464   :  { %5995 = vmatpush3.msra.mxu1 %v8094_v6 }
 0x465   :  { %5996 = vmatprep.subr.mxu1 %v7323_v1 }
 0x466   :  { %5997 = vmatpush3.msra.mxu1 %v8098_v8 }
 0x467   :  { %5999 = vmatmul.mubr.msk.f32.vlgmr.msra.gmra.mxu1 %vm477_vm4, %v7721_v56  ;;  %6068 = vmatprep.subr.mxu1 %v7323_v1  ;;  %v4947_v56 = vld [vmem:[%s8955_s26 + $0xc0] sm:$0xff] }
 0x468   :  { %6069 = vmatpush3.msra.mxu1 %v4950_v10  ;;  %6001 = vmatprep.mubr.msk.f32.mxu1 %vm7324_vm0, %v7323_v1 }
 0x469   :  { %6070 = vmatprep.subr.mxu1 %v7323_v1 }
 0x46a   :  { %6071 = vmatpush3.msra.mxu1 %v4949_v12 }
 0x46b   :  { %6002 = vmatmul.mubr.msk.f32.gmra.mxu1 %vm477_vm4, %v7730_v57  ;;  %6072 = vmatprep.subr.mxu1 %v7323_v1  ;;  %v4945_v57 = vld [vmem:[%s8955_s26 + $0xb0] sm:$0xff] }
 0x46c   :  { %6073 = vmatpush3.msra.mxu1 %v4948_v15  ;;  %6004 = vmatprep.mubr.msk.f32.mxu1 %vm7324_vm0, %v7323_v1 }
 0x46d   :  { %6074 = vmatprep.subr.mxu1 %v7323_v1 }
 0x46e   :  { %6075 = vmatpush3.msra.mxu1 %v4947_v56 }
 0x46f   :  { %6005 = vmatmul.mubr.msk.f32.gmra.mxu1 %vm477_vm4, %v7736_v58  ;;  %6076 = vmatprep.subr.mxu1 %v7323_v1  ;;  %v4943_v58 = vld [vmem:[%s8955_s26 + $0xa0] sm:$0xff] }
 0x470   :  { %6077 = vmatpush3.msra.mxu1 %v4946_v19  ;;  %6007 = vmatprep.mubr.msk.f32.mxu1 %vm7324_vm0, %v7323_v1 }
 0x471   :  { %6078 = vmatprep.subr.mxu1 %v7323_v1 }
 0x472   :  { %6079 = vmatpush3.msra.mxu1 %v4945_v57 }
 0x473   :  { %6008 = vmatmul.mubr.msk.f32.gmra.mxu1 %vm477_vm4, %v7742_v59  ;;  %6080 = vmatprep.subr.mxu1 %v7323_v1  ;;  %v4941_v59 = vld [vmem:[%s8955_s26 + $0x90] sm:$0xff] }
 0x474   :  { %6081 = vmatpush3.msra.mxu1 %v4944_v23  ;;  %6010 = vmatprep.mubr.msk.f32.mxu1 %vm7324_vm0, %v7323_v1 }
 0x475   :  { %6082 = vmatprep.subr.mxu1 %v7323_v1 }
 0x476   :  { %6083 = vmatpush3.msra.mxu1 %v4943_v58 }
 0x477   :  { %6011 = vmatmul.mubr.msk.f32.gmra.mxu1 %vm477_vm4, %v7748_v60  ;;  %6084 = vmatprep.subr.mxu1 %v7323_v1  ;;  %v4939_v60 = vld [vmem:[%s8955_s26 + $0x80] sm:$0xff] }
 0x478   :  { %6085 = vmatpush3.msra.mxu1 %v4942_v27  ;;  %6013 = vmatprep.mubr.msk.f32.mxu1 %vm7324_vm0, %v7323_v1 }
 0x479   :  { %6086 = vmatprep.subr.mxu1 %v7323_v1 }
 0x47a   :  { %6087 = vmatpush3.msra.mxu1 %v4941_v59 }
 0x47b   :  { %6014 = vmatmul.mubr.msk.f32.gmra.mxu1 %vm477_vm4, %v7754_v61  ;;  %6088 = vmatprep.subr.mxu1 %v7323_v1  ;;  %v4937_v61 = vld [vmem:[%s8955_s26 + $0x70] sm:$0xff] }
 0x47c   :  { %6089 = vmatpush3.msra.mxu1 %v4940_v28  ;;  %6016 = vmatprep.mubr.msk.f32.mxu1 %vm7324_vm0, %v7323_v1 }
 0x47d   :  { %6090 = vmatprep.subr.mxu1 %v7323_v1 }
 0x47e   :  { %6091 = vmatpush3.msra.mxu1 %v4939_v60 }
 0x47f   :  { %6017 = vmatmul.mubr.msk.f32.gmra.mxu1 %vm477_vm4, %v7760_v62  ;;  %6092 = vmatprep.subr.mxu1 %v7323_v1 }
 0x480   :  { %6093 = vmatpush3.msra.mxu1 %v4938_v29  ;;  %6096 = vmatprep.mubr.msk.f32.mxu1 %vm7324_vm0, %v7323_v1 }
 0x481   :  { %6094 = vmatprep.subr.mxu1 %v7323_v1 }
 0x482   :  { %6095 = vmatpush3.msra.mxu1 %v4937_v61 }
 0x483   :  { %6097 = vmatmul.mubr.msk.f32.vlgmr.msra.gmra.mxu1 %vm613_vm3, %v8098_v8  ;;  %6152 = vmatprep.subr.mxu1 %v7323_v1 }
 0x484   :  { %6099 = vmatprep.mubr.msk.f32.mxu1 %vm7324_vm0, %v7323_v1 }
 0x487   :  { %6100 = vmatmul.mubr.msk.f32.gmra.mxu1 %vm613_vm3, %v8094_v6 }
 0x488   :  { %6102 = vmatprep.mubr.msk.f32.mxu1 %vm7324_vm0, %v7323_v1 }
 0x48b   :  { %6103 = vmatmul.mubr.msk.f32.gmra.mxu1 %vm613_vm3, %v8090_v5 }
 0x48c   :  { %6105 = vmatprep.mubr.msk.f32.mxu1 %vm7324_vm0, %v7323_v1 }
 0x48f   :  { %6106 = vmatmul.mubr.msk.f32.gmra.mxu1 %vm613_vm3, %v8086_v3 }
 0x490   :  { %6108 = vmatprep.mubr.msk.f32.mxu1 %vm7324_vm0, %v7323_v1 }
 0x493   :  { %6109 = vmatmul.mubr.msk.f32.gmra.mxu1 %vm613_vm3, %v8082_v0 }
 0x494   :  { %6111 = vmatprep.mubr.msk.f32.mxu1 %vm7324_vm0, %v7323_v1 }
 0x497   :  { %6112 = vmatmul.mubr.msk.f32.gmra.mxu1 %vm613_vm3, %v8078_v63 }
 0x498   :  { %6114 = vmatprep.mubr.msk.f32.mxu1 %vm7324_vm0, %v7323_v1 }
 0x49b   :  { %6115 = vmatmul.mubr.msk.f32.gmra.mxu1 %vm613_vm3, %v8074_v55 }
 0x49c   :  { %6180 = vmatprep.mubr.msk.f32.mxu1 %vm7324_vm0, %v7323_v1 }
 0x527   :  { %v1244_v62 = vpop.f32.mrf.mxu1 }
 0x528   :  { %6048 = vmatmul.mubr.msk.f32.vlgmr.msra.gmra.mxu0 %vm613_vm3, %v1244_v62 }
 0x529   :  { %6118 = vmatpush3.msra.mxu0 %v8074_v55  ;;  %v6000_v30 = vpop.f32.mrf.mxu1  ;;  %6050 = vmatprep.mubr.msk.f32.mxu0 %vm7324_vm0, %v7323_v1  ;;  %v4984_v55 = vld [vmem:[%s8955_s26 + $0x108] sm:$0xff] }
 0x52a   :  { %6119 = vmatprep.subr.mxu0 %v7323_v1 }
 0x52b   :  { %6120 = vmatpush3.msra.mxu0 %v8078_v63  ;;  %v1249_v31 = vpop.f32.mrf.mxu1  ;;  %v4981_v63 = vld [vmem:[%s8955_s26 + $0xf0] sm:$0xff] }
 0x52c   :  { %6121 = vmatprep.subr.mxu0 %v7323_v1  ;;  %6051 = vmatmul.mubr.msk.f32.gmra.mxu0 %vm613_vm3, %v1249_v31 }
 0x52d   :  { %6122 = vmatpush3.msra.mxu0 %v8082_v0  ;;  %v6003_v32 = vpop.f32.mrf.mxu1  ;;  %6053 = vmatprep.mubr.msk.f32.mxu0 %vm7324_vm0, %v7323_v1  ;;  %v5021_v0 = vld [vmem:[%s8956_s13 + $0xd8] sm:$0xff] }
 0x52e   :  { %6123 = vmatprep.subr.mxu0 %v7323_v1 }
 0x52f   :  { %6124 = vmatpush3.msra.mxu0 %v8086_v3  ;;  %v1254_v33 = vpop.f32.mrf.mxu1 }
 0x530   :  { %6125 = vmatprep.subr.mxu0 %v7323_v1  ;;  %6054 = vmatmul.mubr.msk.f32.gmra.mxu0 %vm613_vm3, %v1254_v33 }
 0x531   :  { %6126 = vmatpush3.msra.mxu0 %v8090_v5  ;;  %v6006_v34 = vpop.f32.mrf.mxu1  ;;  %6056 = vmatprep.mubr.msk.f32.mxu0 %vm7324_vm0, %v7323_v1 }
 0x532   :  { %6127 = vmatprep.subr.mxu0 %v7323_v1 }
 0x533   :  { %6128 = vmatpush3.msra.mxu0 %v8094_v6  ;;  %v1259_v35 = vpop.f32.mrf.mxu1 }
 0x534   :  { %6129 = vmatprep.subr.mxu0 %v7323_v1  ;;  %6057 = vmatmul.mubr.msk.f32.gmra.mxu0 %vm613_vm3, %v1259_v35 }
 0x535   :  { %6130 = vmatpush3.msra.mxu0 %v8098_v8  ;;  %v6009_v37 = vpop.f32.mrf.mxu1  ;;  %6059 = vmatprep.mubr.msk.f32.mxu0 %vm7324_vm0, %v7323_v1 }
 0x537   :  { %v1264_v38 = vpop.f32.mrf.mxu1 }
 0x538   :  { %6060 = vmatmul.mubr.msk.f32.gmra.mxu0 %vm613_vm3, %v1264_v38  ;;  %v5020_v38 = vld [vmem:[%s8956_s13 + $0xd0] sm:$0xff] }
 0x539   :  { %v6012_v39 = vpop.f32.mrf.mxu1  ;;  %6062 = vmatprep.mubr.msk.f32.mxu0 %vm7324_vm0, %v7323_v1 }
 0x53a   :  { %v5019_v39 = vld [vmem:[%s8956_s13 + $0xc8] sm:$0xff] }
 0x53b   :  { %v1269_v40 = vpop.f32.mrf.mxu1 }
 0x53c   :  { %6063 = vmatmul.mubr.msk.f32.gmra.mxu0 %vm613_vm3, %v1269_v40  ;;  %v5018_v40 = vld [vmem:[%s8956_s13 + $0xc0] sm:$0xff] }
 0x53d   :  { %v6015_v36 = vpop.f32.mrf.mxu1  ;;  %6065 = vmatprep.mubr.msk.f32.mxu0 %vm7324_vm0, %v7323_v1 }
 0x53e   :  { %v5017_v36 = vld [vmem:[%s8956_s13 + $0xb8] sm:$0xff] }
 0x53f   :  { %v1274_v41 = vpop.f32.mrf.mxu1 }
 0x540   :  { %6066 = vmatmul.mubr.msk.f32.gmra.mxu0 %vm613_vm3, %v1274_v41  ;;  %v5016_v41 = vld [vmem:[%s8956_s13 + $0xb0] sm:$0xff] }
 0x541   :  { %v6018_v49 = vpop.f32.mrf.mxu1  ;;  %6131 = vmatprep.mubr.msk.f32.mxu0 %vm7324_vm0, %v7323_v1 }
 0x542   :  { %v5015_v49 = vld [vmem:[%s8956_s13 + $0xa8] sm:$0xff] }
 0x543   :  { %v8248_v24 = vpop.f32.mrf.mxu1 }
 0x544   :  { %6132 = vmatmul.mubr.msk.f32.vlgmr.msra.gmra.mxu0 %vm477_vm4, %v7871_v42 }
 0x545   :  { %v6098_v21 = vpop.f32.mrf.mxu1  ;;  %6134 = vmatprep.mubr.msk.f32.mxu0 %vm7324_vm0, %v7323_v1 }
 0x546   :  { %v5014_v21 = vld [vmem:[%s8956_s13 + $0xa0] sm:$0xff] }
 0x547   :  { %v8254_v22 = vpop.f32.mrf.mxu1 }
 0x548   :  { %6135 = vmatmul.mubr.msk.f32.gmra.mxu0 %vm477_vm4, %v7877_v43 }
 0x549   :  { %v6101_v17 = vpop.f32.mrf.mxu1  ;;  %6137 = vmatprep.mubr.msk.f32.mxu0 %vm7324_vm0, %v7323_v1 }
 0x54a   :  { %v5013_v17 = vld [vmem:[%s8956_s13 + $0x98] sm:$0xff] }
 0x54b   :  { %v8260_v50 = vpop.f32.mrf.mxu1 }
 0x54c   :  { %6138 = vmatmul.mubr.msk.f32.gmra.mxu0 %vm477_vm4, %v7883_v44 }
 0x54d   :  { %v6104_v51 = vpop.f32.mrf.mxu1  ;;  %6140 = vmatprep.mubr.msk.f32.mxu0 %vm7324_vm0, %v7323_v1 }
 0x54e   :  { %v5012_v51 = vld [vmem:[%s8956_s13 + $0x90] sm:$0xff] }
 0x54f   :  { %v8266_v42 = vpop.f32.mrf.mxu1 }
 0x550   :  { %6141 = vmatmul.mubr.msk.f32.gmra.mxu0 %vm477_vm4, %v7889_v45 }
 0x551   :  { %v6107_v52 = vpop.f32.mrf.mxu1  ;;  %6143 = vmatprep.mubr.msk.f32.mxu0 %vm7324_vm0, %v7323_v1 }
 0x552   :  { %v5011_v52 = vld [vmem:[%s8956_s13 + $0x88] sm:$0xff] }
 0x553   :  { %v8272_v43 = vpop.f32.mrf.mxu1 }
 0x554   :  { %6144 = vmatmul.mubr.msk.f32.gmra.mxu0 %vm477_vm4, %v7895_v46  ;;  %v4992_v46 = vld [vmem:[%s8955_s26 + $0x148] sm:$0xff] }
 0x555   :  { %v6110_v20 = vpop.f32.mrf.mxu1  ;;  %6146 = vmatprep.mubr.msk.f32.mxu0 %vm7324_vm0, %v7323_v1  ;;  %6153 = vmatpush3.msra.mxu1 %v4992_v46  ;;  %v1777_v46 = vld [vmem:[#allocation8] sm:$0xff] }
 0x556   :  { %6154 = vmatprep.subr.mxu1 %v7323_v1  ;;  %v5010_v20 = vld [vmem:[%s8956_s13 + $0x80] sm:$0xff] }
 0x557   :  { %v8278_v44 = vpop.f32.mrf.mxu1 }
 0x558   :  { %6147 = vmatmul.mubr.msk.f32.gmra.mxu0 %vm477_vm4, %v7901_v47  ;;  %v4991_v47 = vld [vmem:[%s8955_s26 + $0x140] sm:$0xff] }
 0x559   :  { %v6113_v26 = vpop.f32.mrf.mxu1  ;;  %6149 = vmatprep.mubr.msk.f32.mxu0 %vm7324_vm0, %v7323_v1  ;;  %6155 = vmatpush3.msra.mxu1 %v4991_v47 }
 0x55a   :  { %6156 = vmatprep.subr.mxu1 %v7323_v1  ;;  %v5009_v26 = vld [vmem:[%s8956_s13 + $0x78] sm:$0xff] }
 0x55b   :  { %v8284_v45 = vpop.f32.mrf.mxu1  ;;  %6157 = vmatpush3.msra.mxu1 %v4990_v25 }
 0x55c   :  { %6150 = vmatmul.mubr.msk.f32.gmra.mxu0 %vm477_vm4, %v7907_v48  ;;  %6158 = vmatprep.subr.mxu1 %v7323_v1  ;;  %v4989_v48 = vld [vmem:[%s8955_s26 + $0x130] sm:$0xff] }
 0x55d   :  { %v6116_v13 = vpop.f32.mrf.mxu1  ;;  %6159 = vmatpush3.msra.mxu1 %v4989_v48  ;;  %6215 = vmatprep.mubr.msk.f32.mxu0 %vm477_vm4, %v1777_v46  ;;  %v2207_v46 = vld [vmem:[#allocation8 + $0x58] sm:$0xf] }
 0x55e   :  { %6160 = vmatprep.subr.mxu1 %v7323_v1  ;;  %v5008_v13 = vld [vmem:[%s8956_s13 + $0x70] sm:$0xff] }
 0x55f   :  { %6161 = vmatpush3.msra.mxu1 %v4988_v53 }
 0x560   :  { %6162 = vmatprep.subr.mxu1 %v7323_v1 }
 0x561   :  { %6163 = vmatpush3.msra.mxu1 %v4987_v18 }
 0x562   :  { %6164 = vmatprep.subr.mxu1 %v7323_v1 }
 0x563   :  { %6165 = vmatpush3.msra.mxu1 %v4986_v11 }
 0x564   :  { %6166 = vmatprep.subr.mxu1 %v7323_v1 }
 0x565   :  { %6167 = vmatpush3.msra.mxu1 %v4985_v54 }
 0x566   :  { %6168 = vmatprep.subr.mxu1 %v7323_v1 }
 0x567   :  { %6169 = vmatpush3.msra.mxu1 %v4984_v55 }
 0x568   :  { %6170 = vmatprep.subr.mxu1 %v7323_v1 }
 0x569   :  { %6171 = vmatpush3.msra.mxu1 %v4983_v16 }
 0x56a   :  { %6172 = vmatprep.subr.mxu1 %v7323_v1 }
 0x56b   :  { %6173 = vmatpush3.msra.mxu1 %v4982_v9 }
 0x56c   :  { %6174 = vmatprep.subr.mxu1 %v7323_v1 }
 0x56d   :  { %6175 = vmatpush3.msra.mxu1 %v4981_v63 }
 0x56e   :  { %6176 = vmatprep.subr.mxu1 %v7323_v1 }
 0x56f   :  { %6177 = vmatpush3.msra.mxu1 %v4980_v14 }
 0x570   :  { %6178 = vmatprep.subr.mxu1 %v7323_v1 }
 0x571   :  { %6179 = vmatpush3.msra.mxu1 %v4979_v7 }
 0x572   :  { %6241 = vmatprep.subr.mxu1 %v5021_v0 }
 0x5e8   :  { %v8346_v2 = vpop.f32.mrf.mxu0 }
 0x5ea   :  { %v6049_v3 = vpop.f32.mrf.mxu0 }
 0x5ec   :  { %v8348_v4 = vpop.f32.mrf.mxu0 }
 0x5ee   :  { %v6052_v5 = vpop.f32.mrf.mxu0 }
 0x5f0   :  { %v8350_v6 = vpop.f32.mrf.mxu0 }
 0x5f2   :  { %v6055_v8 = vpop.f32.mrf.mxu0 }
 0x5f4   :  { %v8352_v10 = vpop.f32.mrf.mxu0 }
 0x5f6   :  { %v6058_v12 = vpop.f32.mrf.mxu0 }
 0x5f8   :  { %v8354_v15 = vpop.f32.mrf.mxu0 }
 0x5f9   :  { %v1521_v12 = vadd.f32 %v8272_v43, %v8354_v15  ;;  %v1511_v43 = vadd.f32 %v8260_v50, %v8350_v6  ;;  %v1506_v15 = vadd.f32 %v8254_v22, %v8348_v4  ;;  %v1778_v22 = vld [vmem:[#allocation8 + $0x8] sm:$0xff]  ;;  %v1779_v4 = vld [vmem:[#allocation8 + $0x10] sm:$0xff] }
 0x5fa   :  { %v6061_v56 = vpop.f32.mrf.mxu0  ;;  %v1894_v6 = vld [vmem:[#allocation8 + $0x28] sm:$0xff] }
 0x5fc   :  { %v8356_v19 = vpop.f32.mrf.mxu0 }
 0x5fd   :  { %v1526_v3 = vadd.f32 %v8278_v44, %v8356_v19 }
 0x5fe   :  { %v6064_v57 = vpop.f32.mrf.mxu0 }
 0x600   :  { %v8358_v23 = vpop.f32.mrf.mxu0 }
 0x601   :  { %v1531_v7 = vadd.f32 %v8284_v45, %v8358_v23  ;;  %v1516_v45 = vadd.f32 %v8266_v42, %v8352_v10  ;;  %v1501_v42 = vadd.f32 %v8248_v24, %v8346_v2  ;;  %v1780_v24 = vld [vmem:[#allocation8 + $0x18] sm:$0xf]  ;;  %v1893_v2 = vld [vmem:[#allocation8 + $0x20] sm:$0xff] }
 0x602   :  { %v6067_v58 = vpop.f32.mrf.mxu0  ;;  %v1891_v23 = vld [vmem:[%s8956_s13 + $0x68] sm:$0xff] }
 0x603   :  { %v1895_v58 = vld [vmem:[#allocation8 + $0x30] sm:$0xff] }
 0x604   :  { %v1600_v27 = vpop.f32.mrf.mxu0 }
 0x605   :  { %6181 = vmatmul.mubr.msk.f32.vlgmr.msra.gmra.mxu1 %vm613_vm3, %v1600_v27  ;;  %v1890_v27 = vld [vmem:[%s8956_s13 + $0x60] sm:$0xff] }
 0x606   :  { %v6133_v59 = vpop.f32.mrf.mxu0  ;;  %6183 = vmatprep.mubr.msk.f32.mxu1 %vm7324_vm0, %v7323_v1  ;;  %6242 = vmatpush3.msra.mxu1 %v5021_v0 }
 0x607   :  { %6243 = vmatprep.subr.mxu1 %v5020_v38  ;;  %v1896_v59 = vld [vmem:[#allocation8 + $0x38] sm:$0xf] }
 0x608   :  { %v1605_v28 = vpop.f32.mrf.mxu0  ;;  %6244 = vmatpush3.msra.mxu1 %v5020_v38 }
 0x609   :  { %6184 = vmatmul.mubr.msk.f32.gmra.mxu1 %vm613_vm3, %v1605_v28  ;;  %6245 = vmatprep.subr.mxu1 %v5019_v39  ;;  %v1889_v28 = vld [vmem:[%s8956_s13 + $0x58] sm:$0xff] }
 0x60a   :  { %v6136_v60 = vpop.f32.mrf.mxu0  ;;  %6186 = vmatprep.mubr.msk.f32.mxu1 %vm7324_vm0, %v7323_v1  ;;  %6246 = vmatpush3.msra.mxu1 %v5019_v39 }
 0x60b   :  { %6247 = vmatprep.subr.mxu1 %v5018_v40  ;;  %v1888_v60 = vld [vmem:[%s8956_s13 + $0x50] sm:$0xff] }
 0x60c   :  { %v1610_v29 = vpop.f32.mrf.mxu0  ;;  %6248 = vmatpush3.msra.mxu1 %v5018_v40 }
 0x60d   :  { %6187 = vmatmul.mubr.msk.f32.gmra.mxu1 %vm613_vm3, %v1610_v29  ;;  %6249 = vmatprep.subr.mxu1 %v5017_v36  ;;  %v1887_v29 = vld [vmem:[%s8956_s13 + $0x48] sm:$0xff] }
 0x60e   :  { %v6139_v61 = vpop.f32.mrf.mxu0  ;;  %6189 = vmatprep.mubr.msk.f32.mxu1 %vm7324_vm0, %v7323_v1  ;;  %6250 = vmatpush3.msra.mxu1 %v5017_v36 }
 0x60f   :  { %6251 = vmatprep.subr.mxu1 %v5016_v41  ;;  %v1886_v61 = vld [vmem:[%s8956_s13 + $0x40] sm:$0xff] }
 0x610   :  { %v1615_v62 = vpop.f32.mrf.mxu0  ;;  %6252 = vmatpush3.msra.mxu1 %v5016_v41 }
 0x611   :  { %6190 = vmatmul.mubr.msk.f32.gmra.mxu1 %vm613_vm3, %v1615_v62  ;;  %6253 = vmatprep.subr.mxu1 %v5015_v49  ;;  %v1885_v62 = vld [vmem:[%s8956_s13 + $0x38] sm:$0xff] }
 0x612   :  { %v6142_v30 = vpop.f32.mrf.mxu0  ;;  %6192 = vmatprep.mubr.msk.f32.mxu1 %vm7324_vm0, %v7323_v1  ;;  %6254 = vmatpush3.msra.mxu1 %v5015_v49 }
 0x613   :  { %6255 = vmatprep.subr.mxu1 %v5014_v21  ;;  %v1884_v30 = vld [vmem:[%s8956_s13 + $0x30] sm:$0xff] }
 0x614   :  { %v1620_v31 = vpop.f32.mrf.mxu0  ;;  %6256 = vmatpush3.msra.mxu1 %v5014_v21 }
 0x615   :  { %6193 = vmatmul.mubr.msk.f32.gmra.mxu1 %vm613_vm3, %v1620_v31  ;;  %6257 = vmatprep.subr.mxu1 %v5013_v17  ;;  %v1883_v31 = vld [vmem:[%s8956_s13 + $0x28] sm:$0xff] }
 0x616   :  { %v6145_v32 = vpop.f32.mrf.mxu0  ;;  %6195 = vmatprep.mubr.msk.f32.mxu1 %vm7324_vm0, %v7323_v1  ;;  %6258 = vmatpush3.msra.mxu1 %v5013_v17 }
 0x617   :  { %6259 = vmatprep.subr.mxu1 %v5012_v51  ;;  %v1882_v32 = vld [vmem:[%s8956_s13 + $0x20] sm:$0xff] }
 0x618   :  { %v1625_v33 = vpop.f32.mrf.mxu0  ;;  %6260 = vmatpush3.msra.mxu1 %v5012_v51  ;;  %v2204_v51 = vld [vmem:[#allocation8 + $0x40] sm:$0xff] }
 0x619   :  { %6196 = vmatmul.mubr.msk.f32.gmra.mxu1 %vm613_vm3, %v1625_v33  ;;  %6261 = vmatprep.subr.mxu1 %v5011_v52  ;;  %v1881_v33 = vld [vmem:[%s8956_s13 + $0x18] sm:$0xff] }
 0x61a   :  { %v6148_v34 = vpop.f32.mrf.mxu0  ;;  %6198 = vmatprep.mubr.msk.f32.mxu1 %vm7324_vm0, %v7323_v1  ;;  %6262 = vmatpush3.msra.mxu1 %v5011_v52  ;;  %v2205_v52 = vld [vmem:[#allocation8 + $0x48] sm:$0xff] }
 0x61b   :  { %6263 = vmatprep.subr.mxu1 %v5010_v20  ;;  %v1880_v34 = vld [vmem:[%s8956_s13 + $0x10] sm:$0xff] }
 0x61c   :  { %v1630_v35 = vpop.f32.mrf.mxu0  ;;  %6264 = vmatpush3.msra.mxu1 %v5010_v20  ;;  %v5047_v20 = vld [vmem:[%s8956_s13 + $0x148] sm:$0xff] }
 0x61d   :  { %6199 = vmatmul.mubr.msk.f32.gmra.mxu1 %vm613_vm3, %v1630_v35  ;;  %6265 = vmatprep.subr.mxu1 %v5009_v26  ;;  %v1879_v35 = vld [vmem:[%s8956_s13 + $0x8] sm:$0xff] }
 0x61e   :  { %v6151_v37 = vpop.f32.mrf.mxu0  ;;  %6266 = vmatpush3.msra.mxu1 %v5009_v26  ;;  %v2206_v26 = vld [vmem:[#allocation8 + $0x50] sm:$0xff] }
 0x61f   :  { %6267 = vmatprep.subr.mxu1 %v5008_v13  ;;  %v1878_v37 = vld [vmem:[%s8956_s13] sm:$0xff] }
 0x620   :  { %6268 = vmatpush3.msra.mxu1 %v5008_v13  ;;  %v5046_v13 = vld [vmem:[%s8956_s13 + $0x140] sm:$0xff] }
 0x6c5   :  { %v1736_v47 = vpop.f32.mrf.mxu1 }
 0x6c6   :  { %v8456_v50 = vadd.f32 %v1736_v47, %v1501_v42  ;;  %v5045_v47 = vld [vmem:[%s8956_s13 + $0x138] sm:$0xff] }
 0x6c7   :  { %v6182_v25 = vpop.f32.mrf.mxu1 }
 0x6c8   :  { %v5044_v25 = vld [vmem:[%s8956_s13 + $0x130] sm:$0xff] }
 0x6c9   :  { %v1741_v48 = vpop.f32.mrf.mxu1 }
 0x6ca   :  { %v8452_v10 = vadd.f32 %v1741_v48, %v1506_v15  ;;  %v5043_v48 = vld [vmem:[%s8956_s13 + $0x128] sm:$0xff] }
 0x6cb   :  { %v6185_v53 = vpop.f32.mrf.mxu1 }
 0x6cc   :  { %v5042_v53 = vld [vmem:[%s8956_s13 + $0x120] sm:$0xff] }
 0x6cd   :  { %v1746_v18 = vpop.f32.mrf.mxu1 }
 0x6ce   :  { %v8446_v19 = vadd.f32 %v1746_v18, %v1511_v43  ;;  %v5041_v18 = vld [vmem:[%s8956_s13 + $0x118] sm:$0xff] }
 0x6cf   :  { %v6188_v11 = vpop.f32.mrf.mxu1 }
 0x6d0   :  { %v5040_v11 = vld [vmem:[%s8956_s13 + $0x110] sm:$0xff] }
 0x6d1   :  { %v1751_v54 = vpop.f32.mrf.mxu1 }
 0x6d2   :  { %v8440_v44 = vadd.f32 %v1751_v54, %v1516_v45  ;;  %v5039_v54 = vld [vmem:[%s8956_s13 + $0x108] sm:$0xff]  ;;  %v2570_v45 = vld [vmem:[#allocation11 + $0x30] sm:$0xff] }
 0x6d3   :  { %v6191_v55 = vpop.f32.mrf.mxu1 }
 0x6d4   :  { %v5038_v55 = vld [vmem:[%s8956_s13 + $0x100] sm:$0xff] }
 0x6d5   :  { %v1756_v16 = vpop.f32.mrf.mxu1 }
 0x6d6   :  { %v8434_v57 = vadd.f32 %v1756_v16, %v1521_v12  ;;  %v5037_v16 = vld [vmem:[%s8956_s13 + $0xf8] sm:$0xff]  ;;  %v2572_v12 = vld [vmem:[#allocation11 + $0x40] sm:$0xff] }
 0x6d7   :  { %v6194_v9 = vpop.f32.mrf.mxu1 }
 0x6d8   :  { %v5036_v9 = vld [vmem:[%s8956_s13 + $0xf0] sm:$0xff] }
 0x6d9   :  { %v1761_v63 = vpop.f32.mrf.mxu1 }
 0x6da   :  { %v8427_v56 = vadd.f32 %v1761_v63, %v1526_v3  ;;  %v5035_v63 = vld [vmem:[%s8956_s13 + $0xe8] sm:$0xff] }
 0x6db   :  { %v6197_v14 = vpop.f32.mrf.mxu1  ;;  %v2575_v3 = vld [vmem:[#allocation11 + $0x58] sm:$0xff] }
 0x6dc   :  { %v5034_v14 = vld [vmem:[%s8956_s13 + $0xe0] sm:$0xff] }
 0x6dd   :  { %v1766_v0 = vpop.f32.mrf.mxu1 }
 0x6de   :  { %v8423_v5 = vadd.f32 %v1766_v0, %v1531_v7  ;;  %v2577_v7 = vld [vmem:[#allocation11 + $0x68] sm:$0xff]  ;;  %v2576_v0 = vld [vmem:[#allocation11 + $0x60] sm:$0xff] }
 0x6df   :  { %v6200_v8 = vpop.f32.mrf.mxu1 }
 0x6e0   :  { %6201 = vmatprep.subr.mxu0 %v8423_v5  ;;  %6309 = vmatprep.subr.mxu1 %v8423_v5  ;;  %v2573_v8 = vld [vmem:[#allocation11 + $0x48] sm:$0xff] }
 0x6e1   :  { %6202 = vmatpush3.msra.mxu0 %v8423_v5 }
 0x6e2   :  { %6203 = vmatprep.subr.mxu0 %v8427_v56 }
 0x6e3   :  { %6204 = vmatpush3.msra.mxu0 %v8427_v56 }
 0x6e4   :  { %6205 = vmatprep.subr.mxu0 %v8434_v57 }
 0x6e5   :  { %6206 = vmatpush3.msra.mxu0 %v8434_v57 }
 0x6e6   :  { %6207 = vmatprep.subr.mxu0 %v8440_v44 }
 0x6e7   :  { %6208 = vmatpush3.msra.mxu0 %v8440_v44 }
 0x6e8   :  { %6209 = vmatprep.subr.mxu0 %v8446_v19 }
 0x6e9   :  { %6210 = vmatpush3.msra.mxu0 %v8446_v19 }
 0x6ea   :  { %6211 = vmatprep.subr.mxu0 %v8452_v10 }
 0x6eb   :  { %6212 = vmatpush3.msra.mxu0 %v8452_v10 }
 0x6ec   :  { %6213 = vmatprep.subr.mxu0 %v8456_v50 }
 0x6ed   :  { %6214 = vmatpush3.msra.mxu0 %v8456_v50 }
 0x6ee   :  { %6221 = vmatprep.subr.mxu0 %v8423_v5  ;;  %6216 = vmatmul.mubr.msk.f32.vlgmr.msra.gmra.mxu0 %vm477_vm4, %v1778_v22  ;;  %v2569_v22 = vld [vmem:[#allocation11 + $0x28] sm:$0xff] }
 0x6ef   :  { %6222 = vmatpush3.msra.mxu0 %v8423_v5  ;;  %6218 = vmatprep.mubr.msk.f32.mxu0 %vm477_vm4, %v1779_v4  ;;  %v2568_v4 = vld [vmem:[#allocation11 + $0x20] sm:$0xff] }
 0x6f0   :  { %6223 = vmatprep.subr.mxu0 %v8427_v56 }
 0x6f1   :  { %6224 = vmatpush3.msra.mxu0 %v8427_v56 }
 0x6f2   :  { %6225 = vmatprep.subr.mxu0 %v8434_v57  ;;  %6219 = vmatmul.mubr.msk.f32.gmra.mxu0 %vm477_vm4, %v1780_v24  ;;  %v2567_v24 = vld [vmem:[#allocation11 + $0x18] sm:$0xff] }
 0x6f3   :  { %6226 = vmatpush3.msra.mxu0 %v8434_v57  ;;  %6235 = vmatprep.mubr.msk.f32.mxu0 %vm477_vm4, %v1893_v2  ;;  %v2566_v2 = vld [vmem:[#allocation11 + $0x10] sm:$0xff] }
 0x6f4   :  { %6227 = vmatprep.subr.mxu0 %v8440_v44 }
 0x6f5   :  { %6228 = vmatpush3.msra.mxu0 %v8440_v44 }
 0x6f6   :  { %6229 = vmatprep.subr.mxu0 %v8446_v19 }
 0x6f7   :  { %6230 = vmatpush3.msra.mxu0 %v8446_v19 }
 0x6f8   :  { %6231 = vmatprep.subr.mxu0 %v8452_v10 }
 0x6f9   :  { %6232 = vmatpush3.msra.mxu0 %v8452_v10 }
 0x6fa   :  { %6233 = vmatprep.subr.mxu0 %v8456_v50 }
 0x6fb   :  { %6234 = vmatpush3.msra.mxu0 %v8456_v50 }
 0x6fc   :  { %6236 = vmatmul.mubr.msk.f32.vlgmr.msra.gmra.mxu0 %vm477_vm4, %v1894_v6  ;;  %6275 = vmatprep.subr.mxu0 %v1891_v23  ;;  %v2565_v6 = vld [vmem:[#allocation11 + $0x8] sm:$0xff] }
 0x6fd   :  { %6238 = vmatprep.mubr.msk.f32.mxu0 %vm477_vm4, %v1895_v58  ;;  %6276 = vmatpush3.msra.mxu0 %v1891_v23  ;;  %v2564_v23 = vld [vmem:[#allocation11] sm:$0xff]  ;;  %v8599_v58 = vld [vmem:[%s8957_s4] sm:$0xff] }
 0x6fe   :  { %6277 = vmatprep.subr.mxu0 %v1890_v27 }
 0x6ff   :  { %6278 = vmatpush3.msra.mxu0 %v1890_v27 }
 0x700   :  { %6239 = vmatmul.mubr.msk.f32.gmra.mxu0 %vm477_vm4, %v1896_v59  ;;  %6279 = vmatprep.subr.mxu0 %v1889_v28 }
 0x701   :  { %6280 = vmatpush3.msra.mxu0 %v1889_v28 }
 0x702   :  { %6281 = vmatprep.subr.mxu0 %v1888_v60 }
 0x703   :  { %6282 = vmatpush3.msra.mxu0 %v1888_v60 }
 0x704   :  { %6283 = vmatprep.subr.mxu0 %v1887_v29 }
 0x705   :  { %6284 = vmatpush3.msra.mxu0 %v1887_v29 }
 0x706   :  { %6285 = vmatprep.subr.mxu0 %v1886_v61 }
 0x707   :  { %6286 = vmatpush3.msra.mxu0 %v1886_v61 }
 0x708   :  { %6287 = vmatprep.subr.mxu0 %v1885_v62 }
 0x709   :  { %6288 = vmatpush3.msra.mxu0 %v1885_v62 }
 0x70a   :  { %6289 = vmatprep.subr.mxu0 %v1884_v30 }
 0x70b   :  { %6290 = vmatpush3.msra.mxu0 %v1884_v30 }
 0x70c   :  { %6291 = vmatprep.subr.mxu0 %v1883_v31 }
 0x70d   :  { %6292 = vmatpush3.msra.mxu0 %v1883_v31 }
 0x70e   :  { %6293 = vmatprep.subr.mxu0 %v1882_v32 }
 0x70f   :  { %6294 = vmatpush3.msra.mxu0 %v1882_v32 }
 0x710   :  { %6295 = vmatprep.subr.mxu0 %v1881_v33 }
 0x711   :  { %6296 = vmatpush3.msra.mxu0 %v1881_v33  ;;  %v5052_v33 = vld [vmem:[#allocation10] ss:$0 sm:$0xff] }
 0x712   :  { %6297 = vmatprep.subr.mxu0 %v1880_v34 }
 0x713   :  { %6298 = vmatpush3.msra.mxu0 %v1880_v34 }
 0x714   :  { %6299 = vmatprep.subr.mxu0 %v1879_v35 }
 0x715   :  { %6300 = vmatpush3.msra.mxu0 %v1879_v35 }
 0x716   :  { %6301 = vmatprep.subr.mxu0 %v1878_v37 }
 0x717   :  { %6302 = vmatpush3.msra.mxu0 %v1878_v37 }
 0x718   :  { %6377 = vmatprep.subr.mxu0 %v2577_v7 }
 0x7ae   :  { %v6217_v38 = vpop.f32.mrf.mxu0 }
 0x7b0   :  { %v1859_v39 = vpop.f32.mrf.mxu0 }
 0x7b1   :  { %6303 = vmatprep.mubr.msk.f32.mxu0 %vm613_vm3, %v1859_v39 }
 0x7b2   :  { %v6220_v40 = vpop.f32.mrf.mxu0  ;;  %6304 = vmatmul.mubr.msk.f32.vlgmr.msra.gmra.mxu0 %vm613_vm3, %v6217_v38 }
 0x7b3   :  { %6378 = vmatpush3.msra.mxu0 %v2577_v7  ;;  %v2450_v7 = vld [vmem:[#allocation11 + $0x98] sm:$0xff] }
 0x7b4   :  { %v1869_v36 = vpop.f32.mrf.mxu0  ;;  %6379 = vmatprep.subr.mxu0 %v2576_v0 }
 0x7b5   :  { %6306 = vmatprep.mubr.msk.f32.mxu0 %vm613_vm3, %v1869_v36  ;;  %6380 = vmatpush3.msra.mxu0 %v2576_v0  ;;  %v2449_v0 = vld [vmem:[#allocation11 + $0x90] sm:$0xff] }
 0x7b6   :  { %6307 = vmatmul.mubr.msk.f32.gmra.mxu0 %vm613_vm3, %v6220_v40  ;;  %6381 = vmatprep.subr.mxu0 %v2575_v3 }
 0x7b7   :  { %6382 = vmatpush3.msra.mxu0 %v2575_v3  ;;  %v2448_v3 = vld [vmem:[#allocation11 + $0x88] sm:$0xff] }
 0x7bc   :  { %v6237_v41 = vpop.f32.mrf.mxu0 }
 0x7be   :  { %v1975_v49 = vpop.f32.mrf.mxu0 }
 0x7bf   :  { %6269 = vmatprep.mubr.msk.f32.mxu1 %vm613_vm3, %v1975_v49 }
 0x7c0   :  { %6270 = vmatmul.mubr.msk.f32.vlgmr.msra.gmra.mxu1 %vm613_vm3, %v6237_v41  ;;  %v6240_v21 = vpop.f32.mrf.mxu0 }
 0x7c1   :  { %6310 = vmatpush3.msra.mxu1 %v8423_v5  ;;  %v2574_v5 = vld [vmem:[#allocation11 + $0x50] sm:$0xff] }
 0x7c2   :  { %6311 = vmatprep.subr.mxu1 %v8427_v56  ;;  %v1985_v17 = vpop.f32.mrf.mxu0  ;;  %6383 = vmatprep.subr.mxu0 %v2574_v5 }
 0x7c3   :  { %6312 = vmatpush3.msra.mxu1 %v8427_v56  ;;  %6272 = vmatprep.mubr.msk.f32.mxu1 %vm613_vm3, %v1985_v17  ;;  %v2571_v56 = vld [vmem:[#allocation11 + $0x38] sm:$0xff] }
 0x7c4   :  { %6313 = vmatprep.subr.mxu1 %v8434_v57  ;;  %6273 = vmatmul.mubr.msk.f32.gmra.mxu1 %vm613_vm3, %v6240_v21 }
 0x7c5   :  { %6314 = vmatpush3.msra.mxu1 %v8434_v57  ;;  %6323 = vmatprep.mubr.msk.f32.mxu1 %vm477_vm4, %v2204_v51 }
 0x7c6   :  { %6315 = vmatprep.subr.mxu1 %v8440_v44  ;;  %6384 = vmatpush3.msra.mxu0 %v2574_v5  ;;  %v2447_v5 = vld [vmem:[#allocation11 + $0x80] sm:$0xff] }
 0x7c7   :  { %6316 = vmatpush3.msra.mxu1 %v8440_v44  ;;  %6385 = vmatprep.subr.mxu0 %v2573_v8 }
 0x7c8   :  { %6317 = vmatprep.subr.mxu1 %v8446_v19  ;;  %6386 = vmatpush3.msra.mxu0 %v2573_v8  ;;  %v2446_v8 = vld [vmem:[#allocation11 + $0x78] sm:$0xff] }
 0x7c9   :  { %6318 = vmatpush3.msra.mxu1 %v8446_v19  ;;  %6387 = vmatprep.subr.mxu0 %v2572_v12 }
 0x7ca   :  { %6319 = vmatprep.subr.mxu1 %v8452_v10  ;;  %6388 = vmatpush3.msra.mxu0 %v2572_v12  ;;  %v2445_v12 = vld [vmem:[#allocation11 + $0x70] sm:$0xff] }
 0x7cb   :  { %6320 = vmatpush3.msra.mxu1 %v8452_v10  ;;  %6389 = vmatprep.subr.mxu0 %v2571_v56 }
 0x7cc   :  { %6321 = vmatprep.subr.mxu1 %v8456_v50  ;;  %6390 = vmatpush3.msra.mxu0 %v2571_v56 }
 0x7cd   :  { %6322 = vmatpush3.msra.mxu1 %v8456_v50  ;;  %6391 = vmatprep.subr.mxu0 %v2570_v45 }
 0x7ce   :  { %6324 = vmatmul.mubr.msk.f32.vlgmr.msra.gmra.mxu1 %vm477_vm4, %v2205_v52  ;;  %6329 = vmatprep.subr.mxu1 %v5047_v20 }
 0x7cf   :  { %6326 = vmatprep.mubr.msk.f32.mxu1 %vm477_vm4, %v2206_v26  ;;  %6330 = vmatpush3.msra.mxu1 %v5047_v20 }
 0x7d0   :  { %6331 = vmatprep.subr.mxu1 %v5046_v13  ;;  %6392 = vmatpush3.msra.mxu0 %v2570_v45 }
 0x7d1   :  { %6332 = vmatpush3.msra.mxu1 %v5046_v13  ;;  %6393 = vmatprep.subr.mxu0 %v2569_v22 }
 0x7d2   :  { %6327 = vmatmul.mubr.msk.f32.gmra.mxu1 %vm477_vm4, %v2207_v46  ;;  %6333 = vmatprep.subr.mxu1 %v5045_v47 }
 0x7d3   :  { %6334 = vmatpush3.msra.mxu1 %v5045_v47  ;;  %6394 = vmatpush3.msra.mxu0 %v2569_v22  ;;  %v2885_v22 = vld [vmem:[#allocation11 + $0x138] sm:$0xff] }
 0x7d4   :  { %6335 = vmatprep.subr.mxu1 %v5044_v25  ;;  %6395 = vmatprep.subr.mxu0 %v2568_v4 }
 0x7d5   :  { %6336 = vmatpush3.msra.mxu1 %v5044_v25  ;;  %6396 = vmatpush3.msra.mxu0 %v2568_v4  ;;  %v8624_v25 = vld [vmem:[%s8957_s4 + $0x8] sm:$0xff]  ;;  %v2884_v4 = vld [vmem:[#allocation11 + $0x130] sm:$0xff] }
 0x7d6   :  { %6337 = vmatprep.subr.mxu1 %v5043_v48  ;;  %6397 = vmatprep.subr.mxu0 %v2567_v24 }
 0x7d7   :  { %6338 = vmatpush3.msra.mxu1 %v5043_v48  ;;  %6398 = vmatpush3.msra.mxu0 %v2567_v24  ;;  %v2458_v48 = vld [vmem:[#allocation11 + $0xd8] sm:$0xff]  ;;  %v2883_v24 = vld [vmem:[#allocation11 + $0x128] sm:$0xff] }
 0x7d8   :  { %6339 = vmatprep.subr.mxu1 %v5042_v53  ;;  %6399 = vmatprep.subr.mxu0 %v2566_v2 }
 0x7d9   :  { %6340 = vmatpush3.msra.mxu1 %v5042_v53  ;;  %6400 = vmatpush3.msra.mxu0 %v2566_v2  ;;  %v8630_v53 = vld [vmem:[%s8957_s4 + $0x10] sm:$0xff] }
 0x7da   :  { %6341 = vmatprep.subr.mxu1 %v5041_v18  ;;  %6401 = vmatprep.subr.mxu0 %v2565_v6  ;;  %v2882_v2 = vld [vmem:[#allocation11 + $0x120] sm:$0xff] }
 0x7db   :  { %6342 = vmatpush3.msra.mxu1 %v5041_v18  ;;  %6402 = vmatpush3.msra.mxu0 %v2565_v6  ;;  %v2457_v18 = vld [vmem:[#allocation11 + $0xd0] sm:$0xff]  ;;  %v2881_v6 = vld [vmem:[#allocation11 + $0x118] sm:$0xff] }
 0x7dc   :  { %6343 = vmatprep.subr.mxu1 %v5040_v11  ;;  %6403 = vmatprep.subr.mxu0 %v2564_v23 }
 0x7dd   :  { %6344 = vmatpush3.msra.mxu1 %v5040_v11  ;;  %6404 = vmatpush3.msra.mxu0 %v2564_v23  ;;  %v8640_v11 = vld [vmem:[%s8957_s4 + $0x18] sm:$0xf]  ;;  %v2880_v23 = vld [vmem:[#allocation11 + $0x110] sm:$0xff] }
 0x7de   :  { %6345 = vmatprep.subr.mxu1 %v5039_v54 }
 0x7df   :  { %6346 = vmatpush3.msra.mxu1 %v5039_v54  ;;  %v2456_v54 = vld [vmem:[#allocation11 + $0xc8] sm:$0xff] }
 0x7e0   :  { %6347 = vmatprep.subr.mxu1 %v5038_v55 }
 0x7e1   :  { %6348 = vmatpush3.msra.mxu1 %v5038_v55  ;;  %v2455_v55 = vld [vmem:[#allocation11 + $0xc0] sm:$0xff] }
 0x7e2   :  { %6349 = vmatprep.subr.mxu1 %v5037_v16 }
 0x7e3   :  { %6350 = vmatpush3.msra.mxu1 %v5037_v16  ;;  %v2454_v16 = vld [vmem:[#allocation11 + $0xb8] sm:$0xff] }
 0x7e4   :  { %6351 = vmatprep.subr.mxu1 %v5036_v9 }
 0x7e5   :  { %6352 = vmatpush3.msra.mxu1 %v5036_v9  ;;  %v2453_v9 = vld [vmem:[#allocation11 + $0xb0] sm:$0xff] }
 0x7e6   :  { %6353 = vmatprep.subr.mxu1 %v5035_v63 }
 0x7e7   :  { %6354 = vmatpush3.msra.mxu1 %v5035_v63  ;;  %v2452_v63 = vld [vmem:[#allocation11 + $0xa8] sm:$0xff] }
 0x7e8   :  { %6355 = vmatprep.subr.mxu1 %v5034_v14 }
 0x7e9   :  { %6356 = vmatpush3.msra.mxu1 %v5034_v14  ;;  %v2451_v14 = vld [vmem:[#allocation11 + $0xa0] sm:$0xff] }
 0x872   :  { %v6305_v27 = vpop.f32.mrf.mxu0 }
 0x874   :  { %v2184_v59 = vpop.f32.mrf.mxu0 }
 0x876   :  { %v6308_v28 = vpop.f32.mrf.mxu0 }
 0x878   :  { %v2194_v32 = vpop.f32.mrf.mxu0 }
 0x880   :  { %v6271_v57 = vpop.f32.mrf.mxu1 }
 0x881   :  { %v2190_v29 = vadd.f32 %v6305_v27, %v6271_v57  ;;  %v2878_v27 = vld [vmem:[#allocation11 + $0x100] sm:$0xff] }
 0x882   :  { %v2087_v43 = vpop.f32.mrf.mxu1 }
 0x883   :  { %v2185_v62 = vadd.f32 %v2184_v59, %v2087_v43  ;;  %v2877_v59 = vld [vmem:[#allocation11 + $0xf8] sm:$0xff] }
 0x884   :  { %v6274_v44 = vpop.f32.mrf.mxu1 }
 0x885   :  { %v2200_v30 = vadd.f32 %v6308_v28, %v6274_v44  ;;  %v8662_v44 = vld [vmem:[%s8957_s4 + $0x20] sm:$0xff] }
 0x886   :  { %v2097_v15 = vpop.f32.mrf.mxu1  ;;  %v2876_v28 = vld [vmem:[#allocation11 + $0xf0] sm:$0xff] }
 0x887   :  { %v2195_v35 = vadd.f32 %v2194_v32, %v2097_v15  ;;  %v8674_v15 = vld [vmem:[%s8957_s4 + $0x28] sm:$0xff] }
 0x88e   :  { %v6325_v19 = vpop.f32.mrf.mxu1 }
 0x890   :  { %v2286_v42 = vpop.f32.mrf.mxu1 }
 0x891   :  { %6357 = vmatprep.mubr.msk.f32.mxu1 %vm613_vm3, %v2286_v42  ;;  %v8680_v42 = vld [vmem:[%s8957_s4 + $0x30] sm:$0xff] }
 0x892   :  { %v6328_v10 = vpop.f32.mrf.mxu1  ;;  %6358 = vmatmul.mubr.msk.f32.vlgmr.msra.gmra.mxu1 %vm613_vm3, %v6325_v19  ;;  %v2887_v19 = vld [vmem:[#allocation11 + $0x148] sm:$0xff] }
 0x894   :  { %v2296_v50 = vpop.f32.mrf.mxu1 }
 0x895   :  { %6360 = vmatprep.mubr.msk.f32.mxu1 %vm613_vm3, %v2296_v50  ;;  %v8690_v50 = vld [vmem:[%s8957_s4 + $0x38] sm:$0xf] }
 0x896   :  { %6361 = vmatmul.mubr.msk.f32.gmra.mxu1 %vm613_vm3, %v6328_v10  ;;  %v2886_v10 = vld [vmem:[#allocation11 + $0x140] sm:$0xff] }
 0x897   :  { %6371 = vmatprep.mubr.msk.f32.mxu1 %vm2463_vm12, %v8599_v58 }
 0x952   :  { %v6359_v60 = vpop.f32.mrf.mxu1 }
 0x953   :  { %v2418_v31 = vadd.f32 %v6359_v60, %v2190_v29  ;;  %v2875_v60 = vld [vmem:[#allocation11 + $0xe8] sm:$0xff]  ;;  %v2874_v29 = vld [vmem:[#allocation11 + $0xe0] sm:$0xff] }
 0x954   :  { %v2398_v61 = vpop.f32.mrf.mxu1 }
 0x955   :  { %v2417_v37 = vadd.f32 %v2398_v61, %v2185_v62  ;;  %v2429_v40 = vadd.f32 %v5052_v33, %v2418_v31  ;;  %v3026_v61 = vld [vmem:[#allocation13 + $0xd8] sm:$0xff] }
 0x956   :  { %v6362_v34 = vpop.f32.mrf.mxu1 }
 0x957   :  { %v2420_v38 = vadd.f32 %v6362_v34, %v2200_v30  ;;  %v2428_v49 = vadd.f32 %v5052_v33, %v2417_v37  ;;  %v2437_v51 = vmul.f32 0.2, %v2429_v40  ;;  %vm2433_vm15 = vcmp.gt.f32.partialorder %v2429_v40, 0.0 }
 0x958   :  { %v2408_v39 = vpop.f32.mrf.mxu1 }
 0x959   :  { %v2431_v36 = vadd.f32 %v5052_v33, %v2420_v38  ;;  %v2419_v41 = vadd.f32 %v2408_v39, %v2195_v35  ;;  %v2436_v26 = vmul.f32 0.2, %v2428_v49  ;;  %vm2432_vm2 = vcmp.gt.f32.partialorder %v2428_v49, 0.0  ;;  %v3025_v35 = vld [vmem:[#allocation13 + $0xd0] sm:$0xff]  ;;  %v3024_v38 = vld [vmem:[#allocation13 + $0xc8] sm:$0xff] }
 0x95a   :  { %v8615_v46 = vsel %vm2433_vm15, %v2429_v40, %v2437_v51  ;;  %v3023_v40 = vld [vmem:[#allocation13 + $0xc0] sm:$0xff]  ;;  %v3017_v51 = vld [vmem:[#allocation13 + $0x90] sm:$0xff] }
 0x95b   :  { %vm2435_vm13 = vcmp.gt.f32.partialorder %v2431_v36, 0.0  ;;  %v2439_v21 = vmul.f32 0.2, %v2431_v36  ;;  %v2430_v17 = vadd.f32 %v5052_v33, %v2419_v41  ;;  %v8619_v47 = vsel %vm2432_vm2, %v2428_v49, %v2436_v26  ;;  %v3021_v41 = vld [vmem:[#allocation13 + $0xb0] sm:$0xff]  ;;  %v3020_v49 = vld [vmem:[#allocation13 + $0xa8] sm:$0xff]  ;;  %v3014_v26 = vld [vmem:[#allocation13 + $0x78] sm:$0xff] }
 0x95d   :  { %vm2434_vm14 = vcmp.gt.f32.partialorder %v2430_v17, 0.0  ;;  %v2438_v52 = vmul.f32 0.2, %v2430_v17  ;;  %v8603_v20 = vsel %vm2435_vm13, %v2431_v36, %v2439_v21  ;;  %v3022_v36 = vld [vmem:[#allocation13 + $0xb8] sm:$0xff]  ;;  %v3019_v21 = vld [vmem:[#allocation13 + $0xa0] sm:$0xff]  ;;  %vm4837_vm13 = vcmask 123904  }
 0x95e   :  { %6363 = vmatprep.subr.msk.mxu1 %vm351_vm1, %v8603_v20  ;;  %6445 = vmatprep.subr.msk.mxu0 %vm351_vm1, %v8603_v20 }
 0x95f   :  { %6364 = vmatpush3.msk.msra.mxu1 %vm351_vm1, %v8603_v20  ;;  %v8611_v13 = vsel %vm2434_vm14, %v2430_v17, %v2438_v52  ;;  %v3018_v17 = vld [vmem:[#allocation13 + $0x98] sm:$0xff]  ;;  %v3016_v52 = vld [vmem:[#allocation13 + $0x88] sm:$0xff]  ;;  %vm4849_vm14 = vcmask 1024  }
 0x960   :  { %6365 = vmatprep.subr.mxu1 %v8611_v13 }
 0x961   :  { %6366 = vmatpush3.msra.mxu1 %v8611_v13 }
 0x962   :  { %6367 = vmatprep.subr.mxu1 %v8615_v46 }
 0x963   :  { %6368 = vmatpush3.msra.mxu1 %v8615_v46 }
 0x964   :  { %6369 = vmatprep.subr.mxu1 %v8619_v47 }
 0x965   :  { %6370 = vmatpush3.msra.mxu1 %v8619_v47 }
 0x966   :  { %6372 = vmatmul.mubr.msk.f32.vlgmr.msra.gmra.mxu1 %vm2463_vm12, %v8624_v25  ;;  %6411 = vmatprep.subr.mxu1 %v2458_v48 }
 0x967   :  { %6412 = vmatpush3.msra.mxu1 %v2458_v48  ;;  %6374 = vmatprep.mubr.msk.f32.mxu1 %vm2463_vm12, %v8630_v53 }
 0x968   :  { %6413 = vmatprep.subr.mxu1 %v2457_v18 }
 0x969   :  { %6414 = vmatpush3.msra.mxu1 %v2457_v18 }
 0x96a   :  { %6375 = vmatmul.mubr.msk.f32.gmra.mxu1 %vm2463_vm12, %v8640_v11  ;;  %6415 = vmatprep.subr.mxu1 %v2456_v54 }
 0x96b   :  { %6416 = vmatpush3.msra.mxu1 %v2456_v54  ;;  %6439 = vmatprep.mubr.msk.f32.mxu1 %vm613_vm3, %v8619_v47  ;;  %v5079_v54 = vld [vmem:[%s8913_s12] ss:$0 sm:$0xff] }
 0x96c   :  { %6417 = vmatprep.subr.mxu1 %v2455_v55 }
 0x96d   :  { %6418 = vmatpush3.msra.mxu1 %v2455_v55 }
 0x96e   :  { %6419 = vmatprep.subr.mxu1 %v2454_v16 }
 0x96f   :  { %6420 = vmatpush3.msra.mxu1 %v2454_v16 }
 0x970   :  { %6421 = vmatprep.subr.mxu1 %v2453_v9 }
 0x971   :  { %6422 = vmatpush3.msra.mxu1 %v2453_v9 }
 0x972   :  { %6423 = vmatprep.subr.mxu1 %v2452_v63 }
 0x973   :  { %6424 = vmatpush3.msra.mxu1 %v2452_v63 }
 0x974   :  { %6425 = vmatprep.subr.mxu1 %v2451_v14 }
 0x975   :  { %6426 = vmatpush3.msra.mxu1 %v2451_v14 }
 0x976   :  { %6427 = vmatprep.subr.mxu1 %v2450_v7 }
 0x977   :  { %6428 = vmatpush3.msra.mxu1 %v2450_v7 }
 0x978   :  { %6429 = vmatprep.subr.mxu1 %v2449_v0 }
 0x979   :  { %6430 = vmatpush3.msra.mxu1 %v2449_v0 }
 0x97a   :  { %6431 = vmatprep.subr.mxu1 %v2448_v3 }
 0x97b   :  { %6432 = vmatpush3.msra.mxu1 %v2448_v3 }
 0x97c   :  { %6433 = vmatprep.subr.mxu1 %v2447_v5 }
 0x97d   :  { %6434 = vmatpush3.msra.mxu1 %v2447_v5 }
 0x97e   :  { %6435 = vmatprep.subr.mxu1 %v2446_v8 }
 0x97f   :  { %6436 = vmatpush3.msra.mxu1 %v2446_v8 }
 0x980   :  { %6437 = vmatprep.subr.mxu1 %v2445_v12 }
 0x981   :  { %6438 = vmatpush3.msra.mxu1 %v2445_v12 }
 0x982   :  { %6440 = vmatmul.mubr.msk.f32.vlgmr.msra.gmra.mxu1 %vm613_vm3, %v8615_v46 }
 0x983   :  { %6442 = vmatprep.mubr.msk.f32.mxu1 %vm613_vm3, %v8611_v13 }
 0x986   :  { %6443 = vmatmul.mubr.msk.f32.gmra.mxu1 %vm613_vm3, %v8603_v20 }
 0x987   :  { %6501 = vmatprep.mubr.msk.f32.mxu1 %vm2463_vm12, %v8599_v58  ;;  %v2879_v58 = vld [vmem:[#allocation11 + $0x108] sm:$0xff] }
 0xa26   :  { %v6373_v56 = vpop.f32.mrf.mxu1 }
 0xa28   :  { %v2545_v45 = vpop.f32.mrf.mxu1 }
 0xa29   :  { %6405 = vmatprep.mubr.msk.f32.mxu0 %vm613_vm3, %v2545_v45 }
 0xa2a   :  { %v6376_v57 = vpop.f32.mrf.mxu1  ;;  %6406 = vmatmul.mubr.msk.f32.vlgmr.msra.gmra.mxu0 %vm613_vm3, %v6373_v56 }
 0xa2b   :  { %6446 = vmatpush3.msk.msra.mxu0 %vm351_vm1, %v8603_v20  ;;  %v3015_v20 = vld [vmem:[#allocation13 + $0x80] sm:$0xff] }
 0xa2c   :  { %6447 = vmatprep.subr.mxu0 %v8611_v13  ;;  %v2555_v43 = vpop.f32.mrf.mxu1 }
 0xa2d   :  { %6448 = vmatpush3.msra.mxu0 %v8611_v13  ;;  %6408 = vmatprep.mubr.msk.f32.mxu0 %vm613_vm3, %v2555_v43  ;;  %v3013_v13 = vld [vmem:[#allocation13 + $0x70] sm:$0xff] }
 0xa2e   :  { %6449 = vmatprep.subr.mxu0 %v8615_v46  ;;  %6409 = vmatmul.mubr.msk.f32.gmra.mxu0 %vm613_vm3, %v6376_v57 }
 0xa2f   :  { %6450 = vmatpush3.msra.mxu0 %v8615_v46  ;;  %6453 = vmatprep.mubr.msk.f32.mxu0 %vm2463_vm12, %v8662_v44 }
 0xa30   :  { %6451 = vmatprep.subr.mxu0 %v8619_v47 }
 0xa31   :  { %6452 = vmatpush3.msra.mxu0 %v8619_v47 }
 0xa32   :  { %6454 = vmatmul.mubr.msk.f32.vlgmr.msra.gmra.mxu0 %vm2463_vm12, %v8674_v15  ;;  %6459 = vmatprep.subr.mxu0 %v2887_v19 }
 0xa33   :  { %6456 = vmatprep.mubr.msk.f32.mxu0 %vm2463_vm12, %v8680_v42  ;;  %6460 = vmatpush3.msra.mxu0 %v2887_v19 }
 0xa34   :  { %6461 = vmatprep.subr.mxu0 %v2886_v10 }
 0xa35   :  { %6462 = vmatpush3.msra.mxu0 %v2886_v10 }
 0xa36   :  { %6457 = vmatmul.mubr.msk.f32.gmra.mxu0 %vm2463_vm12, %v8690_v50  ;;  %6463 = vmatprep.subr.mxu0 %v2885_v22 }
 0xa37   :  { %6464 = vmatpush3.msra.mxu0 %v2885_v22 }
 0xa38   :  { %6465 = vmatprep.subr.mxu0 %v2884_v4 }
 0xa39   :  { %6466 = vmatpush3.msra.mxu0 %v2884_v4 }
 0xa3a   :  { %6467 = vmatprep.subr.mxu0 %v2883_v24 }
 0xa3b   :  { %6468 = vmatpush3.msra.mxu0 %v2883_v24 }
 0xa3c   :  { %6469 = vmatprep.subr.mxu0 %v2882_v2 }
 0xa3d   :  { %6470 = vmatpush3.msra.mxu0 %v2882_v2 }
 0xa3e   :  { %6471 = vmatprep.subr.mxu0 %v2881_v6 }
 0xa3f   :  { %6472 = vmatpush3.msra.mxu0 %v2881_v6 }
 0xa40   :  { %6473 = vmatprep.subr.mxu0 %v2880_v23 }
 0xa41   :  { %6474 = vmatpush3.msra.mxu0 %v2880_v23 }
 0xa42   :  { %6475 = vmatprep.subr.mxu0 %v2879_v58  ;;  %v6441_v46 = vpop.f32.mrf.mxu1 }
 0xa43   :  { %6476 = vmatpush3.msra.mxu0 %v2879_v58 }
 0xa44   :  { %6477 = vmatprep.subr.mxu0 %v2878_v27  ;;  %v2752_v47 = vpop.f32.mrf.mxu1 }
 0xa45   :  { %6478 = vmatpush3.msra.mxu0 %v2878_v27  ;;  %v3128_v27 = vld [vmem:[#allocation13 + $0x68] sm:$0xff] }
 0xa46   :  { %6479 = vmatprep.subr.mxu0 %v2877_v59  ;;  %v6444_v55 = vpop.f32.mrf.mxu1 }
 0xa47   :  { %6480 = vmatpush3.msra.mxu0 %v2877_v59  ;;  %v3127_v59 = vld [vmem:[#allocation13 + $0x60] sm:$0xff] }
 0xa48   :  { %6481 = vmatprep.subr.mxu0 %v2876_v28  ;;  %v2762_v5 = vpop.f32.mrf.mxu1 }
 0xa49   :  { %6482 = vmatpush3.msra.mxu0 %v2876_v28  ;;  %v3126_v28 = vld [vmem:[#allocation13 + $0x58] sm:$0xff] }
 0xa4a   :  { %6483 = vmatprep.subr.mxu0 %v2875_v60 }
 0xa4b   :  { %6484 = vmatpush3.msra.mxu0 %v2875_v60  ;;  %v3125_v60 = vld [vmem:[#allocation13 + $0x50] sm:$0xff] }
 0xa4c   :  { %6485 = vmatprep.subr.mxu0 %v2874_v29 }
 0xa4d   :  { %6486 = vmatpush3.msra.mxu0 %v2874_v29  ;;  %v3124_v29 = vld [vmem:[#allocation13 + $0x48] sm:$0xff] }
 0xa4e   :  { %6541 = vmatprep.subr.mxu0 %v3026_v61 }
 0xaea   :  { %v6407_v62 = vpop.f32.mrf.mxu0 }
 0xaeb   :  { %v2758_v48 = vadd.f32 %v6441_v46, %v6407_v62  ;;  %v3121_v62 = vld [vmem:[#allocation13 + $0x30] sm:$0xff] }
 0xaec   :  { %v2656_v30 = vpop.f32.mrf.mxu0 }
 0xaed   :  { %v2753_v16 = vadd.f32 %v2752_v47, %v2656_v30  ;;  %v3119_v30 = vld [vmem:[#allocation13 + $0x20] sm:$0xff] }
 0xaee   :  { %v6410_v31 = vpop.f32.mrf.mxu0 }
 0xaef   :  { %v2768_v14 = vadd.f32 %v6444_v55, %v6410_v31  ;;  %v3117_v31 = vld [vmem:[#allocation13 + $0x10] sm:$0xff] }
 0xaf0   :  { %v8694_v32 = vpop.f32.mrf.mxu0 }
 0xaf1   :  { %v2763_v56 = vadd.f32 %v2762_v5, %v8694_v32  ;;  %v3116_v32 = vld [vmem:[#allocation13 + $0x8] sm:$0xff]  ;;  %v3616_v5 = vld [vmem:[#allocation16 + $0x38] sm:$0xff] }
 0xaf2   :  { %v6455_v33 = vpop.f32.mrf.mxu0 }
 0xaf4   :  { %v2854_v34 = vpop.f32.mrf.mxu0 }
 0xaf5   :  { %6487 = vmatprep.mubr.msk.f32.mxu0 %vm613_vm3, %v2854_v34 }
 0xaf6   :  { %v6458_v37 = vpop.f32.mrf.mxu0  ;;  %6488 = vmatmul.mubr.msk.f32.vlgmr.msra.gmra.mxu0 %vm613_vm3, %v6455_v33  ;;  %v3115_v33 = vld [vmem:[#allocation13] sm:$0xff] }
 0xaf7   :  { %6542 = vmatpush3.msra.mxu0 %v3026_v61  ;;  %v3123_v61 = vld [vmem:[#allocation13 + $0x40] sm:$0xff] }
 0xaf8   :  { %v2864_v39 = vpop.f32.mrf.mxu0  ;;  %6543 = vmatprep.subr.mxu0 %v3025_v35 }
 0xaf9   :  { %6490 = vmatprep.mubr.msk.f32.mxu0 %vm613_vm3, %v2864_v39  ;;  %6544 = vmatpush3.msra.mxu0 %v3025_v35  ;;  %v3421_v39 = vld [vmem:[#allocation13 + $0x148] sm:$0xff] }
 0xafa   :  { %6491 = vmatmul.mubr.msk.f32.gmra.mxu0 %vm613_vm3, %v6458_v37  ;;  %6545 = vmatprep.subr.mxu0 %v3024_v38 }
 0xafb   :  { %6546 = vmatpush3.msra.mxu0 %v3024_v38 }
 0xafc   :  { %6547 = vmatprep.subr.mxu0 %v3023_v40 }
 0xafd   :  { %6548 = vmatpush3.msra.mxu0 %v3023_v40  ;;  %v3420_v40 = vld [vmem:[#allocation13 + $0x140] sm:$0xff] }
 0xafe   :  { %6549 = vmatprep.subr.mxu0 %v3022_v36 }
 0xaff   :  { %6550 = vmatpush3.msra.mxu0 %v3022_v36  ;;  %v3419_v36 = vld [vmem:[#allocation13 + $0x138] sm:$0xff] }
 0xb00   :  { %6551 = vmatprep.subr.mxu0 %v3021_v41 }
 0xb01   :  { %6552 = vmatpush3.msra.mxu0 %v3021_v41  ;;  %v3418_v41 = vld [vmem:[#allocation13 + $0x130] sm:$0xff] }
 0xb02   :  { %6553 = vmatprep.subr.mxu0 %v3020_v49 }
 0xb03   :  { %6554 = vmatpush3.msra.mxu0 %v3020_v49  ;;  %v3416_v49 = vld [vmem:[#allocation13 + $0x120] sm:$0xff] }
 0xb04   :  { %6555 = vmatprep.subr.mxu0 %v3019_v21 }
 0xb05   :  { %6556 = vmatpush3.msra.mxu0 %v3019_v21  ;;  %v3413_v21 = vld [vmem:[#allocation13 + $0x108] sm:$0xff] }
 0xb06   :  { %6557 = vmatprep.subr.mxu0 %v3018_v17 }
 0xb07   :  { %6558 = vmatpush3.msra.mxu0 %v3018_v17  ;;  %v3411_v17 = vld [vmem:[#allocation13 + $0xf8] sm:$0xff] }
 0xb08   :  { %6559 = vmatprep.subr.mxu0 %v3017_v51 }
 0xb09   :  { %6560 = vmatpush3.msra.mxu0 %v3017_v51  ;;  %v3410_v51 = vld [vmem:[#allocation13 + $0xf0] sm:$0xff] }
 0xb0a   :  { %6561 = vmatprep.subr.mxu0 %v3016_v52 }
 0xb0b   :  { %6562 = vmatpush3.msra.mxu0 %v3016_v52  ;;  %v3409_v52 = vld [vmem:[#allocation13 + $0xe8] sm:$0xff] }
 0xb0c   :  { %6563 = vmatprep.subr.mxu0 %v3015_v20 }
 0xb0d   :  { %6564 = vmatpush3.msra.mxu0 %v3015_v20  ;;  %v3408_v20 = vld [vmem:[#allocation13 + $0xe0] sm:$0xff] }
 0xb0e   :  { %6565 = vmatprep.subr.mxu0 %v3014_v26 }
 0xb0f   :  { %6566 = vmatpush3.msra.mxu0 %v3014_v26 }
 0xb10   :  { %6567 = vmatprep.subr.mxu0 %v3013_v13 }
 0xb11   :  { %6568 = vmatpush3.msra.mxu0 %v3013_v13 }
 0xbb6   :  { %v6489_v18 = vpop.f32.mrf.mxu0 }
 0xbb7   :  { %v2986_v9 = vadd.f32 %v6489_v18, %v2758_v48 }
 0xbb8   :  { %v2966_v63 = vpop.f32.mrf.mxu0 }
 0xbb9   :  { %v2997_v7 = vadd.f32 %v5079_v54, %v2986_v9  ;;  %v2985_v0 = vadd.f32 %v2966_v63, %v2753_v16  ;;  %v3523_v16 = vld [vmem:[#allocation14] sm:$0xff]  ;;  %v3622_v9 = vld [vmem:[#allocation16 + $0x68] sm:$0xff]  ;;  %v3621_v63 = vld [vmem:[#allocation16 + $0x60] sm:$0xff] }
 0xbba   :  { %v6492_v3 = vpop.f32.mrf.mxu0 }
 0xbbb   :  { %v2996_v8 = vadd.f32 %v5079_v54, %v2985_v0  ;;  %v2988_v12 = vadd.f32 %v6492_v3, %v2768_v14  ;;  %v3005_v45 = vmul.f32 0.2, %v2997_v7  ;;  %vm3001_vm4 = vcmp.gt.f32.partialorder %v2997_v7, 0.0  ;;  %v3620_v14 = vld [vmem:[#allocation16 + $0x58] sm:$0xff]  ;;  %v3618_v0 = vld [vmem:[#allocation16 + $0x48] sm:$0xff]  ;;  %v3617_v3 = vld [vmem:[#allocation16 + $0x40] sm:$0xff] }
 0xbbc   :  { %v2976_v57 = vpop.f32.mrf.mxu0 }
 0xbbd   :  { %vm3000_vm5 = vcmp.gt.f32.partialorder %v2996_v8, 0.0  ;;  %v3004_v43 = vmul.f32 0.2, %v2996_v8  ;;  %v2999_v19 = vadd.f32 %v5079_v54, %v2988_v12  ;;  %v2987_v10 = vadd.f32 %v2976_v57, %v2763_v56  ;;  %v3614_v12 = vld [vmem:[#allocation16 + $0x28] sm:$0xff] }
 0xbbe   :  { %v8706_v24 = vsel %vm3001_vm4, %v2997_v7, %v3005_v45  ;;  %v3619_v7 = vld [vmem:[#allocation16 + $0x50] sm:$0xff] }
 0xbbf   :  { %vm3003_vm6 = vcmp.gt.f32.partialorder %v2999_v19, 0.0  ;;  %v3007_v22 = vmul.f32 0.2, %v2999_v19  ;;  %v8704_v4 = vsel %vm3000_vm5, %v2996_v8, %v3004_v43  ;;  %v2998_v2 = vadd.f32 %v5079_v54, %v2987_v10  ;;  %v3615_v8 = vld [vmem:[#allocation16 + $0x30] sm:$0xff] }
 0xbc0   :  { %6569 = vmatprep.mubr.msk.f32.mxu0 %vm613_vm3, %v8704_v4 }
 0xbc1   :  { %6570 = vmatmul.mubr.msk.f32.vlgmr.msra.gmra.mxu0 %vm613_vm3, %v8706_v24  ;;  %v8712_v6 = vsel %vm3003_vm6, %v2999_v19, %v3007_v22  ;;  %vm3002_vm7 = vcmp.gt.f32.partialorder %v2998_v2, 0.0  ;;  %v3006_v23 = vmul.f32 0.2, %v2998_v2 }
 0xbc2   :  { %6493 = vmatprep.subr.msk.mxu1 %vm351_vm1, %v8712_v6 }
 0xbc3   :  { %6494 = vmatpush3.msk.msra.mxu1 %vm351_vm1, %v8712_v6  ;;  %v3010_v58 = vsel %vm3002_vm7, %v2998_v2, %v3006_v23 }
 0xbc4   :  { %6495 = vmatprep.subr.mxu1 %v3010_v58  ;;  %6572 = vmatprep.mubr.msk.f32.mxu0 %vm613_vm3, %v3010_v58 }
 0xbc5   :  { %6496 = vmatpush3.msra.mxu1 %v3010_v58  ;;  %6573 = vmatmul.mubr.msk.f32.gmra.mxu0 %vm613_vm3, %v8712_v6 }
 0xbc6   :  { %6497 = vmatprep.subr.mxu1 %v8706_v24  ;;  %6631 = vmatprep.mubr.msk.f32.mxu0 %vm2463_vm12, %v3523_v16  ;;  %v3973_v16 = vld [vmem:[#allocation16 + $0x100] sm:$0xff] }
 0xbc7   :  { %6498 = vmatpush3.msra.mxu1 %v8706_v24 }
 0xbc8   :  { %6499 = vmatprep.subr.mxu1 %v8704_v4 }
 0xbc9   :  { %6500 = vmatpush3.msra.mxu1 %v8704_v4 }
 0xbca   :  { %6502 = vmatmul.mubr.msk.f32.vlgmr.msra.gmra.mxu1 %vm2463_vm12, %v8624_v25  ;;  %6507 = vmatprep.subr.mxu1 %v3128_v27  ;;  %v3122_v25 = vld [vmem:[#allocation13 + $0x38] sm:$0xff] }
 0xbcb   :  { %6508 = vmatpush3.msra.mxu1 %v3128_v27  ;;  %6504 = vmatprep.mubr.msk.f32.mxu1 %vm2463_vm12, %v8630_v53  ;;  %v3120_v53 = vld [vmem:[#allocation13 + $0x28] sm:$0xff] }
 0xbcc   :  { %6509 = vmatprep.subr.mxu1 %v3127_v59 }
 0xbcd   :  { %6510 = vmatpush3.msra.mxu1 %v3127_v59 }
 0xbce   :  { %6505 = vmatmul.mubr.msk.f32.gmra.mxu1 %vm2463_vm12, %v8640_v11  ;;  %6511 = vmatprep.subr.mxu1 %v3126_v28  ;;  %v3118_v11 = vld [vmem:[#allocation13 + $0x18] sm:$0xff] }
 0xbcf   :  { %6512 = vmatpush3.msra.mxu1 %v3126_v28 }
 0xbd0   :  { %6513 = vmatprep.subr.mxu1 %v3125_v60 }
 0xbd1   :  { %6514 = vmatpush3.msra.mxu1 %v3125_v60  ;;  %v3524_v60 = vld [vmem:[#allocation14 + $0x8] sm:$0x3f] }
 0xbd2   :  { %6515 = vmatprep.subr.mxu1 %v3124_v29 }
 0xbd3   :  { %6516 = vmatpush3.msra.mxu1 %v3124_v29  ;;  %v3624_v29 = vld [vmem:[#allocation14 + $0x10] sm:$0xff] }
 0xbd4   :  { %6517 = vmatprep.subr.mxu1 %v3123_v61 }
 0xbd5   :  { %6518 = vmatpush3.msra.mxu1 %v3123_v61  ;;  %v3625_v61 = vld [vmem:[#allocation14 + $0x18] sm:$0x3f] }
 0xbd6   :  { %6519 = vmatprep.subr.mxu1 %v3122_v25 }
 0xbd7   :  { %6520 = vmatpush3.msra.mxu1 %v3122_v25  ;;  %v3721_v25 = vld [vmem:[#allocation16 + $0xd8] sm:$0xff] }
 0xbd8   :  { %6521 = vmatprep.subr.mxu1 %v3121_v62 }
 0xbd9   :  { %6522 = vmatpush3.msra.mxu1 %v3121_v62  ;;  %v3720_v62 = vld [vmem:[#allocation16 + $0xd0] sm:$0xff] }
 0xbda   :  { %6523 = vmatprep.subr.mxu1 %v3120_v53 }
 0xbdb   :  { %6524 = vmatpush3.msra.mxu1 %v3120_v53  ;;  %v3719_v53 = vld [vmem:[#allocation16 + $0xc8] sm:$0xff] }
 0xbdc   :  { %6525 = vmatprep.subr.mxu1 %v3119_v30 }
 0xbdd   :  { %6526 = vmatpush3.msra.mxu1 %v3119_v30  ;;  %v3718_v30 = vld [vmem:[#allocation16 + $0xc0] sm:$0xff] }
 0xbde   :  { %6527 = vmatprep.subr.mxu1 %v3118_v11 }
 0xbdf   :  { %6528 = vmatpush3.msra.mxu1 %v3118_v11  ;;  %v3717_v11 = vld [vmem:[#allocation16 + $0xb8] sm:$0xff] }
 0xbe0   :  { %6529 = vmatprep.subr.mxu1 %v3117_v31 }
 0xbe1   :  { %6530 = vmatpush3.msra.mxu1 %v3117_v31  ;;  %v3716_v31 = vld [vmem:[#allocation16 + $0xb0] sm:$0xff] }
 0xbe2   :  { %6531 = vmatprep.subr.mxu1 %v3116_v32 }
 0xbe3   :  { %6532 = vmatpush3.msra.mxu1 %v3116_v32  ;;  %v3715_v32 = vld [vmem:[#allocation16 + $0xa8] sm:$0xff] }
 0xbe4   :  { %6533 = vmatprep.subr.mxu1 %v3115_v33 }
 0xbe5   :  { %6534 = vmatpush3.msra.mxu1 %v3115_v33  ;;  %v3714_v33 = vld [vmem:[#allocation16 + $0xa0] sm:$0xff] }
 0xbe6   :  { %6575 = vmatprep.subr.msk.mxu1 %vm351_vm1, %v8712_v6 }
 0xc81   :  { %v6571_v56 = vpop.f32.mrf.mxu0 }
 0xc83   :  { %v3303_v45 = vpop.f32.mrf.mxu0 }
 0xc85   :  { %v6574_v57 = vpop.f32.mrf.mxu0 }
 0xc87   :  { %v3313_v22 = vpop.f32.mrf.mxu0 }
 0xc8a   :  { %v6503_v34 = vpop.f32.mrf.mxu1 }
 0xc8c   :  { %v3096_v35 = vpop.f32.mrf.mxu1 }
 0xc8d   :  { %6535 = vmatprep.mubr.msk.f32.mxu1 %vm613_vm3, %v3096_v35  ;;  %v3712_v35 = vld [vmem:[#allocation16 + $0x90] sm:$0xff] }
 0xc8e   :  { %v6506_v37 = vpop.f32.mrf.mxu1  ;;  %6536 = vmatmul.mubr.msk.f32.vlgmr.msra.gmra.mxu1 %vm613_vm3, %v6503_v34  ;;  %v3713_v34 = vld [vmem:[#allocation16 + $0x98] sm:$0xff] }
 0xc8f   :  { %6576 = vmatpush3.msk.msra.mxu1 %vm351_vm1, %v8712_v6 }
 0xc90   :  { %6577 = vmatprep.subr.mxu1 %v3010_v58  ;;  %v3106_v38 = vpop.f32.mrf.mxu1 }
 0xc91   :  { %6578 = vmatpush3.msra.mxu1 %v3010_v58  ;;  %6538 = vmatprep.mubr.msk.f32.mxu1 %vm613_vm3, %v3106_v38  ;;  %v3710_v38 = vld [vmem:[#allocation16 + $0x80] sm:$0xff] }
 0xc92   :  { %6579 = vmatprep.subr.mxu1 %v8706_v24  ;;  %6539 = vmatmul.mubr.msk.f32.gmra.mxu1 %vm613_vm3, %v6506_v37  ;;  %v3711_v37 = vld [vmem:[#allocation16 + $0x88] sm:$0xff] }
 0xc93   :  { %6580 = vmatpush3.msra.mxu1 %v8706_v24  ;;  %6583 = vmatprep.mubr.msk.f32.mxu1 %vm2463_vm12, %v8662_v44  ;;  %v3417_v44 = vld [vmem:[#allocation13 + $0x128] sm:$0xff] }
 0xc94   :  { %6581 = vmatprep.subr.mxu1 %v8704_v4 }
 0xc95   :  { %6582 = vmatpush3.msra.mxu1 %v8704_v4 }
 0xc96   :  { %6584 = vmatmul.mubr.msk.f32.vlgmr.msra.gmra.mxu1 %vm2463_vm12, %v8674_v15  ;;  %6589 = vmatprep.subr.mxu1 %v3421_v39  ;;  %v3415_v15 = vld [vmem:[#allocation13 + $0x118] sm:$0xff] }
 0xc97   :  { %6586 = vmatprep.mubr.msk.f32.mxu1 %vm2463_vm12, %v8680_v42  ;;  %6590 = vmatpush3.msra.mxu1 %v3421_v39  ;;  %v3414_v42 = vld [vmem:[#allocation13 + $0x110] sm:$0xff]  ;;  %v3709_v39 = vld [vmem:[#allocation16 + $0x78] sm:$0xff] }
 0xc98   :  { %6591 = vmatprep.subr.mxu1 %v3420_v40 }
 0xc99   :  { %6592 = vmatpush3.msra.mxu1 %v3420_v40  ;;  %v3708_v40 = vld [vmem:[#allocation16 + $0x70] sm:$0xff] }
 0xc9a   :  { %6587 = vmatmul.mubr.msk.f32.gmra.mxu1 %vm2463_vm12, %v8690_v50  ;;  %6593 = vmatprep.subr.mxu1 %v3419_v36  ;;  %v3412_v50 = vld [vmem:[#allocation13 + $0x100] sm:$0xff] }
 0xc9b   :  { %6594 = vmatpush3.msra.mxu1 %v3419_v36  ;;  %v3613_v36 = vld [vmem:[#allocation16 + $0x20] sm:$0xff] }
 0xc9c   :  { %6595 = vmatprep.subr.mxu1 %v3418_v41 }
 0xc9d   :  { %6596 = vmatpush3.msra.mxu1 %v3418_v41  ;;  %v3612_v41 = vld [vmem:[#allocation16 + $0x18] sm:$0xff] }
 0xc9e   :  { %6597 = vmatprep.subr.mxu1 %v3417_v44 }
 0xc9f   :  { %6598 = vmatpush3.msra.mxu1 %v3417_v44  ;;  %v3611_v44 = vld [vmem:[#allocation16 + $0x10] sm:$0xff] }
 0xca0   :  { %6599 = vmatprep.subr.mxu1 %v3416_v49 }
 0xca1   :  { %6600 = vmatpush3.msra.mxu1 %v3416_v49  ;;  %v3610_v49 = vld [vmem:[#allocation16 + $0x8] sm:$0xff] }
 0xca2   :  { %6601 = vmatprep.subr.mxu1 %v3415_v15 }
 0xca3   :  { %6602 = vmatpush3.msra.mxu1 %v3415_v15  ;;  %v3609_v15 = vld [vmem:[#allocation16] sm:$0xff] }
 0xca4   :  { %6603 = vmatprep.subr.mxu1 %v3414_v42 }
 0xca5   :  { %6604 = vmatpush3.msra.mxu1 %v3414_v42  ;;  %v3982_v42 = vld [vmem:[#allocation16 + $0x148] sm:$0xff] }
 0xca6   :  { %6605 = vmatprep.subr.mxu1 %v3413_v21 }
 0xca7   :  { %6606 = vmatpush3.msra.mxu1 %v3413_v21 }
 0xca8   :  { %6607 = vmatprep.subr.mxu1 %v3412_v50 }
 0xca9   :  { %6608 = vmatpush3.msra.mxu1 %v3412_v50 }
 0xcaa   :  { %6609 = vmatprep.subr.mxu1 %v3411_v17 }
 0xcab   :  { %6610 = vmatpush3.msra.mxu1 %v3411_v17  ;;  %v3981_v17 = vld [vmem:[#allocation16 + $0x140] sm:$0xff] }
 0xcac   :  { %6611 = vmatprep.subr.mxu1 %v3410_v51 }
 0xcad   :  { %6612 = vmatpush3.msra.mxu1 %v3410_v51  ;;  %v3980_v51 = vld [vmem:[#allocation16 + $0x138] sm:$0xff] }
 0xcae   :  { %6613 = vmatprep.subr.mxu1 %v3409_v52 }
 0xcaf   :  { %6614 = vmatpush3.msra.mxu1 %v3409_v52  ;;  %v3979_v52 = vld [vmem:[#allocation16 + $0x130] sm:$0xff] }
 0xcb0   :  { %6615 = vmatprep.subr.mxu1 %v3408_v20 }
 0xcb1   :  { %6616 = vmatpush3.msra.mxu1 %v3408_v20 }
 0xcb2   :  { %6676 = vmatprep.subr.mxu1 %v3622_v9 }
 0xd4e   :  { %v6537_v26 = vpop.f32.mrf.mxu1 }
 0xd4f   :  { %v3309_v23 = vadd.f32 %v6571_v56, %v6537_v26  ;;  %v3978_v26 = vld [vmem:[#allocation16 + $0x128] sm:$0xff] }
 0xd50   :  { %v3207_v13 = vpop.f32.mrf.mxu1  ;;  %v4094_v56 = vld [vmem:[#allocation19 + $0xd0] sm:$0xff] }
 0xd51   :  { %v3304_v27 = vadd.f32 %v3303_v45, %v3207_v13  ;;  %v4093_v45 = vld [vmem:[#allocation19 + $0xc8] sm:$0xff] }
 0xd52   :  { %v6540_v46 = vpop.f32.mrf.mxu1 }
 0xd53   :  { %v3319_v10 = vadd.f32 %v6574_v57, %v6540_v46  ;;  %v3885_v46 = vld [vmem:[#allocation14 + $0x20] sm:$0xff] }
 0xd54   :  { %v3217_v47 = vpop.f32.mrf.mxu1  ;;  %v4092_v57 = vld [vmem:[#allocation19 + $0xc0] sm:$0xff] }
 0xd55   :  { %v3314_v24 = vadd.f32 %v3313_v22, %v3217_v47  ;;  %v3977_v47 = vld [vmem:[#allocation16 + $0x120] sm:$0xff]  ;;  %v4088_v22 = vld [vmem:[#allocation19 + $0xa0] sm:$0xff] }
 0xd56   :  { %v6585_v48 = vpop.f32.mrf.mxu1 }
 0xd58   :  { %v3388_v18 = vpop.f32.mrf.mxu1 }
 0xd59   :  { %6617 = vmatprep.mubr.msk.f32.mxu1 %vm613_vm3, %v3388_v18  ;;  %v3975_v18 = vld [vmem:[#allocation16 + $0x110] sm:$0xff] }
 0xd5a   :  { %v6588_v54 = vpop.f32.mrf.mxu1  ;;  %6618 = vmatmul.mubr.msk.f32.vlgmr.msra.gmra.mxu1 %vm613_vm3, %v6585_v48  ;;  %v3976_v48 = vld [vmem:[#allocation16 + $0x118] sm:$0xff] }
 0xd5b   :  { %6677 = vmatpush3.msra.mxu1 %v3622_v9  ;;  %v3972_v9 = vld [vmem:[#allocation16 + $0xf8] sm:$0xff] }
 0xd5c   :  { %v3398_v55 = vpop.f32.mrf.mxu1  ;;  %6678 = vmatprep.subr.mxu1 %v3621_v63 }
 0xd5d   :  { %6620 = vmatprep.mubr.msk.f32.mxu1 %vm613_vm3, %v3398_v55  ;;  %6679 = vmatpush3.msra.mxu1 %v3621_v63  ;;  %v3974_v55 = vld [vmem:[#allocation16 + $0x108] sm:$0xff]  ;;  %v3971_v63 = vld [vmem:[#allocation16 + $0xf0] sm:$0xff] }
 0xd5e   :  { %6621 = vmatmul.mubr.msk.f32.gmra.mxu1 %vm613_vm3, %v6588_v54  ;;  %6680 = vmatprep.subr.mxu1 %v3620_v14  ;;  %v3886_v54 = vld [vmem:[#allocation14 + $0x28] sm:$0x3f] }
 0xd5f   :  { %6681 = vmatpush3.msra.mxu1 %v3620_v14  ;;  %v3970_v14 = vld [vmem:[#allocation16 + $0xe8] sm:$0xff] }
 0xd60   :  { %6682 = vmatprep.subr.mxu1 %v3619_v7 }
 0xd61   :  { %6683 = vmatpush3.msra.mxu1 %v3619_v7  ;;  %v3969_v7 = vld [vmem:[#allocation16 + $0xe0] sm:$0xff] }
 0xd62   :  { %6684 = vmatprep.subr.mxu1 %v3618_v0 }
 0xd63   :  { %6685 = vmatpush3.msra.mxu1 %v3618_v0  ;;  %v4095_v0 = vld [vmem:[#allocation19 + $0xd8] sm:$0xff] }
 0xd64   :  { %6686 = vmatprep.subr.mxu1 %v3617_v3 }
 0xd65   :  { %6687 = vmatpush3.msra.mxu1 %v3617_v3 }
 0xd66   :  { %6688 = vmatprep.subr.mxu1 %v3616_v5 }
 0xd67   :  { %6689 = vmatpush3.msra.mxu1 %v3616_v5 }
 0xd68   :  { %6690 = vmatprep.subr.mxu1 %v3615_v8 }
 0xd69   :  { %6691 = vmatpush3.msra.mxu1 %v3615_v8 }
 0xd6a   :  { %6692 = vmatprep.subr.mxu1 %v3614_v12 }
 0xd6b   :  { %6693 = vmatpush3.msra.mxu1 %v3614_v12 }
 0xd6c   :  { %6694 = vmatprep.subr.mxu1 %v3613_v36 }
 0xd6d   :  { %6695 = vmatpush3.msra.mxu1 %v3613_v36  ;;  %v4194_v36 = vld [vmem:[#allocation19 + $0x50] sm:$0xff] }
 0xd6e   :  { %6696 = vmatprep.subr.mxu1 %v3612_v41 }
 0xd6f   :  { %6697 = vmatpush3.msra.mxu1 %v3612_v41  ;;  %v4193_v41 = vld [vmem:[#allocation19 + $0x48] sm:$0xff] }
 0xd70   :  { %6698 = vmatprep.subr.mxu1 %v3611_v44 }
 0xd71   :  { %6699 = vmatpush3.msra.mxu1 %v3611_v44  ;;  %v4192_v44 = vld [vmem:[#allocation19 + $0x40] sm:$0xff] }
 0xd72   :  { %6700 = vmatprep.subr.mxu1 %v3610_v49 }
 0xd73   :  { %6701 = vmatpush3.msra.mxu1 %v3610_v49  ;;  %v4191_v49 = vld [vmem:[#allocation19 + $0x38] sm:$0xff] }
 0xd74   :  { %6702 = vmatprep.subr.mxu1 %v3609_v15 }
 0xd75   :  { %6703 = vmatpush3.msra.mxu1 %v3609_v15  ;;  %v4190_v15 = vld [vmem:[#allocation19 + $0x30] sm:$0xff] }
 0xd76   :  { %6718 = vmatprep.subr.mxu1 %v3982_v42 }
 0xe1a   :  { %v6619_v43 = vpop.f32.mrf.mxu1 }
 0xe1b   :  { %v8764_v59 = vadd.f32 %v6619_v43, %v3309_v23  ;;  %v4091_v43 = vld [vmem:[#allocation19 + $0xb8] sm:$0xff] }
 0xe1c   :  { %v3500_v19 = vpop.f32.mrf.mxu1  ;;  %v4083_v23 = vld [vmem:[#allocation19 + $0x78] sm:$0xff] }
 0xe1d   :  { %v8768_v28 = vadd.f32 %v3500_v19, %v3304_v27  ;;  %v4090_v19 = vld [vmem:[#allocation19 + $0xb0] sm:$0xff] }
 0xe1e   :  { %v6622_v4 = vpop.f32.mrf.mxu1  ;;  %v4096_v27 = vld [vmem:[%s8918_s17] sm:$0xff] }
 0xe1f   :  { %v8756_v2 = vadd.f32 %v6622_v4, %v3319_v10  ;;  %v4089_v10 = vld [vmem:[#allocation19 + $0xa8] sm:$0xff]  ;;  %v4087_v4 = vld [vmem:[#allocation19 + $0x98] sm:$0xff] }
 0xe20   :  { %v3510_v6 = vpop.f32.mrf.mxu1 }
 0xe21   :  { %v8758_v58 = vadd.f32 %v3510_v6, %v3314_v24  ;;  %6623 = vmatprep.subr.msk.mxu0 %vm351_vm1, %v8756_v2  ;;  %v4086_v24 = vld [vmem:[#allocation19 + $0x90] sm:$0xff]  ;;  %v4084_v6 = vld [vmem:[#allocation19 + $0x80] sm:$0xff] }
 0xe22   :  { %6624 = vmatpush3.msk.msra.mxu0 %vm351_vm1, %v8756_v2 }
 0xe23   :  { %6625 = vmatprep.subr.mxu0 %v8758_v58 }
 0xe24   :  { %6626 = vmatpush3.msra.mxu0 %v8758_v58 }
 0xe25   :  { %6627 = vmatprep.subr.mxu0 %v8764_v59 }
 0xe26   :  { %6628 = vmatpush3.msra.mxu0 %v8764_v59 }
 0xe27   :  { %6629 = vmatprep.subr.mxu0 %v8768_v28 }
 0xe28   :  { %6630 = vmatpush3.msra.mxu0 %v8768_v28 }
 0xe29   :  { %6634 = vmatprep.subr.msk.mxu0 %vm351_vm1, %v8756_v2  ;;  %6632 = vmatmul.mubr.msk.f32.vlgmr.msra.gmra.mxu0 %vm2463_vm12, %v3524_v60 }
 0xe2a   :  { %6635 = vmatpush3.msk.msra.mxu0 %vm351_vm1, %v8756_v2  ;;  %6642 = vmatprep.mubr.msk.f32.mxu0 %vm2463_vm12, %v3624_v29 }
 0xe2b   :  { %6636 = vmatprep.subr.mxu0 %v8758_v58 }
 0xe2c   :  { %6637 = vmatpush3.msra.mxu0 %v8758_v58 }
 0xe2d   :  { %6638 = vmatprep.subr.mxu0 %v8764_v59 }
 0xe2e   :  { %6639 = vmatpush3.msra.mxu0 %v8764_v59 }
 0xe2f   :  { %6640 = vmatprep.subr.mxu0 %v8768_v28 }
 0xe30   :  { %6641 = vmatpush3.msra.mxu0 %v8768_v28 }
 0xe31   :  { %6643 = vmatmul.mubr.msk.f32.vlgmr.msra.gmra.mxu0 %vm2463_vm12, %v3625_v61  ;;  %6645 = vmatprep.subr.mxu0 %v3721_v25  ;;  %v5117_v61 = vld [vmem:[#allocation17] ss:$0 sm:$0xff] }
 0xe32   :  { %6646 = vmatpush3.msra.mxu0 %v3721_v25 }
 0xe33   :  { %6647 = vmatprep.subr.mxu0 %v3720_v62 }
 0xe34   :  { %6648 = vmatpush3.msra.mxu0 %v3720_v62 }
 0xe35   :  { %6649 = vmatprep.subr.mxu0 %v3719_v53 }
 0xe36   :  { %6650 = vmatpush3.msra.mxu0 %v3719_v53 }
 0xe37   :  { %6651 = vmatprep.subr.mxu0 %v3718_v30 }
 0xe38   :  { %6652 = vmatpush3.msra.mxu0 %v3718_v30 }
 0xe39   :  { %6653 = vmatprep.subr.mxu0 %v3717_v11 }
 0xe3a   :  { %6654 = vmatpush3.msra.mxu0 %v3717_v11 }
 0xe3b   :  { %6655 = vmatprep.subr.mxu0 %v3716_v31 }
 0xe3c   :  { %6656 = vmatpush3.msra.mxu0 %v3716_v31 }
 0xe3d   :  { %6657 = vmatprep.subr.mxu0 %v3715_v32 }
 0xe3e   :  { %6658 = vmatpush3.msra.mxu0 %v3715_v32 }
 0xe3f   :  { %6659 = vmatprep.subr.mxu0 %v3714_v33 }
 0xe40   :  { %6660 = vmatpush3.msra.mxu0 %v3714_v33 }
 0xe41   :  { %6661 = vmatprep.subr.mxu0 %v3713_v34 }
 0xe42   :  { %6662 = vmatpush3.msra.mxu0 %v3713_v34 }
 0xe43   :  { %6663 = vmatprep.subr.mxu0 %v3712_v35 }
 0xe44   :  { %6664 = vmatpush3.msra.mxu0 %v3712_v35 }
 0xe45   :  { %6665 = vmatprep.subr.mxu0 %v3711_v37 }
 0xe46   :  { %6666 = vmatpush3.msra.mxu0 %v3711_v37  ;;  %v4097_v37 = vld [vmem:[%s8918_s17 + $0x8] sm:$0x3f] }
 0xe47   :  { %6667 = vmatprep.subr.mxu0 %v3710_v38 }
 0xe48   :  { %6668 = vmatpush3.msra.mxu0 %v3710_v38  ;;  %v4197_v38 = vld [vmem:[#allocation19 + $0x68] sm:$0xff] }
 0xe49   :  { %6669 = vmatprep.subr.mxu0 %v3709_v39 }
 0xe4a   :  { %6670 = vmatpush3.msra.mxu0 %v3709_v39  ;;  %v4196_v39 = vld [vmem:[#allocation19 + $0x60] sm:$0xff] }
 0xe4b   :  { %6671 = vmatprep.subr.mxu0 %v3708_v40 }
 0xe4c   :  { %6672 = vmatpush3.msra.mxu0 %v3708_v40  ;;  %v4195_v40 = vld [vmem:[#allocation19 + $0x58] sm:$0xff] }
 0xe4d   :  { %6707 = vmatprep.subr.msk.mxu0 %vm351_vm1, %v8756_v2 }
 0xee9   :  { %v6633_v21 = vpop.f32.mrf.mxu0 }
 0xeeb   :  { %v3600_v50 = vpop.f32.mrf.mxu0 }
 0xeec   :  { %6704 = vmatprep.mubr.msk.f32.mxu1 %vm613_vm3, %v3600_v50  ;;  %v4187_v50 = vld [vmem:[#allocation19 + $0x18] sm:$0xff] }
 0xeed   :  { %6705 = vmatmul.mubr.msk.f32.vlgmr.msra.gmra.mxu1 %vm613_vm3, %v6633_v21  ;;  %v4188_v21 = vld [vmem:[#allocation19 + $0x20] sm:$0xff] }
 0xeee   :  { %6719 = vmatpush3.msra.mxu1 %v3982_v42  ;;  %v4189_v42 = vld [vmem:[#allocation19 + $0x28] sm:$0xff] }
 0xeef   :  { %6720 = vmatprep.subr.mxu1 %v3981_v17 }
 0xef0   :  { %6721 = vmatpush3.msra.mxu1 %v3981_v17  ;;  %v4186_v17 = vld [vmem:[#allocation19 + $0x10] sm:$0xff] }
 0xef1   :  { %v6644_v20 = vpop.f32.mrf.mxu0  ;;  %6722 = vmatprep.subr.mxu1 %v3980_v51 }
 0xef2   :  { %6723 = vmatpush3.msra.mxu1 %v3980_v51  ;;  %v4185_v51 = vld [vmem:[#allocation19 + $0x8] sm:$0xff] }
 0xef3   :  { %v3698_v13 = vpop.f32.mrf.mxu0  ;;  %6724 = vmatprep.subr.mxu1 %v3979_v52 }
 0xef4   :  { %6673 = vmatprep.mubr.msk.f32.mxu0 %vm613_vm3, %v3698_v13  ;;  %6725 = vmatpush3.msra.mxu1 %v3979_v52  ;;  %v4184_v52 = vld [vmem:[#allocation19] sm:$0xff] }
 0xef5   :  { %6674 = vmatmul.mubr.msk.f32.vlgmr.msra.gmra.mxu0 %vm613_vm3, %v6644_v20  ;;  %6726 = vmatprep.subr.mxu1 %v3978_v26  ;;  %v5125_v13 = vld [vmem:[%s8918_s17 + $0x10] sm:$0xff] }
 0xef6   :  { %6708 = vmatpush3.msk.msra.mxu0 %vm351_vm1, %v8756_v2  ;;  %6715 = vmatprep.mubr.msk.f32.mxu0 %vm2463_vm12, %v3885_v46  ;;  %v4085_v2 = vld [vmem:[#allocation19 + $0x88] sm:$0xff]  ;;  %vm4098_vm1 = vcmask 113664  }
 0xef7   :  { %6709 = vmatprep.subr.mxu0 %v8758_v58  ;;  %6727 = vmatpush3.msra.mxu1 %v3978_v26  ;;  %v5126_v46 = vld [vmem:[%s8918_s17 + $0x18] sm:$0x3f] }
 0xef8   :  { %6710 = vmatpush3.msra.mxu0 %v8758_v58  ;;  %6728 = vmatprep.subr.mxu1 %v3977_v47  ;;  %v4082_v58 = vld [vmem:[#allocation19 + $0x70] sm:$0xff] }
 0xef9   :  { %6711 = vmatprep.subr.mxu0 %v8764_v59  ;;  %6729 = vmatpush3.msra.mxu1 %v3977_v47  ;;  %v4457_v47 = vld [vmem:[#allocation19 + $0x148] sm:$0xff] }
 0xefa   :  { %6712 = vmatpush3.msra.mxu0 %v8764_v59  ;;  %6730 = vmatprep.subr.mxu1 %v3976_v48 }
 0xefb   :  { %6713 = vmatprep.subr.mxu0 %v8768_v28  ;;  %6731 = vmatpush3.msra.mxu1 %v3976_v48  ;;  %v4456_v48 = vld [vmem:[#allocation19 + $0x140] sm:$0xff] }
 0xefc   :  { %6714 = vmatpush3.msra.mxu0 %v8768_v28  ;;  %6732 = vmatprep.subr.mxu1 %v3975_v18 }
 0xefd   :  { %6716 = vmatmul.mubr.msk.f32.vlgmr.msra.gmra.mxu0 %vm2463_vm12, %v3886_v54  ;;  %6733 = vmatpush3.msra.mxu1 %v3975_v18  ;;  %v4455_v18 = vld [vmem:[#allocation19 + $0x138] sm:$0xff]  ;;  %v4454_v54 = vld [vmem:[#allocation19 + $0x130] sm:$0xff] }
 0xefe   :  { %6734 = vmatprep.subr.mxu1 %v3974_v55  ;;  %6753 = vmatprep.mubr.msk.f32.mxu0 %vm4098_vm1, %v4096_v27  ;;  %v4559_v27 = vld [vmem:[#allocation22 + $0x18] sm:$0xff] }
 0xeff   :  { %6735 = vmatpush3.msra.mxu1 %v3974_v55  ;;  %v4453_v55 = vld [vmem:[#allocation19 + $0x128] sm:$0xff] }
 0xf00   :  { %6736 = vmatprep.subr.mxu1 %v3973_v16 }
 0xf01   :  { %6737 = vmatpush3.msra.mxu1 %v3973_v16  ;;  %v4452_v16 = vld [vmem:[#allocation19 + $0x120] sm:$0xff] }
 0xf02   :  { %6738 = vmatprep.subr.mxu1 %v3972_v9 }
 0xf03   :  { %6739 = vmatpush3.msra.mxu1 %v3972_v9  ;;  %v4451_v9 = vld [vmem:[#allocation19 + $0x118] sm:$0xff] }
 0xf04   :  { %6740 = vmatprep.subr.mxu1 %v3971_v63 }
 0xf05   :  { %6741 = vmatpush3.msra.mxu1 %v3971_v63  ;;  %v4450_v63 = vld [vmem:[#allocation19 + $0x110] sm:$0xff] }
 0xf06   :  { %6742 = vmatprep.subr.mxu1 %v3970_v14 }
 0xf07   :  { %6743 = vmatpush3.msra.mxu1 %v3970_v14  ;;  %v4449_v14 = vld [vmem:[#allocation19 + $0x108] sm:$0xff] }
 0xf08   :  { %6744 = vmatprep.subr.mxu1 %v3969_v7 }
 0xf09   :  { %6745 = vmatpush3.msra.mxu1 %v3969_v7  ;;  %v4448_v7 = vld [vmem:[#allocation19 + $0x100] sm:$0xff] }
 0xf0a   :  { %6787 = vmatprep.subr.mxu1 %v4095_v0 }
 0xfad   :  { %v6706_v59 = vpop.f32.mrf.mxu1 }
 0xfaf   :  { %v3875_v28 = vpop.f32.mrf.mxu1 }
 0xfb5   :  { %v6675_v3 = vpop.f32.mrf.mxu0 }
 0xfb6   :  { %v3881_v60 = vadd.f32 %v6706_v59, %v6675_v3  ;;  %v4446_v3 = vld [vmem:[#allocation19 + $0xf0] sm:$0xff]  ;;  %v4558_v59 = vld [vmem:[#allocation22 + $0x10] sm:$0xff] }
 0xfb7   :  { %v3794_v5 = vpop.f32.mrf.mxu0 }
 0xfb8   :  { %v3876_v25 = vadd.f32 %v3875_v28, %v3794_v5  ;;  %v4445_v5 = vld [vmem:[#allocation19 + $0xe8] sm:$0xff]  ;;  %v4557_v28 = vld [vmem:[#allocation22 + $0x8] sm:$0xff] }
 0xfbd   :  { %v6717_v8 = vpop.f32.mrf.mxu0 }
 0xfbf   :  { %v3959_v12 = vpop.f32.mrf.mxu0 }
 0xfc0   :  { %6746 = vmatprep.mubr.msk.f32.mxu1 %vm613_vm3, %v3959_v12  ;;  %v4569_v12 = vld [vmem:[#allocation22 + $0x68] sm:$0xff] }
 0xfc1   :  { %6747 = vmatmul.mubr.msk.f32.vlgmr.msra.gmra.mxu1 %vm613_vm3, %v6717_v8  ;;  %v4444_v8 = vld [vmem:[#allocation19 + $0xe0] sm:$0xff] }
 0xfc2   :  { %6788 = vmatpush3.msra.mxu1 %v4095_v0  ;;  %v4447_v0 = vld [vmem:[#allocation19 + $0xf8] sm:$0xff] }
 0xfc3   :  { %6789 = vmatprep.subr.mxu1 %v4094_v56 }
 0xfc4   :  { %6790 = vmatpush3.msra.mxu1 %v4094_v56  ;;  %v4568_v56 = vld [vmem:[#allocation22 + $0x60] sm:$0xff] }
 0xfc5   :  { %6791 = vmatprep.subr.mxu1 %v4093_v45 }
 0xfc6   :  { %6792 = vmatpush3.msra.mxu1 %v4093_v45  ;;  %v4567_v45 = vld [vmem:[#allocation22 + $0x58] sm:$0xff] }
 0xfc7   :  { %6793 = vmatprep.subr.mxu1 %v4092_v57 }
 0xfc8   :  { %6794 = vmatpush3.msra.mxu1 %v4092_v57  ;;  %v4566_v57 = vld [vmem:[#allocation22 + $0x50] sm:$0xff] }
 0xfc9   :  { %6795 = vmatprep.subr.mxu1 %v4091_v43 }
 0xfca   :  { %6796 = vmatpush3.msra.mxu1 %v4091_v43  ;;  %v4565_v43 = vld [vmem:[#allocation22 + $0x48] sm:$0xff] }
 0xfcb   :  { %6797 = vmatprep.subr.mxu1 %v4090_v19 }
 0xfcc   :  { %6798 = vmatpush3.msra.mxu1 %v4090_v19  ;;  %v4564_v19 = vld [vmem:[#allocation22 + $0x40] sm:$0xff] }
 0xfcd   :  { %6799 = vmatprep.subr.mxu1 %v4089_v10 }
 0xfce   :  { %6800 = vmatpush3.msra.mxu1 %v4089_v10  ;;  %v4563_v10 = vld [vmem:[#allocation22 + $0x38] sm:$0xff] }
 0xfcf   :  { %6801 = vmatprep.subr.mxu1 %v4088_v22 }
 0xfd0   :  { %6802 = vmatpush3.msra.mxu1 %v4088_v22  ;;  %v4562_v22 = vld [vmem:[#allocation22 + $0x30] sm:$0xff] }
 0xfd1   :  { %6803 = vmatprep.subr.mxu1 %v4087_v4 }
 0xfd2   :  { %6804 = vmatpush3.msra.mxu1 %v4087_v4  ;;  %v4561_v4 = vld [vmem:[#allocation22 + $0x28] sm:$0xff] }
 0xfd3   :  { %6805 = vmatprep.subr.mxu1 %v4086_v24 }
 0xfd4   :  { %6806 = vmatpush3.msra.mxu1 %v4086_v24 }
 0xfd5   :  { %6807 = vmatprep.subr.mxu1 %v4085_v2 }
 0xfd6   :  { %6808 = vmatpush3.msra.mxu1 %v4085_v2 }
 0xfd7   :  { %6809 = vmatprep.subr.mxu1 %v4084_v6 }
 0xfd8   :  { %6810 = vmatpush3.msra.mxu1 %v4084_v6 }
 0xfd9   :  { %6811 = vmatprep.subr.mxu1 %v4083_v23 }
 0xfda   :  { %6812 = vmatpush3.msra.mxu1 %v4083_v23 }
 0xfdb   :  { %6813 = vmatprep.subr.mxu1 %v4082_v58 }
 0xfdc   :  { %6814 = vmatpush3.msra.mxu1 %v4082_v58  ;;  %v4560_v58 = vld [vmem:[#allocation22 + $0x20] sm:$0xff] }
 0xfdd   :  { %6856 = vmatprep.subr.mxu1 %v4569_v12 }
0x1081   :  { %v6748_v29 = vpop.f32.mrf.mxu1 }
0x1082   :  { %v4065_v62 = vadd.f32 %v6748_v29, %v3881_v60  ;;  %v4556_v60 = vld [vmem:[#allocation22] sm:$0xff] }
0x1083   :  { %v4055_v53 = vpop.f32.mrf.mxu1 }
0x1084   :  { %v4074_v30 = vadd.f32 %v5117_v61, %v4065_v62  ;;  %v4064_v11 = vadd.f32 %v4055_v53, %v3876_v25  ;;  %v5132_v53 = vld [vmem:[#allocation20] ss:$0 sm:$0xff] }
0x1086   :  { %vm4076_vm8 = vcmp.gt.f32.partialorder %v4074_v30, 0.0  ;;  %v4078_v31 = vmul.f32 0.2, %v4074_v30  ;;  %v4073_v32 = vadd.f32 %v5117_v61, %v4064_v11 }
0x1088   :  { %vm4075_vm10 = vcmp.gt.f32.partialorder %v4073_v32, 0.0  ;;  %v4077_v33 = vmul.f32 0.2, %v4073_v32  ;;  %v4080_v34 = vsel %vm4076_vm8, %v4074_v30, %v4078_v31 }
0x1089   :  { %6749 = vmatprep.subr.msk.mxu0 %vm4105_vm9, %v4080_v34 }
0x108a   :  { %6750 = vmatpush3.msk.msra.mxu0 %vm4105_vm9, %v4080_v34  ;;  %v4079_v35 = vsel %vm4075_vm10, %v4073_v32, %v4077_v33 }
0x108b   :  { %6751 = vmatprep.subr.mxu0 %v4079_v35  ;;  %6815 = vmatprep.mubr.msk.f32.mxu1 %vm613_vm3, %v4079_v35 }
0x108c   :  { %6752 = vmatpush3.msra.mxu0 %v4079_v35  ;;  %6816 = vmatmul.mubr.msk.f32.vlgmr.msra.gmra.mxu1 %vm613_vm3, %v4080_v34 }
0x108d   :  { %6754 = vmatmul.mubr.msk.f32.vlgmr.msra.gmra.mxu0 %vm4098_vm1, %v4097_v37  ;;  %6756 = vmatprep.subr.mxu0 %v4197_v38 }
0x108e   :  { %6757 = vmatpush3.msra.mxu0 %v4197_v38  ;;  %6857 = vmatpush3.msra.mxu1 %v4569_v12 }
0x108f   :  { %6758 = vmatprep.subr.mxu0 %v4196_v39  ;;  %6858 = vmatprep.subr.mxu1 %v4568_v56 }
0x1090   :  { %6759 = vmatpush3.msra.mxu0 %v4196_v39  ;;  %6859 = vmatpush3.msra.mxu1 %v4568_v56  ;;  %v5140_v56 = vld [vmem:[#allocation2] ss:$0 sm:$0xff] }
0x1091   :  { %6760 = vmatprep.subr.mxu0 %v4195_v40  ;;  %6860 = vmatprep.subr.mxu1 %v4567_v45 }
0x1092   :  { %6761 = vmatpush3.msra.mxu0 %v4195_v40  ;;  %6861 = vmatpush3.msra.mxu1 %v4567_v45  ;;  %v4652_v40 = vld [vmem:[#allocation23 + $0x8] sm:$0x3f] }
0x1093   :  { %6762 = vmatprep.subr.mxu0 %v4194_v36  ;;  %6862 = vmatprep.subr.mxu1 %v4566_v57 }
0x1094   :  { %6763 = vmatpush3.msra.mxu0 %v4194_v36  ;;  %6863 = vmatpush3.msra.mxu1 %v4566_v57 }
0x1095   :  { %6764 = vmatprep.subr.mxu0 %v4193_v41  ;;  %6864 = vmatprep.subr.mxu1 %v4565_v43 }
0x1096   :  { %6765 = vmatpush3.msra.mxu0 %v4193_v41  ;;  %6865 = vmatpush3.msra.mxu1 %v4565_v43  ;;  %v4651_v41 = vld [vmem:[#allocation23] sm:$0xff] }
0x1097   :  { %6766 = vmatprep.subr.mxu0 %v4192_v44  ;;  %6866 = vmatprep.subr.mxu1 %v4564_v19 }
0x1098   :  { %6767 = vmatpush3.msra.mxu0 %v4192_v44  ;;  %6867 = vmatpush3.msra.mxu1 %v4564_v19 }
0x1099   :  { %6768 = vmatprep.subr.mxu0 %v4191_v49  ;;  %6868 = vmatprep.subr.mxu1 %v4563_v10 }
0x109a   :  { %6769 = vmatpush3.msra.mxu0 %v4191_v49  ;;  %6869 = vmatpush3.msra.mxu1 %v4563_v10 }
0x109b   :  { %6770 = vmatprep.subr.mxu0 %v4190_v15  ;;  %6870 = vmatprep.subr.mxu1 %v4562_v22 }
0x109c   :  { %6771 = vmatpush3.msra.mxu0 %v4190_v15  ;;  %6871 = vmatpush3.msra.mxu1 %v4562_v22 }
0x109d   :  { %6772 = vmatprep.subr.mxu0 %v4189_v42  ;;  %6872 = vmatprep.subr.mxu1 %v4561_v4 }
0x109e   :  { %6773 = vmatpush3.msra.mxu0 %v4189_v42  ;;  %6873 = vmatpush3.msra.mxu1 %v4561_v4  ;;  %v4655_v42 = vld [vmem:[#allocation25] sm:$0x3] }
0x109f   :  { %6774 = vmatprep.subr.mxu0 %v4188_v21  ;;  %6874 = vmatprep.subr.mxu1 %v4560_v58 }
0x10a0   :  { %6775 = vmatpush3.msra.mxu0 %v4188_v21  ;;  %6875 = vmatpush3.msra.mxu1 %v4560_v58  ;;  %v4745_v21 = vld [vmem:[%s8923_s22 + $0x68] sm:$0xff] }
0x10a1   :  { %6776 = vmatprep.subr.mxu0 %v4187_v50  ;;  %6876 = vmatprep.subr.mxu1 %v4559_v27 }
0x10a2   :  { %6777 = vmatpush3.msra.mxu0 %v4187_v50  ;;  %6877 = vmatpush3.msra.mxu1 %v4559_v27  ;;  %v4744_v50 = vld [vmem:[%s8923_s22 + $0x60] sm:$0xff] }
0x10a3   :  { %6778 = vmatprep.subr.mxu0 %v4186_v17  ;;  %6878 = vmatprep.subr.mxu1 %v4558_v59 }
0x10a4   :  { %6779 = vmatpush3.msra.mxu0 %v4186_v17  ;;  %6879 = vmatpush3.msra.mxu1 %v4558_v59  ;;  %v4743_v17 = vld [vmem:[%s8923_s22 + $0x58] sm:$0xff] }
0x10a5   :  { %6780 = vmatprep.subr.mxu0 %v4185_v51  ;;  %6880 = vmatprep.subr.mxu1 %v4557_v28 }
0x10a6   :  { %6781 = vmatpush3.msra.mxu0 %v4185_v51  ;;  %6881 = vmatpush3.msra.mxu1 %v4557_v28  ;;  %v4742_v51 = vld [vmem:[%s8923_s22 + $0x50] sm:$0xff] }
0x10a7   :  { %6782 = vmatprep.subr.mxu0 %v4184_v52  ;;  %6882 = vmatprep.subr.mxu1 %v4556_v60 }
0x10a8   :  { %6783 = vmatpush3.msra.mxu0 %v4184_v52  ;;  %6883 = vmatpush3.msra.mxu1 %v4556_v60  ;;  %v4741_v52 = vld [vmem:[%s8923_s22 + $0x48] sm:$0xff] }
0x10a9   :  { %6818 = vmatprep.subr.msk.mxu0 %vm4105_vm9, %v4080_v34 }
0x114c   :  { %v6817_v29 = vpop.f32.mrf.mxu1 }
0x114d   :  { %v6755_v20 = vpop.f32.mrf.mxu0 }
0x114e   :  { %v4350_v25 = vpop.f32.mrf.mxu1 }
0x114f   :  { %v4175_v26 = vpop.f32.mrf.mxu0 }
0x1150   :  { %6784 = vmatprep.mubr.msk.f32.mxu0 %vm613_vm3, %v4175_v26  ;;  %v4739_v26 = vld [vmem:[%s8923_s22 + $0x38] sm:$0xff] }
0x1151   :  { %6785 = vmatmul.mubr.msk.f32.vlgmr.msra.gmra.mxu0 %vm613_vm3, %v6755_v20  ;;  %v4740_v20 = vld [vmem:[%s8923_s22 + $0x40] sm:$0xff] }
0x1152   :  { %6819 = vmatpush3.msk.msra.mxu0 %vm4105_vm9, %v4080_v34  ;;  %6822 = vmatprep.mubr.msk.f32.mxu0 %vm4098_vm1, %v5125_v13  ;;  %v4738_v13 = vld [vmem:[%s8923_s22 + $0x30] sm:$0xff] }
0x1153   :  { %6820 = vmatprep.subr.mxu0 %v4079_v35 }
0x1154   :  { %6821 = vmatpush3.msra.mxu0 %v4079_v35 }
0x1155   :  { %6823 = vmatmul.mubr.msk.f32.vlgmr.msra.gmra.mxu0 %vm4098_vm1, %v5126_v46  ;;  %6825 = vmatprep.subr.mxu0 %v4457_v47  ;;  %v4737_v46 = vld [vmem:[%s8923_s22 + $0x28] sm:$0xff] }
0x1156   :  { %6826 = vmatpush3.msra.mxu0 %v4457_v47  ;;  %v4736_v47 = vld [vmem:[%s8923_s22 + $0x20] sm:$0xff] }
0x1157   :  { %6827 = vmatprep.subr.mxu0 %v4456_v48 }
0x1158   :  { %6828 = vmatpush3.msra.mxu0 %v4456_v48  ;;  %v4735_v48 = vld [vmem:[%s8923_s22 + $0x18] sm:$0xff] }
0x1159   :  { %6829 = vmatprep.subr.mxu0 %v4455_v18 }
0x115a   :  { %6830 = vmatpush3.msra.mxu0 %v4455_v18  ;;  %v4734_v18 = vld [vmem:[%s8923_s22 + $0x10] sm:$0xff] }
0x115b   :  { %6831 = vmatprep.subr.mxu0 %v4454_v54 }
0x115c   :  { %6832 = vmatpush3.msra.mxu0 %v4454_v54  ;;  %v4733_v54 = vld [vmem:[%s8923_s22 + $0x8] sm:$0xff] }
0x115d   :  { %6833 = vmatprep.subr.mxu0 %v4453_v55 }
0x115e   :  { %6834 = vmatpush3.msra.mxu0 %v4453_v55  ;;  %v4732_v55 = vld [vmem:[%s8923_s22] sm:$0xff] }
0x115f   :  { %6835 = vmatprep.subr.mxu0 %v4452_v16 }
0x1160   :  { %6836 = vmatpush3.msra.mxu0 %v4452_v16 }
0x1161   :  { %6837 = vmatprep.subr.mxu0 %v4451_v9 }
0x1162   :  { %6838 = vmatpush3.msra.mxu0 %v4451_v9 }
0x1163   :  { %6839 = vmatprep.subr.mxu0 %v4450_v63 }
0x1164   :  { %6840 = vmatpush3.msra.mxu0 %v4450_v63  ;;  %v5137_v63 = vld [vmem:[#allocation26] ss:$0 sm:$0xff] }
0x1165   :  { %6841 = vmatprep.subr.mxu0 %v4449_v14 }
0x1166   :  { %6842 = vmatpush3.msra.mxu0 %v4449_v14 }
0x1167   :  { %6843 = vmatprep.subr.mxu0 %v4448_v7 }
0x1168   :  { %6844 = vmatpush3.msra.mxu0 %v4448_v7 }
0x1169   :  { %6845 = vmatprep.subr.mxu0 %v4447_v0 }
0x116a   :  { %6846 = vmatpush3.msra.mxu0 %v4447_v0 }
0x116b   :  { %6847 = vmatprep.subr.mxu0 %v4446_v3 }
0x116c   :  { %6848 = vmatpush3.msra.mxu0 %v4446_v3 }
0x116d   :  { %6849 = vmatprep.subr.mxu0 %v4445_v5 }
0x116e   :  { %6850 = vmatpush3.msra.mxu0 %v4445_v5  ;;  %v5139_v5 = vld [vmem:[#allocation28] ss:$0 sm:$0xff] }
0x116f   :  { %6851 = vmatprep.subr.mxu0 %v4444_v8 }
0x1170   :  { %6852 = vmatpush3.msra.mxu0 %v4444_v8 }
0x1171   :  { %6887 = vmatprep.subr.mxu0 %v7323_v1 }
0x1211   :  { %v6786_v24 = vpop.f32.mrf.mxu0 }
0x1212   :  { %v4356_v61 = vadd.f32 %v6817_v29, %v6786_v24 }
0x1213   :  { %v4270_v2 = vpop.f32.mrf.mxu0 }
0x1214   :  { %v4351_v30 = vadd.f32 %v4350_v25, %v4270_v2 }
0x1215   :  { %v6824_v6 = vpop.f32.mrf.mxu0 }
0x1217   :  { %v4434_v23 = vpop.f32.mrf.mxu0 }
0x1218   :  { %6853 = vmatprep.mubr.msk.f32.mxu0 %vm613_vm3, %v4434_v23 }
0x1219   :  { %6854 = vmatmul.mubr.msk.f32.vlgmr.msra.gmra.mxu0 %vm613_vm3, %v6824_v6 }
0x121a   :  { %6891 = vmatprep.mubr.msk.f32.mxu0 %vm7324_vm0, %v7323_v1 }
0x12d9   :  { %v6855_v62 = vpop.f32.mrf.mxu0 }
0x12da   :  { %v4540_v11 = vadd.f32 %v6855_v62, %v4356_v61 }
0x12db   :  { %v4530_v31 = vpop.f32.mrf.mxu0 }
0x12dc   :  { %v4549_v32 = vadd.f32 %v5132_v53, %v4540_v11  ;;  %v4539_v33 = vadd.f32 %v4530_v31, %v4351_v30 }
0x12de   :  { %v4548_v34 = vadd.f32 %v5132_v53, %v4539_v33  ;;  %v4553_v35 = vmul.f32 0.2, %v4549_v32  ;;  %vm4551_vm11 = vcmp.gt.f32.partialorder %v4549_v32, 0.0 }
0x12e0   :  { %v4552_v37 = vmul.f32 0.2, %v4548_v34  ;;  %vm4550_vm12 = vcmp.gt.f32.partialorder %v4548_v34, 0.0  ;;  %v4555_v39 = vsel %vm4551_vm11, %v4549_v32, %v4553_v35 }
0x12e2   :  { %v4554_v38 = vsel %vm4550_vm12, %v4548_v34, %v4552_v37 }
0x12e3   :  { %6884 = vmatprep.mubr.msk.f32.mxu1 %vm613_vm3, %v4554_v38 }
0x12e4   :  { %6885 = vmatmul.mubr.msk.f32.vlgmr.msra.gmra.mxu1 %vm613_vm3, %v4555_v39 }
0x13a4   :  { %v6886_v36 = vpop.f32.mrf.mxu1 }
0x13a5   :  { %v4654_v44 = vmul.f32 %v6886_v36, %v4652_v40 }
0x13a6   :  { %v4642_v49 = vpop.f32.mrf.mxu1 }
0x13a7   :  { %v4653_v15 = vmul.f32 %v4651_v41, %v4642_v49  ;;  %6888 = vmatpush3.msk.msra.mxu0 %vm4105_vm9, %v4654_v44 }
0x13a8   :  { %6889 = vmatprep.subr.mxu0 %v7323_v1 }
0x13a9   :  { %6890 = vmatpush3.msra.mxu0 %v4653_v15 }
0x13aa   :  { %6892 = vmatmul.mubr.msk.f32.vlgmr.msra.gmra.mxu0 %vm4098_vm1, %v4655_v42  ;;  %6894 = vmatprep.subr.mxu0 %v7323_v1 }
0x13ab   :  { %6895 = vmatpush3.msra.mxu0 %v4745_v21  ;;  %6922 = vmatprep.mubr.msk.f32.mxu0 %vm7324_vm0, %v7323_v1 }
0x13ac   :  { %6896 = vmatprep.subr.mxu0 %v7323_v1 }
0x13ad   :  { %6897 = vmatpush3.msra.mxu0 %v4744_v50 }
0x13ae   :  { %6898 = vmatprep.subr.mxu0 %v7323_v1 }
0x13af   :  { %6899 = vmatpush3.msra.mxu0 %v4743_v17 }
0x13b0   :  { %6900 = vmatprep.subr.mxu0 %v7323_v1 }
0x13b1   :  { %6901 = vmatpush3.msra.mxu0 %v4742_v51 }
0x13b2   :  { %6902 = vmatprep.subr.mxu0 %v7323_v1 }
0x13b3   :  { %6903 = vmatpush3.msra.mxu0 %v4741_v52 }
0x13b4   :  { %6904 = vmatprep.subr.mxu0 %v7323_v1 }
0x13b5   :  { %6905 = vmatpush3.msra.mxu0 %v4740_v20 }
0x13b6   :  { %6906 = vmatprep.subr.mxu0 %v7323_v1 }
0x13b7   :  { %6907 = vmatpush3.msra.mxu0 %v4739_v26 }
0x13b8   :  { %6908 = vmatprep.subr.mxu0 %v7323_v1 }
0x13b9   :  { %6909 = vmatpush3.msra.mxu0 %v4738_v13 }
0x13ba   :  { %6910 = vmatprep.subr.mxu0 %v7323_v1 }
0x13bb   :  { %6911 = vmatpush3.msra.mxu0 %v4737_v46 }
0x13bc   :  { %6912 = vmatprep.subr.mxu0 %v7323_v1 }
0x13bd   :  { %6913 = vmatpush3.msra.mxu0 %v4736_v47 }
0x13be   :  { %6914 = vmatprep.subr.mxu0 %v7323_v1 }
0x13bf   :  { %6915 = vmatpush3.msra.mxu0 %v4735_v48 }
0x13c0   :  { %6916 = vmatprep.subr.mxu0 %v7323_v1 }
0x13c1   :  { %6917 = vmatpush3.msra.mxu0 %v4734_v18 }
0x13c2   :  { %6918 = vmatprep.subr.mxu0 %v7323_v1 }
0x13c3   :  { %6919 = vmatpush3.msra.mxu0 %v4733_v54 }
0x13c4   :  { %6920 = vmatprep.subr.mxu0 %v7323_v1 }
0x13c5   :  { %6921 = vmatpush3.msra.mxu0 %v4732_v55 }
0x146a   :  { %v4728_v16 = vpop.f32.mrf.mxu0 }
0x146b   :  { %6923 = vmatmul.mubr.msk.f32.vlgmr.msra.gmra.mxu0 %vm613_vm3, %v4728_v16 }
0x146c   :  { %v6893_v9 = vpop.f32.mrf.mxu0 }
0x152b   :  { %v4822_v14 = vpop.f32.mrf.mxu0 }
0x152c   :  { %v4823_v7 = vadd.f32 %v5137_v63, %v4822_v14 }
0x152d   :  { %v6924_v0 = vpop.f32.mrf.mxu0 }
0x152e   :  { %v4827_v3 = vmul.f32 0.2, %v4823_v7  ;;  %vm4826_vm0 = vcmp.gt.f32.partialorder %v4823_v7, 0.0 }
0x1530   :  { %v4828_v8 = vsel %vm4826_vm0, %v4823_v7, %v4827_v3 }
0x1531   :  { %v4836_v12 = vmul.f32 %v5139_v5, %v4828_v8 }
0x1533   :  { %v4838_v1 = vsel %vm4837_vm13, %v4836_v12, 0.0 }
0x1534   :  { %4839 = vadd.xlane.f32.xlu0 %v4838_v1 }
0x15bd   :  { %v4840_v45 = vpop.xlane.xlu0 %4839 }
0x15be   :  { %v4848_v57 = vadd.f32 %v5140_v56, %v4840_v45 }
0x15c0   :  { %4850 = vst.msk [vmem:[%s8928_s27] sm:$0x3] %vm4849_vm14, %v4848_v57 }
0x15c1   :  { %4855 = vsyncpa [#allocation4], 1 }
0x15c2   :  { %4856 = vsyncpa [#allocation6], 1 }
0x15c3   :  { %4857 = vsyncpa [#allocation9], 1 }
0x15c4   :  { %4858 = vsyncpa [#allocation12], 1 }
0x15c5   :  { %4859 = vsyncpa [#allocation15], 1 }
0x15c6   :  { %4860 = vsyncpa [#allocation18], 1 }
0x15c7   :  { %4861 = vsyncpa [#allocation21], 1 }
0x15c8   :  { %4862 = vsyncpa [#allocation24], 1 }
0x15c9   :  { %4863 = vsyncpa [#allocation27], 1 }

</bundles_post_ra>
